<compile_context>
chip_gen: v5e
topology: v5e:2x2
jax: 0.10.0
libtpu: 0.0.40
codegen_flags: <defaults>
</compile_context>

<pallas_src>
import functools

import jax
import jax.numpy as jnp
from jax.experimental import pallas as pl
from jax.experimental.pallas import tpu as pltpu

LN_EPS = 1e-5          # torch.nn.LayerNorm default eps
SOFTMAX_EPS = 1e-7     # scatter_softmax eps
NEG_BIG = -1e30
VMEM_LIMIT = 48 * 1024 * 1024   # safe on v5e/v6e (128 MiB) and v7x (64 MiB)


def _round_up(x, m):
    return ((x + m - 1) // m) * m


def _gelu(x):
    # torch.nn.GELU() default (erf-based, approximate='none')
    return 0.5 * x * (1.0 + jax.lax.erf(x * (2.0 ** -0.5)))


def _layernorm(x, g, b):
    mu = jnp.mean(x, axis=-1, keepdims=True)
    var = jnp.mean(jnp.square(x - mu), axis=-1, keepdims=True)
    return (x - mu) * jax.lax.rsqrt(var + LN_EPS) * g + b


def _bf16(w):
    return w.astype(jnp.bfloat16)


def _row(v):
    return v.reshape(1, -1).astype(jnp.float32)


def _full(a):
    return pl.BlockSpec(a.shape, lambda i, _n=a.ndim: (0,) * _n)


def _full_pf(a):
    # full-array spec for a PrefetchScalarGridSpec kernel (1 prefetch operand)
    return pl.BlockSpec(a.shape, lambda w, meta, _n=a.ndim: (0,) * _n)


# ----------------------------------------------------------------------------
# Kernel A: fused node projections  q | v_src | v_tgt | pool_k | pool_v
# ----------------------------------------------------------------------------
def _proj_kernel(x_ref, wq_ref, bq_ref, wvs_ref, wvt_ref, wpk_ref, bpk_ref,
                 wpv_ref, bpv_ref, q_ref, vs_ref, vt_ref, pk_ref, pv_ref):
    x16 = x_ref[...].astype(jnp.bfloat16)
    q_ref[...] = (jnp.dot(x16, wq_ref[...], preferred_element_type=jnp.float32)
                  + bq_ref[...]).astype(jnp.bfloat16)
    vs_ref[...] = jnp.dot(x16, wvs_ref[...],
                          preferred_element_type=jnp.float32).astype(jnp.bfloat16)
    vt_ref[...] = jnp.dot(x16, wvt_ref[...],
                          preferred_element_type=jnp.float32).astype(jnp.bfloat16)
    pk_ref[...] = jnp.dot(x16, wpk_ref[...],
                          preferred_element_type=jnp.float32) + bpk_ref[...]
    pv_ref[...] = jnp.dot(x16, wpv_ref[...],
                          preferred_element_type=jnp.float32) + bpv_ref[...]


def pallas_node_proj(x, p, bm):
    lp, d = x.shape
    weights = [_bf16(p['attn_q_w']), _row(p['attn_q_b']),
               _bf16(p['attn_v_w'][:d]), _bf16(p['attn_v_w'][2 * d:]),
               _bf16(p['pool_k_w']), _row(p['pool_k_b']),
               _bf16(p['pool_v_w']), _row(p['pool_v_b'])]
    row = pl.BlockSpec((bm, d), lambda i: (i, 0))
    return pl.pallas_call(
        _proj_kernel,
        out_shape=(jax.ShapeDtypeStruct((lp, d), jnp.bfloat16),   # q
                   jax.ShapeDtypeStruct((lp, d), jnp.bfloat16),   # v_src
                   jax.ShapeDtypeStruct((lp, d), jnp.bfloat16),   # v_tgt
                   jax.ShapeDtypeStruct((lp, d), jnp.float32),    # pool_k
                   jax.ShapeDtypeStruct((lp, d), jnp.float32)),   # pool_v
        grid=(lp // bm,),
        in_specs=[row] + [_full(w) for w in weights],
        out_specs=(row, row, row, row, row),
        compiler_params=pltpu.CompilerParams(
            dimension_semantics=("parallel",), vmem_limit_bytes=VMEM_LIMIT),
    )(x, *weights)


# ----------------------------------------------------------------------------
# Kernel B: GraphAttentionUpdate core (work-list driven segment attention)
#   meta[0,w]=node tile, meta[1,w]=edge block, meta[2,w]=first-of-tile,
#   meta[3,w]=last-of-tile, meta[4,w]=valid
# ----------------------------------------------------------------------------
def _edge_attn_kernel(meta_ref, tgt_ref, q_ref, fe_ref, vn_ref,
                      wk_ref, bk_ref, wve_ref, bv_ref,
                      o_ref, m_sc, l_sc, *, scale, n_heads):
    w = pl.program_id(0)
    tl, d = q_ref.shape
    dh = d // n_heads

    @pl.when(meta_ref[2, w] == 1)            # first work item of this node tile
    def _():
        m_sc[...] = jnp.full_like(m_sc, NEG_BIG)
        l_sc[...] = jnp.zeros_like(l_sc)
        o_ref[...] = jnp.zeros_like(o_ref)

    @pl.when(meta_ref[4, w] == 1)            # valid (non-padding) work item
    def _():
        te = fe_ref.shape[0]
        fe16 = fe_ref[...]                                            # bf16 [te, D]
        k = (jnp.dot(fe16, wk_ref[...], preferred_element_type=jnp.float32)
             + bk_ref[...])
        v = (vn_ref[...].astype(jnp.float32)
             + jnp.dot(fe16, wve_ref[...], preferred_element_type=jnp.float32)
             + bv_ref[...])
        k16 = k.astype(jnp.bfloat16)
        v16 = v.astype(jnp.bfloat16)
        q16 = q_ref[...]                                              # bf16 [tl, D]

        base = meta_ref[0, w] * tl
        local = tgt_ref[...] - base                                   # [1, te] int32
        rows = jax.lax.broadcasted_iota(jnp.int32, (tl, te), 0)
        pmask = local == rows                                         # [tl, te]
        pmaskf = pmask.astype(jnp.float32)

        for h in range(n_heads):
            sl = slice(h * dh, (h + 1) * dh)
            s = jax.lax.dot_general(
                q16[:, sl], k16[:, sl], (((1,), (1,)), ((), ())),
                preferred_element_type=jnp.float32) * scale           # [tl, te]
            s = jnp.where(pmask, s, NEG_BIG)
            m_old = m_sc[:, h:h + 1]
            m_new = jnp.maximum(m_old, jnp.max(s, axis=1, keepdims=True))
            alpha = jnp.exp(m_old - m_new)
            prob = jnp.exp(s - m_new) * pmaskf                        # exact per-node softmax
            l_sc[:, h:h + 1] = (l_sc[:, h:h + 1] * alpha
                                + jnp.sum(prob, axis=1, keepdims=True))
            o_ref[:, sl] = (o_ref[:, sl] * alpha
                            + jnp.dot(prob.astype(jnp.bfloat16), v16[:, sl],
                                      preferred_element_type=jnp.float32))
            m_sc[:, h:h + 1] = m_new

    @pl.when(meta_ref[3, w] == 1)            # last work item: normalize in place
    def _():
        for h in range(n_heads):
            sl = slice(h * dh, (h + 1) * dh)
            inv = pl.reciprocal(l_sc[:, h:h + 1] + SOFTMAX_EPS, approx=True)
            o_ref[:, sl] = o_ref[:, sl] * inv


def pallas_edge_attention(meta, tgt2d, q, f_edge_s, v_node_s, p, scale,
                          n_heads, tl, te, lp, d):
    # TODO(synk): split the work list over v7x's two TensorCores (core_map /
    # leading parallel axis) instead of one sequential "arbitrary" grid.
    n_work = meta.shape[1]
    weights = [_bf16(p['attn_k_w']), _row(p['attn_k_b']),
               _bf16(p['attn_v_w'][d:2 * d]), _row(p['attn_v_b'])]
    grid_spec = pltpu.PrefetchScalarGridSpec(
        num_scalar_prefetch=1,
        grid=(n_work,),
        in_specs=[pl.BlockSpec((1, te), lambda w, m: (m[1, w], 0)),   # sorted targets
                  pl.BlockSpec((tl, d), lambda w, m: (m[0, w], 0)),   # q (node tile)
                  pl.BlockSpec((te, d), lambda w, m: (m[1, w], 0)),   # f_edge sorted
                  pl.BlockSpec((te, d), lambda w, m: (m[1, w], 0))]   # node value part
                 + [_full_pf(a) for a in weights],
        out_specs=pl.BlockSpec((tl, d), lambda w, m: (m[0, w], 0)),
        scratch_shapes=[pltpu.VMEM((tl, n_heads), jnp.float32),       # running max
                        pltpu.VMEM((tl, n_heads), jnp.float32)],      # running denom
    )
    return pl.pallas_call(
        functools.partial(_edge_attn_kernel, scale=scale, n_heads=n_heads),
        grid_spec=grid_spec,
        out_shape=jax.ShapeDtypeStruct((lp, d), jnp.float32),
        compiler_params=pltpu.CompilerParams(
            dimension_semantics=("arbitrary",), vmem_limit_bytes=VMEM_LIMIT),
    )(meta, tgt2d, q, f_edge_s, v_node_s, *weights)


# ----------------------------------------------------------------------------
# Kernel C: AttnGraphPooling (streamed over node tiles, in-kernel one-hot)
# ----------------------------------------------------------------------------
def _pool_kernel(gid_ref, pk_ref, pv_ref, lng_ref, lnb_ref,
                 o_ref, m_sc, s_sc, *, n_real):
    t = pl.program_id(0)
    tl = pk_ref.shape[0]
    g = o_ref.shape[0]

    @pl.when(t == 0)
    def _():
        m_sc[...] = jnp.full_like(m_sc, NEG_BIG)
        s_sc[...] = jnp.zeros_like(s_sc)
        o_ref[...] = jnp.zeros_like(o_ref)

    gid = gid_ref[...]                                                # [1, tl] int32
    oh16 = (gid == jax.lax.broadcasted_iota(jnp.int32, (g, tl), 0)
            ).astype(jnp.bfloat16)                                    # [G, tl]
    rows = jax.lax.broadcasted_iota(jnp.int32, (tl, 1), 0) + t * tl
    rvalid = rows < n_real                                            # mask padded rows
    pk = jnp.where(rvalid, pk_ref[...], NEG_BIG)
    m_old = m_sc[...]
    # TODO(synk): running per-feature global max (not exact per-graph max);
    # exact parity with torch scatter_softmax needs a per-graph max pass.
    m_new = jnp.maximum(m_old, jnp.max(pk, axis=0, keepdims=True))
    alpha = jnp.exp(m_old - m_new)
    ex = jnp.exp(pk - m_new) * rvalid.astype(jnp.float32)             # [tl, D]
    s_sc[...] = s_sc[...] * alpha + jnp.dot(
        oh16, ex.astype(jnp.bfloat16), preferred_element_type=jnp.float32)
    o_ref[...] = o_ref[...] * alpha + jnp.dot(
        oh16, (pv_ref[...] * ex).astype(jnp.bfloat16),
        preferred_element_type=jnp.float32)
    m_sc[...] = m_new

    @pl.when(t == pl.num_programs(0) - 1)
    def _():
        fg = o_ref[...] * pl.reciprocal(s_sc[...] + SOFTMAX_EPS, approx=True)
        o_ref[...] = _layernorm(fg, lng_ref[...], lnb_ref[...])


def pallas_graph_pooling(gid2d, pk, pv, p, g, tl, n_real):
    lp, d = pk.shape
    lng, lnb = _row(p['pool_ln_g']), _row(p['pool_ln_b'])
    return pl.pallas_call(
        functools.partial(_pool_kernel, n_real=n_real),
        out_shape=jax.ShapeDtypeStruct((g, d), jnp.float32),
        grid=(lp // tl,),
        in_specs=[pl.BlockSpec((1, tl), lambda i: (i, 0)),
                  pl.BlockSpec((tl, d), lambda i: (i, 0)),
                  pl.BlockSpec((tl, d), lambda i: (i, 0)),
                  _full(lng), _full(lnb)],
        out_specs=pl.BlockSpec((g, d), lambda i: (0, 0)),
        scratch_shapes=[pltpu.VMEM((1, d), jnp.float32),
                        pltpu.VMEM((g, d), jnp.float32)],
        compiler_params=pltpu.CompilerParams(
            dimension_semantics=("arbitrary",), vmem_limit_bytes=VMEM_LIMIT),
    )(gid2d, pk, pv, lng, lnb)


# ----------------------------------------------------------------------------
# Kernel D: attn out-proj+LN, graph_update (LinearUpdate), KernelSelection, FFN
# ----------------------------------------------------------------------------
def _tail_kernel(agg_ref, fn_ref, fg_ref,
                 wo_ref, bo_ref, alng_ref, alnb_ref,
                 guwn_ref, guwg_ref, gub_ref, gulng_ref, gulnb_ref,
                 nfg_ref, nfb_ref, sqw_ref, sqb_ref,
                 exw0_ref, exb0_ref, exw1_ref, exb1_ref, nug_ref, nub_ref,
                 wv_ref, wg_ref, w2_ref, ffg_ref, ffb_ref, o_ref):
    fn = fn_ref[...]

    # GraphAttentionUpdate epilogue: out-projection + LayerNorm (moved from B)
    f_in = _layernorm(
        jnp.dot(agg_ref[...].astype(jnp.bfloat16), wo_ref[...],
                preferred_element_type=jnp.float32) + bo_ref[...],
        alng_ref[...], alnb_ref[...])

    # LinearUpdate(2D -> D), residual=False; concat avoided by splitting gu_w
    g_lin = (jnp.dot(fn.astype(jnp.bfloat16), guwn_ref[...],
                     preferred_element_type=jnp.float32)
             + jnp.dot(fg_ref[...].astype(jnp.bfloat16), guwg_ref[...],
                       preferred_element_type=jnp.float32)
             + gub_ref[...])
    fng = _layernorm(_gelu(g_lin), gulng_ref[...], gulnb_ref[...])

    # KernelSelection (n_fea = 2)
    un = _layernorm(f_in + fng, nfg_ref[...], nfb_ref[...])
    sq = _gelu(jnp.dot(un.astype(jnp.bfloat16), sqw_ref[...],
                       preferred_element_type=jnp.float32) + sqb_ref[...])
    sq16 = sq.astype(jnp.bfloat16)
    a0 = jnp.dot(sq16, exw0_ref[...], preferred_element_type=jnp.float32) + exb0_ref[...]
    a1 = jnp.dot(sq16, exw1_ref[...], preferred_element_type=jnp.float32) + exb1_ref[...]
    mx = jnp.maximum(a0, a1)
    e0 = jnp.exp(a0 - mx)
    e1 = jnp.exp(a1 - mx)
    inv_z = pl.reciprocal(e0 + e1, approx=True)
    f_sk = _layernorm(fn + f_in * (e0 * inv_z) + fng * (e1 * inv_z),
                      nug_ref[...], nub_ref[...])

    # PositionwiseFeedForward: GLU + ff2 + add & norm
    sk16 = f_sk.astype(jnp.bfloat16)
    value = jnp.dot(sk16, wv_ref[...], preferred_element_type=jnp.float32)
    gate = jnp.dot(sk16, wg_ref[...], preferred_element_type=jnp.float32)
    glu = (_gelu(gate) * value).astype(jnp.bfloat16)
    f_upd = jnp.dot(glu, w2_ref[...], preferred_element_type=jnp.float32)
    o_ref[...] = _layernorm(f_sk + f_upd, ffg_ref[...], ffb_ref[...])


def pallas_node_tail(agg, f_node, f_graph_g, p, bm):
    lp, d = f_node.shape
    # pad KernelSelection squeeze width to a multiple of 128 (zero columns /
    # zero excitation rows -> exact same math, lane-aligned matmuls)
    dsq = p['sk_sq_w'].shape[1]
    pad = _round_up(max(dsq, 1), 128) - dsq
    sq_w = jnp.pad(p['sk_sq_w'], ((0, 0), (0, pad)))
    sq_b = jnp.pad(p['sk_sq_b'], ((0, pad),))
    ex_w = jnp.pad(p['sk_ex_w'], ((0, pad), (0, 0)))

    weights = [
        _bf16(p['attn_o_w']), _row(p['attn_o_b']),
        _row(p['attn_ln_g']), _row(p['attn_ln_b']),
        _bf16(p['gu_w'][:d]), _bf16(p['gu_w'][d:]), _row(p['gu_b']),
        _row(p['gu_ln_g']), _row(p['gu_ln_b']),
        _row(p['sk_nf_g']), _row(p['sk_nf_b']),
        _bf16(sq_w), _row(sq_b),
        _bf16(ex_w[:, :d]), _row(p['sk_ex_b'][:d]),
        _bf16(ex_w[:, d:]), _row(p['sk_ex_b'][d:]),
        _row(p['sk_nu_g']), _row(p['sk_nu_b']),
        _bf16(p['ff1_wv']), _bf16(p['ff1_wg']), _bf16(p['ff2_w']),
        _row(p['ff_ln_g']), _row(p['ff_ln_b']),
    ]
    row = pl.BlockSpec((bm, d), lambda i: (i, 0))
    return pl.pallas_call(
        _tail_kernel,
        out_shape=jax.ShapeDtypeStruct((lp, d), jnp.float32),
        grid=(lp // bm,),
        in_specs=[row, row, row] + [_full(w) for w in weights],
        out_specs=row,
        compiler_params=pltpu.CompilerParams(
            dimension_semantics=("parallel",), vmem_limit_bytes=VMEM_LIMIT),
    )(agg, f_node, f_graph_g, *weights)


# ----------------------------------------------------------------------------
# Parameter init (deterministic, torch.nn.Linear-style uniform init)
# ----------------------------------------------------------------------------
def init_params(key, d_model):
    D = d_model

    def linear(k, din, dout, bias=True):
        kw, kb = jax.random.split(k)
        bound = 1.0 / (din ** 0.5)
        w = jax.random.uniform(kw, (din, dout), jnp.float32, -bound, bound)
        b = (jax.random.uniform(kb, (dout,), jnp.float32, -bound, bound)
             if bias else None)
        return w, b

    ks = jax.random.split(key, 12)
    p = {}
    # GraphAttentionUpdate(d_model, kdim=D, vdim=3D)
    p['attn_q_w'], p['attn_q_b'] = linear(ks[0], D, D)
    p['attn_k_w'], p['attn_k_b'] = linear(ks[1], D, D)
    p['attn_v_w'], p['attn_v_b'] = linear(ks[2], 3 * D, D)
    p['attn_o_w'], p['attn_o_b'] = linear(ks[3], D, D)
    p['attn_ln_g'], p['attn_ln_b'] = jnp.ones((D,)), jnp.zeros((D,))
    # AttnGraphPooling(d_model)
    p['pool_k_w'], p['pool_k_b'] = linear(ks[4], D, D)
    p['pool_v_w'], p['pool_v_b'] = linear(ks[5], D, D)
    p['pool_ln_g'], p['pool_ln_b'] = jnp.ones((D,)), jnp.zeros((D,))
    # LinearUpdate(2D, D) -> residual=False
    p['gu_w'], p['gu_b'] = linear(ks[6], 2 * D, D)
    p['gu_ln_g'], p['gu_ln_b'] = jnp.ones((D,)), jnp.zeros((D,))
    # KernelSelection(D, n_fea=2, sk_ratio=4)
    p['sk_nf_g'], p['sk_nf_b'] = jnp.ones((D,)), jnp.zeros((D,))
    p['sk_sq_w'], p['sk_sq_b'] = linear(ks[7], D, D // 4)
    p['sk_ex_w'], p['sk_ex_b'] = linear(ks[8], D // 4, 2 * D)
    p['sk_nu_g'], p['sk_nu_b'] = jnp.ones((D,)), jnp.zeros((D,))
    # PositionwiseFeedForward(D): d_ff = 2D, GLU(d, 2*d_ff) + ff2(d_ff, D)
    d_ff = 2 * D
    w_ff1, _ = linear(ks[9], D, 2 * d_ff, bias=False)
    p['ff1_wv'] = w_ff1[:, :d_ff]   # value half of torch.chunk
    p['ff1_wg'] = w_ff1[:, d_ff:]   # gate half
    p['ff2_w'], _ = linear(ks[10], d_ff, D, bias=False)
    p['ff_ln_g'], p['ff_ln_b'] = jnp.ones((D,)), jnp.zeros((D,))
    return p


# ----------------------------------------------------------------------------
# NodeUpdate forward (eval mode)
# ----------------------------------------------------------------------------
def node_update_forward(p, f_node, f_edge, edge_index, graph_id,
                        n_heads, n_graphs):
    L, D = f_node.shape
    E = f_edge.shape[0]
    G = n_graphs
    dh = D // n_heads
    scale = float(dh) ** -0.5

    tl = min(256, _round_up(L, 8))      # node row tile (kernels A/B/C/D)
    Lp = _round_up(L, tl)
    Lt = Lp // tl
    te = min(256, _round_up(E, 8))      # edge block
    Ep = _round_up(E, te)
    Eb = Ep // te

    tgt_idx = edge_index[0].astype(jnp.int32)
    src_idx = edge_index[1].astype(jnp.int32)
    f_node_p = jnp.pad(f_node, ((0, Lp - L), (0, 0)))

    # ---- kernel A: fused node projections (q/v_src/v_tgt bf16, pool f32) ----
    q, vs, vt, pk, pv = pallas_node_proj(f_node_p, p, tl)

    # ---- sort edges by target node; build static work list -------------------
    order = jnp.argsort(tgt_idx)
    tgt_s = tgt_idx[order]
    src_s = src_idx[order]
    # TODO(synk): fuse these O(E*D) gathers into kernel B via index-driven DMA.
    f_edge_s = jnp.pad(f_edge[order].astype(jnp.bfloat16), ((0, Ep - E), (0, 0)))
    v_node_s = jnp.pad((vs[src_s].astype(jnp.float32)
                        + vt[tgt_s].astype(jnp.float32)).astype(jnp.bfloat16),
                       ((0, Ep - E), (0, 0)))
    tgt_pad = jnp.concatenate(
        [tgt_s, jnp.full((Ep - E,), 2 * Lp + 1, jnp.int32)]).reshape(Eb, te)

    bounds = jnp.arange(Lt + 1, dtype=jnp.int32) * tl
    starts = jnp.searchsorted(tgt_s, bounds[:-1], side='left').astype(jnp.int32)
    ends = jnp.searchsorted(tgt_s, bounds[1:], side='left').astype(jnp.int32)
    bstart = starts // te
    bend = jnp.where(ends > starts, (ends + te - 1) // te, bstart)
    counts = jnp.maximum(bend - bstart, 1).astype(jnp.int32)   # every tile visited
    offs = jnp.concatenate([jnp.zeros((1,), jnp.int32),
                            jnp.cumsum(counts).astype(jnp.int32)])
    total = offs[-1]
    W = 2 * Lt + Eb                                             # static upper bound
    w_idx = jnp.arange(W, dtype=jnp.int32)
    nt = jnp.clip(jnp.searchsorted(offs, w_idx, side='right') - 1,
                  0, Lt - 1).astype(jnp.int32)
    eb = jnp.clip(bstart[nt] + (w_idx - offs[nt]), 0, Eb - 1).astype(jnp.int32)
    valid = (w_idx < total).astype(jnp.int32)
    first = ((w_idx == offs[nt]) & (valid == 1)).astype(jnp.int32)
    last = ((w_idx == offs[nt] + counts[nt] - 1) & (valid == 1)).astype(jnp.int32)
    meta = jnp.stack([nt, eb, first, last, valid], axis=0)      # [5, W] int32

    # ---- kernel B: segment attention (softmax-weighted value aggregation) ----
    agg = pallas_edge_attention(meta, tgt_pad, q, f_edge_s, v_node_s, p,
                                scale, n_heads, tl, te, Lp, D)   # [Lp, D]

    # ---- kernel C: AttnGraphPooling -------------------------------------------
    gid_pad = jnp.concatenate([graph_id.astype(jnp.int32),
                               jnp.full((Lp - L,), G, jnp.int32)])
    f_graph = pallas_graph_pooling(gid_pad.reshape(Lt, tl), pk, pv, p, G, tl, L)
    f_graph_g = f_graph[gid_pad]                                  # [Lp, D]

    # ---- kernel D: attn out-proj+LN, graph_update, KernelSelection, FFN -------
    out = pallas_node_tail(agg, f_node_p, f_graph_g, p, tl)       # [Lp, D]
    return out[:L]


if __name__ == "__main__":
    D, H = 32, 4         # d_model, n_heads
    L, E, G = 16, 32, 2  # nodes, edges, graphs

    key = jax.random.PRNGKey(0)
    k1, k2, k3, kp = jax.random.split(key, 4)
    f_node = jax.random.normal(k1, (L, D), jnp.float32)
    f_edge = jax.random.normal(k2, (E, D), jnp.float32)
    edge_index = jax.random.randint(k3, (2, E), 0, L, dtype=jnp.int32)
    graph_id = jnp.concatenate([jnp.zeros((L // 2,), jnp.int32),
                                jnp.ones((L // 2,), jnp.int32)])

    params = init_params(kp, D)

    fwd = jax.jit(functools.partial(node_update_forward, n_heads=H, n_graphs=G))
    out = fwd(params, f_node, f_edge, edge_index, graph_id)
    jax.block_until_ready(out)
    assert out.shape == (L, D) and out.dtype == jnp.float32
    assert bool(jnp.all(jnp.isfinite(out)))
    print("KERNEL_OK")
</pallas_src>

<mosaic_0001>
module attributes {stable_mosaic.version = 11 : i64} {
  func.func @_proj_kernel(%arg0: i32, %arg1: memref<16x32xf32, #tpu.memory_space<vmem>>, %arg2: memref<32x32xbf16, #tpu.memory_space<vmem>>, %arg3: memref<1x32xf32, #tpu.memory_space<vmem>>, %arg4: memref<32x32xbf16, #tpu.memory_space<vmem>>, %arg5: memref<32x32xbf16, #tpu.memory_space<vmem>>, %arg6: memref<32x32xbf16, #tpu.memory_space<vmem>>, %arg7: memref<1x32xf32, #tpu.memory_space<vmem>>, %arg8: memref<32x32xbf16, #tpu.memory_space<vmem>>, %arg9: memref<1x32xf32, #tpu.memory_space<vmem>>, %arg10: memref<16x32xbf16, #tpu.memory_space<vmem>>, %arg11: memref<16x32xbf16, #tpu.memory_space<vmem>>, %arg12: memref<16x32xbf16, #tpu.memory_space<vmem>>, %arg13: memref<16x32xf32, #tpu.memory_space<vmem>>, %arg14: memref<16x32xf32, #tpu.memory_space<vmem>>) attributes {dimension_semantics = [#tpu.dimension_semantics<parallel>], iteration_bounds = array<i64: 1>, scalar_prefetch = 0 : i64, scratch_operands = 0 : i64, tpu.core_type = #tpu.core_type<tc>, window_params = [{transform_indices = @transform_0, window_bounds = array<i64: 16, 32>}, {pipeline_mode = #tpu.pipeline_mode<synchronous>, transform_indices = @transform_1, window_bounds = array<i64: 32, 32>}, {pipeline_mode = #tpu.pipeline_mode<synchronous>, transform_indices = @transform_2, window_bounds = array<i64: 1, 32>}, {pipeline_mode = #tpu.pipeline_mode<synchronous>, transform_indices = @transform_3, window_bounds = array<i64: 32, 32>}, {pipeline_mode = #tpu.pipeline_mode<synchronous>, transform_indices = @transform_4, window_bounds = array<i64: 32, 32>}, {pipeline_mode = #tpu.pipeline_mode<synchronous>, transform_indices = @transform_5, window_bounds = array<i64: 32, 32>}, {pipeline_mode = #tpu.pipeline_mode<synchronous>, transform_indices = @transform_6, window_bounds = array<i64: 1, 32>}, {pipeline_mode = #tpu.pipeline_mode<synchronous>, transform_indices = @transform_7, window_bounds = array<i64: 32, 32>}, {pipeline_mode = #tpu.pipeline_mode<synchronous>, transform_indices = @transform_8, window_bounds = array<i64: 1, 32>}, {transform_indices = @transform_9, window_bounds = array<i64: 16, 32>}, {transform_indices = @transform_10, window_bounds = array<i64: 16, 32>}, {transform_indices = @transform_11, window_bounds = array<i64: 16, 32>}, {transform_indices = @transform_12, window_bounds = array<i64: 16, 32>}, {transform_indices = @transform_13, window_bounds = array<i64: 16, 32>}]} {
    %c0 = arith.constant 0 : index
    %c0_0 = arith.constant 0 : index
    %0 = vector.load %arg1[%c0, %c0_0] : memref<16x32xf32, #tpu.memory_space<vmem>>, vector<16x32xf32>
    %1 = arith.truncf %0 : vector<16x32xf32> to vector<16x32xbf16>
    %c0_1 = arith.constant 0 : index
    %c0_2 = arith.constant 0 : index
    %2 = vector.load %arg2[%c0_1, %c0_2] : memref<32x32xbf16, #tpu.memory_space<vmem>>, vector<32x32xbf16>
    %cst = arith.constant dense<0.000000e+00> : vector<16x32xf32>
    %3 = tpu.matmul %1, %2, %cst {dimension_numbers = #tpu.dot_dimension_numbers<[1], [0], [0], [1], [0, 0, 1, 1], [], []>} : vector<16x32xbf16>, vector<32x32xbf16>, vector<16x32xf32> -> vector<16x32xf32>
    %c0_3 = arith.constant 0 : index
    %c0_4 = arith.constant 0 : index
    %4 = vector.load %arg3[%c0_3, %c0_4] : memref<1x32xf32, #tpu.memory_space<vmem>>, vector<1x32xf32>
    %5 = vector.broadcast %4 : vector<1x32xf32> to vector<16x32xf32>
    %6 = arith.addf %3, %5 : vector<16x32xf32>
    %7 = arith.truncf %6 : vector<16x32xf32> to vector<16x32xbf16>
    %c0_5 = arith.constant 0 : index
    %c0_6 = arith.constant 0 : index
    %8 = vector.load %arg10[%c0_5, %c0_6] : memref<16x32xbf16, #tpu.memory_space<vmem>>, vector<16x32xbf16>
    tpu.vector_store %arg10[%c0_5, %c0_6], %7 {strides = array<i32>} : memref<16x32xbf16, #tpu.memory_space<vmem>>, vector<16x32xbf16>,
    %c0_7 = arith.constant 0 : index
    %c0_8 = arith.constant 0 : index
    %9 = vector.load %arg4[%c0_7, %c0_8] : memref<32x32xbf16, #tpu.memory_space<vmem>>, vector<32x32xbf16>
    %cst_9 = arith.constant dense<0.000000e+00> : vector<16x32xf32>
    %10 = tpu.matmul %1, %9, %cst_9 {dimension_numbers = #tpu.dot_dimension_numbers<[1], [0], [0], [1], [0, 0, 1, 1], [], []>} : vector<16x32xbf16>, vector<32x32xbf16>, vector<16x32xf32> -> vector<16x32xf32>
    %11 = arith.truncf %10 : vector<16x32xf32> to vector<16x32xbf16>
    %c0_10 = arith.constant 0 : index
    %c0_11 = arith.constant 0 : index
    %12 = vector.load %arg11[%c0_10, %c0_11] : memref<16x32xbf16, #tpu.memory_space<vmem>>, vector<16x32xbf16>
    tpu.vector_store %arg11[%c0_10, %c0_11], %11 {strides = array<i32>} : memref<16x32xbf16, #tpu.memory_space<vmem>>, vector<16x32xbf16>,
    %c0_12 = arith.constant 0 : index
    %c0_13 = arith.constant 0 : index
    %13 = vector.load %arg5[%c0_12, %c0_13] : memref<32x32xbf16, #tpu.memory_space<vmem>>, vector<32x32xbf16>
    %cst_14 = arith.constant dense<0.000000e+00> : vector<16x32xf32>
    %14 = tpu.matmul %1, %13, %cst_14 {dimension_numbers = #tpu.dot_dimension_numbers<[1], [0], [0], [1], [0, 0, 1, 1], [], []>} : vector<16x32xbf16>, vector<32x32xbf16>, vector<16x32xf32> -> vector<16x32xf32>
    %15 = arith.truncf %14 : vector<16x32xf32> to vector<16x32xbf16>
    %c0_15 = arith.constant 0 : index
    %c0_16 = arith.constant 0 : index
    %16 = vector.load %arg12[%c0_15, %c0_16] : memref<16x32xbf16, #tpu.memory_space<vmem>>, vector<16x32xbf16>
    tpu.vector_store %arg12[%c0_15, %c0_16], %15 {strides = array<i32>} : memref<16x32xbf16, #tpu.memory_space<vmem>>, vector<16x32xbf16>,
    %c0_17 = arith.constant 0 : index
    %c0_18 = arith.constant 0 : index
    %17 = vector.load %arg6[%c0_17, %c0_18] : memref<32x32xbf16, #tpu.memory_space<vmem>>, vector<32x32xbf16>
    %cst_19 = arith.constant dense<0.000000e+00> : vector<16x32xf32>
    %18 = tpu.matmul %1, %17, %cst_19 {dimension_numbers = #tpu.dot_dimension_numbers<[1], [0], [0], [1], [0, 0, 1, 1], [], []>} : vector<16x32xbf16>, vector<32x32xbf16>, vector<16x32xf32> -> vector<16x32xf32>
    %c0_20 = arith.constant 0 : index
    %c0_21 = arith.constant 0 : index
    %19 = vector.load %arg7[%c0_20, %c0_21] : memref<1x32xf32, #tpu.memory_space<vmem>>, vector<1x32xf32>
    %20 = vector.broadcast %19 : vector<1x32xf32> to vector<16x32xf32>
    %21 = arith.addf %18, %20 : vector<16x32xf32>
    %c0_22 = arith.constant 0 : index
    %c0_23 = arith.constant 0 : index
    %22 = vector.load %arg13[%c0_22, %c0_23] : memref<16x32xf32, #tpu.memory_space<vmem>>, vector<16x32xf32>
    tpu.vector_store %arg13[%c0_22, %c0_23], %21 {strides = array<i32>} : memref<16x32xf32, #tpu.memory_space<vmem>>, vector<16x32xf32>,
    %c0_24 = arith.constant 0 : index
    %c0_25 = arith.constant 0 : index
    %23 = vector.load %arg8[%c0_24, %c0_25] : memref<32x32xbf16, #tpu.memory_space<vmem>>, vector<32x32xbf16>
    %cst_26 = arith.constant dense<0.000000e+00> : vector<16x32xf32>
    %24 = tpu.matmul %1, %23, %cst_26 {dimension_numbers = #tpu.dot_dimension_numbers<[1], [0], [0], [1], [0, 0, 1, 1], [], []>} : vector<16x32xbf16>, vector<32x32xbf16>, vector<16x32xf32> -> vector<16x32xf32>
    %c0_27 = arith.constant 0 : index
    %c0_28 = arith.constant 0 : index
    %25 = vector.load %arg9[%c0_27, %c0_28] : memref<1x32xf32, #tpu.memory_space<vmem>>, vector<1x32xf32>
    %26 = vector.broadcast %25 : vector<1x32xf32> to vector<16x32xf32>
    %27 = arith.addf %24, %26 : vector<16x32xf32>
    %c0_29 = arith.constant 0 : index
    %c0_30 = arith.constant 0 : index
    %28 = vector.load %arg14[%c0_29, %c0_30] : memref<16x32xf32, #tpu.memory_space<vmem>>, vector<16x32xf32>
    tpu.vector_store %arg14[%c0_29, %c0_30], %27 {strides = array<i32>} : memref<16x32xf32, #tpu.memory_space<vmem>>, vector<16x32xf32>,
    return
  }
  func.func @transform_0(%arg0: i32) -> (i32, i32) {
    %c0_i32 = arith.constant 0 : i32
    %c0_i32_0 = arith.constant 0 : i32
    return %arg0, %c0_i32 : i32, i32
  }
  func.func @transform_1(%arg0: i32) -> (i32, i32) {
    %c0_i32 = arith.constant 0 : i32
    %c0_i32_0 = arith.constant 0 : i32
    %c0_i32_1 = arith.constant 0 : i32
    return %c0_i32, %c0_i32_0 : i32, i32
  }
  func.func @transform_2(%arg0: i32) -> (i32, i32) {
    %c0_i32 = arith.constant 0 : i32
    %c0_i32_0 = arith.constant 0 : i32
    %c0_i32_1 = arith.constant 0 : i32
    return %c0_i32, %c0_i32_0 : i32, i32
  }
  func.func @transform_3(%arg0: i32) -> (i32, i32) {
    %c0_i32 = arith.constant 0 : i32
    %c0_i32_0 = arith.constant 0 : i32
    %c0_i32_1 = arith.constant 0 : i32
    return %c0_i32, %c0_i32_0 : i32, i32
  }
  func.func @transform_4(%arg0: i32) -> (i32, i32) {
    %c0_i32 = arith.constant 0 : i32
    %c0_i32_0 = arith.constant 0 : i32
    %c0_i32_1 = arith.constant 0 : i32
    return %c0_i32, %c0_i32_0 : i32, i32
  }
  func.func @transform_5(%arg0: i32) -> (i32, i32) {
    %c0_i32 = arith.constant 0 : i32
    %c0_i32_0 = arith.constant 0 : i32
    %c0_i32_1 = arith.constant 0 : i32
    return %c0_i32, %c0_i32_0 : i32, i32
  }
  func.func @transform_6(%arg0: i32) -> (i32, i32) {
    %c0_i32 = arith.constant 0 : i32
    %c0_i32_0 = arith.constant 0 : i32
    %c0_i32_1 = arith.constant 0 : i32
    return %c0_i32, %c0_i32_0 : i32, i32
  }
  func.func @transform_7(%arg0: i32) -> (i32, i32) {
    %c0_i32 = arith.constant 0 : i32
    %c0_i32_0 = arith.constant 0 : i32
    %c0_i32_1 = arith.constant 0 : i32
    return %c0_i32, %c0_i32_0 : i32, i32
  }
  func.func @transform_8(%arg0: i32) -> (i32, i32) {
    %c0_i32 = arith.constant 0 : i32
    %c0_i32_0 = arith.constant 0 : i32
    %c0_i32_1 = arith.constant 0 : i32
    return %c0_i32, %c0_i32_0 : i32, i32
  }
  func.func @transform_9(%arg0: i32) -> (i32, i32) {
    %c0_i32 = arith.constant 0 : i32
    %c0_i32_0 = arith.constant 0 : i32
    return %arg0, %c0_i32 : i32, i32
  }
  func.func @transform_10(%arg0: i32) -> (i32, i32) {
    %c0_i32 = arith.constant 0 : i32
    %c0_i32_0 = arith.constant 0 : i32
    return %arg0, %c0_i32 : i32, i32
  }
  func.func @transform_11(%arg0: i32) -> (i32, i32) {
    %c0_i32 = arith.constant 0 : i32
    %c0_i32_0 = arith.constant 0 : i32
    return %arg0, %c0_i32 : i32, i32
  }
  func.func @transform_12(%arg0: i32) -> (i32, i32) {
    %c0_i32 = arith.constant 0 : i32
    %c0_i32_0 = arith.constant 0 : i32
    return %arg0, %c0_i32 : i32, i32
  }
  func.func @transform_13(%arg0: i32) -> (i32, i32) {
    %c0_i32 = arith.constant 0 : i32
    %c0_i32_0 = arith.constant 0 : i32
    return %arg0, %c0_i32 : i32, i32
  }
}

module attributes {stable_mosaic.version = 11 : i64} {
  func.func @_pool_kernel(%arg0: i32, %arg1: memref<1x16xi32, #tpu.memory_space<vmem>>, %arg2: memref<16x32xf32, #tpu.memory_space<vmem>>, %arg3: memref<16x32xf32, #tpu.memory_space<vmem>>, %arg4: memref<1x32xf32, #tpu.memory_space<vmem>>, %arg5: memref<1x32xf32, #tpu.memory_space<vmem>>, %arg6: memref<2x32xf32, #tpu.memory_space<vmem>>, %arg7: memref<1x32xf32, #tpu.memory_space<vmem>>, %arg8: memref<2x32xf32, #tpu.memory_space<vmem>>) attributes {dimension_semantics = [#tpu.dimension_semantics<arbitrary>], iteration_bounds = array<i64: 1>, scalar_prefetch = 0 : i64, scratch_operands = 2 : i64, tpu.core_type = #tpu.core_type<tc>, window_params = [{transform_indices = @transform_0, window_bounds = array<i64: 1, 16>}, {transform_indices = @transform_1, window_bounds = array<i64: 16, 32>}, {transform_indices = @transform_2, window_bounds = array<i64: 16, 32>}, {pipeline_mode = #tpu.pipeline_mode<synchronous>, transform_indices = @transform_3, window_bounds = array<i64: 1, 32>}, {pipeline_mode = #tpu.pipeline_mode<synchronous>, transform_indices = @transform_4, window_bounds = array<i64: 1, 32>}, {pipeline_mode = #tpu.pipeline_mode<synchronous>, transform_indices = @transform_5, window_bounds = array<i64: 2, 32>}]} {
    %c0_i32 = arith.constant 0 : i32
    %0 = arith.cmpi eq, %arg0, %c0_i32 : i32
    %1 = arith.extui %0 : i1 to i32
    %c0_i32_0 = arith.constant 0 : i32
    %2 = arith.cmpi ne, %1, %c0_i32_0 : i32
    scf.if %2 {
      %cst_24 = arith.constant -1.000000e+30 : f32
      %54 = vector.broadcast %cst_24 : f32 to vector<1x32xf32>
      %c0_25 = arith.constant 0 : index
      %c0_26 = arith.constant 0 : index
      %55 = vector.load %arg7[%c0_25, %c0_26] : memref<1x32xf32, #tpu.memory_space<vmem>>, vector<1x32xf32>
      tpu.vector_store %arg7[%c0_25, %c0_26], %54 {strides = array<i32>} : memref<1x32xf32, #tpu.memory_space<vmem>>, vector<1x32xf32>,
      %cst_27 = arith.constant 0.000000e+00 : f32
      %56 = vector.broadcast %cst_27 : f32 to vector<2x32xf32>
      %c0_28 = arith.constant 0 : index
      %c0_29 = arith.constant 0 : index
      %57 = vector.load %arg8[%c0_28, %c0_29] : memref<2x32xf32, #tpu.memory_space<vmem>>, vector<2x32xf32>
      tpu.vector_store %arg8[%c0_28, %c0_29], %56 {strides = array<i32>} : memref<2x32xf32, #tpu.memory_space<vmem>>, vector<2x32xf32>,
      %cst_30 = arith.constant 0.000000e+00 : f32
      %58 = vector.broadcast %cst_30 : f32 to vector<2x32xf32>
      %c0_31 = arith.constant 0 : index
      %c0_32 = arith.constant 0 : index
      %59 = vector.load %arg6[%c0_31, %c0_32] : memref<2x32xf32, #tpu.memory_space<vmem>>, vector<2x32xf32>
      tpu.vector_store %arg6[%c0_31, %c0_32], %58 {strides = array<i32>} : memref<2x32xf32, #tpu.memory_space<vmem>>, vector<2x32xf32>,
    } else {
    }
    %c0 = arith.constant 0 : index
    %c0_1 = arith.constant 0 : index
    %3 = vector.load %arg1[%c0, %c0_1] : memref<1x16xi32, #tpu.memory_space<vmem>>, vector<1x16xi32>
    %4 = tpu.iota {dimensions = array<i32: 0>} : vector<2x16xi32>
    %5 = vector.broadcast %3 : vector<1x16xi32> to vector<2x16xi32>
    %6 = arith.cmpi eq, %5, %4 : vector<2x16xi32>
    %7 = arith.extui %6 : vector<2x16xi1> to vector<2x16xi32>
    %8 = arith.sitofp %7 : vector<2x16xi32> to vector<2x16xf32>
    %9 = arith.truncf %8 : vector<2x16xf32> to vector<2x16xbf16>
    %10 = tpu.iota {dimensions = array<i32: 0>} : vector<16x1xi32>
    %c16_i32 = arith.constant 16 : i32
    %11 = arith.muli %arg0, %c16_i32 : i32
    %12 = vector.broadcast %11 : i32 to vector<16x1xi32>
    %13 = arith.addi %10, %12 : vector<16x1xi32>
    %c16_i32_2 = arith.constant 16 : i32
    %14 = vector.broadcast %c16_i32_2 : i32 to vector<16x1xi32>
    %15 = arith.cmpi slt, %13, %14 : vector<16x1xi32>
    %c0_3 = arith.constant 0 : index
    %c0_4 = arith.constant 0 : index
    %16 = vector.load %arg2[%c0_3, %c0_4] : memref<16x32xf32, #tpu.memory_space<vmem>>, vector<16x32xf32>
    %cst = arith.constant -1.000000e+30 : f32
    %17 = vector.shape_cast %15 : vector<16x1xi1> to vector<16x1xi1>
    %18 = vector.broadcast %17 : vector<16x1xi1> to vector<16x32xi1>
    %19 = vector.broadcast %cst : f32 to vector<16x32xf32>
    %20 = arith.select %18, %16, %19 : vector<16x32xi1>, vector<16x32xf32>
    %c0_5 = arith.constant 0 : index
    %c0_6 = arith.constant 0 : index
    %21 = vector.load %arg7[%c0_5, %c0_6] : memref<1x32xf32, #tpu.memory_space<vmem>>, vector<1x32xf32>
    %cst_7 = arith.constant dense<0xFF800000> : vector<32xf32>
    %22 = vector.multi_reduction <maximumf>, %20, %cst_7 [0] : vector<16x32xf32> to vector<32xf32>
    %23 = vector.shape_cast %22 : vector<32xf32> to vector<1x32xf32>
    %24 = arith.maximumf %21, %23 : vector<1x32xf32>
    %25 = arith.subf %21, %24 : vector<1x32xf32>
    %26 = math.exp %25 : vector<1x32xf32>
    %27 = vector.broadcast %24 : vector<1x32xf32> to vector<16x32xf32>
    %28 = arith.subf %20, %27 : vector<16x32xf32>
    %29 = math.exp %28 : vector<16x32xf32>
    %30 = arith.extui %15 : vector<16x1xi1> to vector<16x1xi32>
    %31 = arith.sitofp %30 : vector<16x1xi32> to vector<16x1xf32>
    %32 = vector.broadcast %31 : vector<16x1xf32> to vector<16x32xf32>
    %33 = arith.mulf %29, %32 : vector<16x32xf32>
    %c0_8 = arith.constant 0 : index
    %c0_9 = arith.constant 0 : index
    %34 = vector.load %arg8[%c0_8, %c0_9] : memref<2x32xf32, #tpu.memory_space<vmem>>, vector<2x32xf32>
    %35 = vector.broadcast %26 : vector<1x32xf32> to vector<2x32xf32>
    %36 = arith.mulf %34, %35 : vector<2x32xf32>
    %37 = arith.truncf %33 : vector<16x32xf32> to vector<16x32xbf16>
    %cst_10 = arith.constant dense<0.000000e+00> : vector<2x32xf32>
    %38 = tpu.matmul %9, %37, %cst_10 {dimension_numbers = #tpu.dot_dimension_numbers<[1], [0], [0], [1], [0, 0, 1, 1], [], []>} : vector<2x16xbf16>, vector<16x32xbf16>, vector<2x32xf32> -> vector<2x32xf32>
    %39 = arith.addf %36, %38 : vector<2x32xf32>
    %c0_11 = arith.constant 0 : index
    %c0_12 = arith.constant 0 : index
    %40 = vector.load %arg8[%c0_11, %c0_12] : memref<2x32xf32, #tpu.memory_space<vmem>>, vector<2x32xf32>
    tpu.vector_store %arg8[%c0_11, %c0_12], %39 {strides = array<i32>} : memref<2x32xf32, #tpu.memory_space<vmem>>, vector<2x32xf32>,
    %c0_13 = arith.constant 0 : index
    %c0_14 = arith.constant 0 : index
    %41 = vector.load %arg6[%c0_13, %c0_14] : memref<2x32xf32, #tpu.memory_space<vmem>>, vector<2x32xf32>
    %42 = vector.broadcast %26 : vector<1x32xf32> to vector<2x32xf32>
    %43 = arith.mulf %41, %42 : vector<2x32xf32>
    %c0_15 = arith.constant 0 : index
    %c0_16 = arith.constant 0 : index
    %44 = vector.load %arg3[%c0_15, %c0_16] : memref<16x32xf32, #tpu.memory_space<vmem>>, vector<16x32xf32>
    %45 = arith.mulf %44, %33 : vector<16x32xf32>
    %46 = arith.truncf %45 : vector<16x32xf32> to vector<16x32xbf16>
    %cst_17 = arith.constant dense<0.000000e+00> : vector<2x32xf32>
    %47 = tpu.matmul %9, %46, %cst_17 {dimension_numbers = #tpu.dot_dimension_numbers<[1], [0], [0], [1], [0, 0, 1, 1], [], []>} : vector<2x16xbf16>, vector<16x32xbf16>, vector<2x32xf32> -> vector<2x32xf32>
    %48 = arith.addf %43, %47 : vector<2x32xf32>
    %c0_18 = arith.constant 0 : index
    %c0_19 = arith.constant 0 : index
    %49 = vector.load %arg6[%c0_18, %c0_19] : memref<2x32xf32, #tpu.memory_space<vmem>>, vector<2x32xf32>
    tpu.vector_store %arg6[%c0_18, %c0_19], %48 {strides = array<i32>} : memref<2x32xf32, #tpu.memory_space<vmem>>, vector<2x32xf32>,
    %c0_20 = arith.constant 0 : index
    %c0_21 = arith.constant 0 : index
    %50 = vector.load %arg7[%c0_20, %c0_21] : memref<1x32xf32, #tpu.memory_space<vmem>>, vector<1x32xf32>
    tpu.vector_store %arg7[%c0_20, %c0_21], %24 {strides = array<i32>} : memref<1x32xf32, #tpu.memory_space<vmem>>, vector<1x32xf32>,
    %c0_i32_22 = arith.constant 0 : i32
    %51 = arith.cmpi eq, %arg0, %c0_i32_22 : i32
    %52 = arith.extui %51 : i1 to i32
    %c0_i32_23 = arith.constant 0 : i32
    %53 = arith.cmpi ne, %52, %c0_i32_23 : i32
    scf.if %53 {
      %c0_24 = arith.constant 0 : index
      %c0_25 = arith.constant 0 : index
      %54 = vector.load %arg6[%c0_24, %c0_25] : memref<2x32xf32, #tpu.memory_space<vmem>>, vector<2x32xf32>
      %c0_26 = arith.constant 0 : index
      %c0_27 = arith.constant 0 : index
      %55 = vector.load %arg8[%c0_26, %c0_27] : memref<2x32xf32, #tpu.memory_space<vmem>>, vector<2x32xf32>
      %cst_28 = arith.constant 1.000000e-07 : f32
      %56 = vector.broadcast %cst_28 : f32 to vector<2x32xf32>
      %57 = arith.addf %55, %56 : vector<2x32xf32>
      %58 = tpu.reciprocal %57 {approx = true} : vector<2x32xf32> -> vector<2x32xf32>
      %59 = arith.mulf %54, %58 : vector<2x32xf32>
      %c0_29 = arith.constant 0 : index
      %c0_30 = arith.constant 0 : index
      %60 = vector.load %arg4[%c0_29, %c0_30] : memref<1x32xf32, #tpu.memory_space<vmem>>, vector<1x32xf32>
      %c0_31 = arith.constant 0 : index
      %c0_32 = arith.constant 0 : index
      %61 = vector.load %arg5[%c0_31, %c0_32] : memref<1x32xf32, #tpu.memory_space<vmem>>, vector<1x32xf32>
      %cst_33 = arith.constant dense<0.000000e+00> : vector<2xf32>
      %62 = vector.multi_reduction <add>, %59, %cst_33 [1] : vector<2x32xf32> to vector<2xf32>
      %63 = vector.shape_cast %62 : vector<2xf32> to vector<2x1xf32>
      %cst_34 = arith.constant 3.200000e+01 : f32
      %64 = vector.broadcast %cst_34 : f32 to vector<2x1xf32>
      %65 = arith.divf %63, %64 : vector<2x1xf32>
      %66 = vector.broadcast %65 : vector<2x1xf32> to vector<2x32xf32>
      %67 = arith.subf %59, %66 : vector<2x32xf32>
      %68 = arith.mulf %67, %67 : vector<2x32xf32>
      %cst_35 = arith.constant dense<0.000000e+00> : vector<2xf32>
      %69 = vector.multi_reduction <add>, %68, %cst_35 [1] : vector<2x32xf32> to vector<2xf32>
      %70 = vector.shape_cast %69 : vector<2xf32> to vector<2x1xf32>
      %cst_36 = arith.constant 3.200000e+01 : f32
      %71 = vector.broadcast %cst_36 : f32 to vector<2x1xf32>
      %72 = arith.divf %70, %71 : vector<2x1xf32>
      %73 = vector.broadcast %65 : vector<2x1xf32> to vector<2x32xf32>
      %74 = arith.subf %59, %73 : vector<2x32xf32>
      %cst_37 = arith.constant 9.99999974E-6 : f32
      %75 = vector.broadcast %cst_37 : f32 to vector<2x1xf32>
      %76 = arith.addf %72, %75 : vector<2x1xf32>
      %77 = math.rsqrt %76 : vector<2x1xf32>
      %78 = vector.broadcast %77 : vector<2x1xf32> to vector<2x32xf32>
      %79 = arith.mulf %74, %78 : vector<2x32xf32>
      %80 = vector.broadcast %60 : vector<1x32xf32> to vector<2x32xf32>
      %81 = arith.mulf %79, %80 : vector<2x32xf32>
      %82 = vector.broadcast %61 : vector<1x32xf32> to vector<2x32xf32>
      %83 = arith.addf %81, %82 : vector<2x32xf32>
      %c0_38 = arith.constant 0 : index
      %c0_39 = arith.constant 0 : index
      %84 = vector.load %arg6[%c0_38, %c0_39] : memref<2x32xf32, #tpu.memory_space<vmem>>, vector<2x32xf32>
      tpu.vector_store %arg6[%c0_38, %c0_39], %83 {strides = array<i32>} : memref<2x32xf32, #tpu.memory_space<vmem>>, vector<2x32xf32>,
    } else {
    }
    return
  }
  func.func @transform_0(%arg0: i32) -> (i32, i32) {
    %c0_i32 = arith.constant 0 : i32
    %c0_i32_0 = arith.constant 0 : i32
    return %arg0, %c0_i32 : i32, i32
  }
  func.func @transform_1(%arg0: i32) -> (i32, i32) {
    %c0_i32 = arith.constant 0 : i32
    %c0_i32_0 = arith.constant 0 : i32
    return %arg0, %c0_i32 : i32, i32
  }
  func.func @transform_2(%arg0: i32) -> (i32, i32) {
    %c0_i32 = arith.constant 0 : i32
    %c0_i32_0 = arith.constant 0 : i32
    return %arg0, %c0_i32 : i32, i32
  }
  func.func @transform_3(%arg0: i32) -> (i32, i32) {
    %c0_i32 = arith.constant 0 : i32
    %c0_i32_0 = arith.constant 0 : i32
    %c0_i32_1 = arith.constant 0 : i32
    return %c0_i32, %c0_i32_0 : i32, i32
  }
  func.func @transform_4(%arg0: i32) -> (i32, i32) {
    %c0_i32 = arith.constant 0 : i32
    %c0_i32_0 = arith.constant 0 : i32
    %c0_i32_1 = arith.constant 0 : i32
    return %c0_i32, %c0_i32_0 : i32, i32
  }
  func.func @transform_5(%arg0: i32) -> (i32, i32) {
    %c0_i32 = arith.constant 0 : i32
    %c0_i32_0 = arith.constant 0 : i32
    %c0_i32_1 = arith.constant 0 : i32
    return %c0_i32, %c0_i32_0 : i32, i32
  }
}

module attributes {stable_mosaic.version = 11 : i64} {
  func.func @_edge_attn_kernel(%arg0: i32, %arg1: memref<5x3xi32, #tpu.memory_space<smem>>, %arg2: memref<1x32xi32, #tpu.memory_space<vmem>>, %arg3: memref<16x32xbf16, #tpu.memory_space<vmem>>, %arg4: memref<32x32xbf16, #tpu.memory_space<vmem>>, %arg5: memref<32x32xbf16, #tpu.memory_space<vmem>>, %arg6: memref<32x32xbf16, #tpu.memory_space<vmem>>, %arg7: memref<1x32xf32, #tpu.memory_space<vmem>>, %arg8: memref<32x32xbf16, #tpu.memory_space<vmem>>, %arg9: memref<1x32xf32, #tpu.memory_space<vmem>>, %arg10: memref<16x32xf32, #tpu.memory_space<vmem>>, %arg11: memref<16x4xf32, #tpu.memory_space<vmem>>, %arg12: memref<16x4xf32, #tpu.memory_space<vmem>>) attributes {dimension_semantics = [#tpu.dimension_semantics<arbitrary>], iteration_bounds = array<i64: 3>, scalar_prefetch = 1 : i64, scratch_operands = 2 : i64, tpu.core_type = #tpu.core_type<tc>, window_params = [{transform_indices = @transform_0, window_bounds = array<i64: 1, 32>}, {transform_indices = @transform_1, window_bounds = array<i64: 16, 32>}, {transform_indices = @transform_2, window_bounds = array<i64: 32, 32>}, {transform_indices = @transform_3, window_bounds = array<i64: 32, 32>}, {pipeline_mode = #tpu.pipeline_mode<synchronous>, transform_indices = @transform_4, window_bounds = array<i64: 32, 32>}, {pipeline_mode = #tpu.pipeline_mode<synchronous>, transform_indices = @transform_5, window_bounds = array<i64: 1, 32>}, {pipeline_mode = #tpu.pipeline_mode<synchronous>, transform_indices = @transform_6, window_bounds = array<i64: 32, 32>}, {pipeline_mode = #tpu.pipeline_mode<synchronous>, transform_indices = @transform_7, window_bounds = array<i64: 1, 32>}, {transform_indices = @transform_8, window_bounds = array<i64: 16, 32>}]} {
    %c2 = arith.constant 2 : index
    %0 = arith.index_cast %arg0 : i32 to index
    %1 = memref.load %arg1[%c2, %0] : memref<5x3xi32, #tpu.memory_space<smem>>
    %c1_i32 = arith.constant 1 : i32
    %2 = arith.cmpi eq, %1, %c1_i32 : i32
    %3 = arith.extui %2 : i1 to i32
    %c0_i32 = arith.constant 0 : i32
    %4 = arith.cmpi ne, %3, %c0_i32 : i32
    scf.if %4 {
      %cst = arith.constant -1.000000e+30 : f32
      %15 = vector.broadcast %cst : f32 to vector<16x4xf32>
      %c0 = arith.constant 0 : index
      %c0_4 = arith.constant 0 : index
      %16 = vector.load %arg11[%c0, %c0_4] : memref<16x4xf32, #tpu.memory_space<vmem>>, vector<16x4xf32>
      tpu.vector_store %arg11[%c0, %c0_4], %15 {strides = array<i32>} : memref<16x4xf32, #tpu.memory_space<vmem>>, vector<16x4xf32>,
      %cst_5 = arith.constant 0.000000e+00 : f32
      %17 = vector.broadcast %cst_5 : f32 to vector<16x4xf32>
      %c0_6 = arith.constant 0 : index
      %c0_7 = arith.constant 0 : index
      %18 = vector.load %arg12[%c0_6, %c0_7] : memref<16x4xf32, #tpu.memory_space<vmem>>, vector<16x4xf32>
      tpu.vector_store %arg12[%c0_6, %c0_7], %17 {strides = array<i32>} : memref<16x4xf32, #tpu.memory_space<vmem>>, vector<16x4xf32>,
      %cst_8 = arith.constant 0.000000e+00 : f32
      %19 = vector.broadcast %cst_8 : f32 to vector<16x32xf32>
      %c0_9 = arith.constant 0 : index
      %c0_10 = arith.constant 0 : index
      %20 = vector.load %arg10[%c0_9, %c0_10] : memref<16x32xf32, #tpu.memory_space<vmem>>, vector<16x32xf32>
      tpu.vector_store %arg10[%c0_9, %c0_10], %19 {strides = array<i32>} : memref<16x32xf32, #tpu.memory_space<vmem>>, vector<16x32xf32>,
    } else {
    }
    %c4 = arith.constant 4 : index
    %5 = arith.index_cast %arg0 : i32 to index
    %6 = memref.load %arg1[%c4, %5] : memref<5x3xi32, #tpu.memory_space<smem>>
    %c1_i32_0 = arith.constant 1 : i32
    %7 = arith.cmpi eq, %6, %c1_i32_0 : i32
    %8 = arith.extui %7 : i1 to i32
    %c0_i32_1 = arith.constant 0 : i32
    %9 = arith.cmpi ne, %8, %c0_i32_1 : i32
    scf.if %9 {
      %c0 = arith.constant 0 : index
      %c0_4 = arith.constant 0 : index
      %15 = vector.load %arg4[%c0, %c0_4] : memref<32x32xbf16, #tpu.memory_space<vmem>>, vector<32x32xbf16>
      %c0_5 = arith.constant 0 : index
      %c0_6 = arith.constant 0 : index
      %16 = vector.load %arg6[%c0_5, %c0_6] : memref<32x32xbf16, #tpu.memory_space<vmem>>, vector<32x32xbf16>
      %cst = arith.constant dense<0.000000e+00> : vector<32x32xf32>
      %17 = tpu.matmul %15, %16, %cst {dimension_numbers = #tpu.dot_dimension_numbers<[1], [0], [0], [1], [0, 0, 1, 1], [], []>} : vector<32x32xbf16>, vector<32x32xbf16>, vector<32x32xf32> -> vector<32x32xf32>
      %c0_7 = arith.constant 0 : index
      %c0_8 = arith.constant 0 : index
      %18 = vector.load %arg7[%c0_7, %c0_8] : memref<1x32xf32, #tpu.memory_space<vmem>>, vector<1x32xf32>
      %19 = vector.broadcast %18 : vector<1x32xf32> to vector<32x32xf32>
      %20 = arith.addf %17, %19 : vector<32x32xf32>
      %c0_9 = arith.constant 0 : index
      %c0_10 = arith.constant 0 : index
      %21 = vector.load %arg5[%c0_9, %c0_10] : memref<32x32xbf16, #tpu.memory_space<vmem>>, vector<32x32xbf16>
      %22 = arith.extf %21 : vector<32x32xbf16> to vector<32x32xf32>
      %c0_11 = arith.constant 0 : index
      %c0_12 = arith.constant 0 : index
      %23 = vector.load %arg8[%c0_11, %c0_12] : memref<32x32xbf16, #tpu.memory_space<vmem>>, vector<32x32xbf16>
      %cst_13 = arith.constant dense<0.000000e+00> : vector<32x32xf32>
      %24 = tpu.matmul %15, %23, %cst_13 {dimension_numbers = #tpu.dot_dimension_numbers<[1], [0], [0], [1], [0, 0, 1, 1], [], []>} : vector<32x32xbf16>, vector<32x32xbf16>, vector<32x32xf32> -> vector<32x32xf32>
      %25 = arith.addf %22, %24 : vector<32x32xf32>
      %c0_14 = arith.constant 0 : index
      %c0_15 = arith.constant 0 : index
      %26 = vector.load %arg9[%c0_14, %c0_15] : memref<1x32xf32, #tpu.memory_space<vmem>>, vector<1x32xf32>
      %27 = vector.broadcast %26 : vector<1x32xf32> to vector<32x32xf32>
      %28 = arith.addf %25, %27 : vector<32x32xf32>
      %29 = arith.truncf %20 : vector<32x32xf32> to vector<32x32xbf16>
      %30 = arith.truncf %28 : vector<32x32xf32> to vector<32x32xbf16>
      %c0_16 = arith.constant 0 : index
      %c0_17 = arith.constant 0 : index
      %31 = vector.load %arg3[%c0_16, %c0_17] : memref<16x32xbf16, #tpu.memory_space<vmem>>, vector<16x32xbf16>
      %c0_18 = arith.constant 0 : index
      %32 = arith.index_cast %arg0 : i32 to index
      %33 = memref.load %arg1[%c0_18, %32] : memref<5x3xi32, #tpu.memory_space<smem>>
      %c16_i32 = arith.constant 16 : i32
      %34 = arith.muli %33, %c16_i32 : i32
      %c0_19 = arith.constant 0 : index
      %c0_20 = arith.constant 0 : index
      %35 = vector.load %arg2[%c0_19, %c0_20] : memref<1x32xi32, #tpu.memory_space<vmem>>, vector<1x32xi32>
      %36 = vector.broadcast %34 : i32 to vector<1x32xi32>
      %37 = arith.subi %35, %36 : vector<1x32xi32>
      %38 = tpu.iota {dimensions = array<i32: 0>} : vector<16x32xi32>
      %39 = vector.broadcast %37 : vector<1x32xi32> to vector<16x32xi32>
      %40 = arith.cmpi eq, %39, %38 : vector<16x32xi32>
      %41 = arith.extui %40 : vector<16x32xi1> to vector<16x32xi32>
      %42 = arith.sitofp %41 : vector<16x32xi32> to vector<16x32xf32>
      %43 = vector.extract_strided_slice %31 {offsets = [0, 0], sizes = [16, 8], strides = [1, 1]} : vector<16x32xbf16> to vector<16x8xbf16>
      %44 = vector.extract_strided_slice %29 {offsets = [0, 0], sizes = [32, 8], strides = [1, 1]} : vector<32x32xbf16> to vector<32x8xbf16>
      %cst_21 = arith.constant dense<0.000000e+00> : vector<16x32xf32>
      %45 = tpu.matmul %43, %44, %cst_21 {dimension_numbers = #tpu.dot_dimension_numbers<[1], [1], [0], [0], [0, 0, 1, 0], [], []>} : vector<16x8xbf16>, vector<32x8xbf16>, vector<16x32xf32> -> vector<16x32xf32>
      %cst_22 = arith.constant 0.353553385 : f32
      %46 = vector.broadcast %cst_22 : f32 to vector<16x32xf32>
      %47 = arith.mulf %45, %46 : vector<16x32xf32>
      %cst_23 = arith.constant -1.000000e+30 : f32
      %48 = vector.broadcast %cst_23 : f32 to vector<16x32xf32>
      %49 = arith.select %40, %47, %48 : vector<16x32xi1>, vector<16x32xf32>
      %c0_24 = arith.constant 0 : index
      %c0_25 = arith.constant 0 : index
      %50 = vector.load %arg11[%c0_24, %c0_25] : memref<16x4xf32, #tpu.memory_space<vmem>>, vector<16x1xf32>
      %cst_26 = arith.constant dense<0xFF800000> : vector<16xf32>
      %51 = vector.multi_reduction <maximumf>, %49, %cst_26 [1] : vector<16x32xf32> to vector<16xf32>
      %52 = vector.shape_cast %51 : vector<16xf32> to vector<16x1xf32>
      %53 = arith.maximumf %50, %52 : vector<16x1xf32>
      %54 = arith.subf %50, %53 : vector<16x1xf32>
      %55 = math.exp %54 : vector<16x1xf32>
      %56 = vector.broadcast %53 : vector<16x1xf32> to vector<16x32xf32>
      %57 = arith.subf %49, %56 : vector<16x32xf32>
      %58 = math.exp %57 : vector<16x32xf32>
      %59 = arith.mulf %58, %42 : vector<16x32xf32>
      %c0_27 = arith.constant 0 : index
      %c0_28 = arith.constant 0 : index
      %60 = vector.load %arg12[%c0_27, %c0_28] : memref<16x4xf32, #tpu.memory_space<vmem>>, vector<16x1xf32>
      %61 = arith.mulf %60, %55 : vector<16x1xf32>
      %cst_29 = arith.constant dense<0.000000e+00> : vector<16xf32>
      %62 = vector.multi_reduction <add>, %59, %cst_29 [1] : vector<16x32xf32> to vector<16xf32>
      %63 = vector.shape_cast %62 : vector<16xf32> to vector<16x1xf32>
      %64 = arith.addf %61, %63 : vector<16x1xf32>
      %c0_30 = arith.constant 0 : index
      %c0_31 = arith.constant 0 : index
      %65 = vector.load %arg12[%c0_30, %c0_31] : memref<16x4xf32, #tpu.memory_space<vmem>>, vector<16x1xf32>
      tpu.vector_store %arg12[%c0_30, %c0_31], %64 {strides = array<i32>} : memref<16x4xf32, #tpu.memory_space<vmem>>, vector<16x1xf32>,
      %c0_32 = arith.constant 0 : index
      %c0_33 = arith.constant 0 : index
      %66 = vector.load %arg10[%c0_32, %c0_33] : memref<16x32xf32, #tpu.memory_space<vmem>>, vector<16x8xf32>
      %67 = vector.broadcast %55 : vector<16x1xf32> to vector<16x8xf32>
      %68 = arith.mulf %66, %67 : vector<16x8xf32>
      %69 = arith.truncf %59 : vector<16x32xf32> to vector<16x32xbf16>
      %70 = vector.extract_strided_slice %30 {offsets = [0, 0], sizes = [32, 8], strides = [1, 1]} : vector<32x32xbf16> to vector<32x8xbf16>
      %cst_34 = arith.constant dense<0.000000e+00> : vector<16x8xf32>
      %71 = tpu.matmul %69, %70, %cst_34 {dimension_numbers = #tpu.dot_dimension_numbers<[1], [0], [0], [1], [0, 0, 1, 1], [], []>} : vector<16x32xbf16>, vector<32x8xbf16>, vector<16x8xf32> -> vector<16x8xf32>
      %72 = arith.addf %68, %71 : vector<16x8xf32>
      %c0_35 = arith.constant 0 : index
      %c0_36 = arith.constant 0 : index
      %73 = vector.load %arg10[%c0_35, %c0_36] : memref<16x32xf32, #tpu.memory_space<vmem>>, vector<16x8xf32>
      tpu.vector_store %arg10[%c0_35, %c0_36], %72 {strides = array<i32>} : memref<16x32xf32, #tpu.memory_space<vmem>>, vector<16x8xf32>,
      %c0_37 = arith.constant 0 : index
      %c0_38 = arith.constant 0 : index
      %74 = vector.load %arg11[%c0_37, %c0_38] : memref<16x4xf32, #tpu.memory_space<vmem>>, vector<16x1xf32>
      tpu.vector_store %arg11[%c0_37, %c0_38], %53 {strides = array<i32>} : memref<16x4xf32, #tpu.memory_space<vmem>>, vector<16x1xf32>,
      %75 = vector.extract_strided_slice %31 {offsets = [0, 8], sizes = [16, 8], strides = [1, 1]} : vector<16x32xbf16> to vector<16x8xbf16>
      %76 = vector.extract_strided_slice %29 {offsets = [0, 8], sizes = [32, 8], strides = [1, 1]} : vector<32x32xbf16> to vector<32x8xbf16>
      %cst_39 = arith.constant dense<0.000000e+00> : vector<16x32xf32>
      %77 = tpu.matmul %75, %76, %cst_39 {dimension_numbers = #tpu.dot_dimension_numbers<[1], [1], [0], [0], [0, 0, 1, 0], [], []>} : vector<16x8xbf16>, vector<32x8xbf16>, vector<16x32xf32> -> vector<16x32xf32>
      %cst_40 = arith.constant 0.353553385 : f32
      %78 = vector.broadcast %cst_40 : f32 to vector<16x32xf32>
      %79 = arith.mulf %77, %78 : vector<16x32xf32>
      %cst_41 = arith.constant -1.000000e+30 : f32
      %80 = vector.broadcast %cst_41 : f32 to vector<16x32xf32>
      %81 = arith.select %40, %79, %80 : vector<16x32xi1>, vector<16x32xf32>
      %c0_42 = arith.constant 0 : index
      %c1 = arith.constant 1 : index
      %82 = vector.load %arg11[%c0_42, %c1] : memref<16x4xf32, #tpu.memory_space<vmem>>, vector<16x1xf32>
      %cst_43 = arith.constant dense<0xFF800000> : vector<16xf32>
      %83 = vector.multi_reduction <maximumf>, %81, %cst_43 [1] : vector<16x32xf32> to vector<16xf32>
      %84 = vector.shape_cast %83 : vector<16xf32> to vector<16x1xf32>
      %85 = arith.maximumf %82, %84 : vector<16x1xf32>
      %86 = arith.subf %82, %85 : vector<16x1xf32>
      %87 = math.exp %86 : vector<16x1xf32>
      %88 = vector.broadcast %85 : vector<16x1xf32> to vector<16x32xf32>
      %89 = arith.subf %81, %88 : vector<16x32xf32>
      %90 = math.exp %89 : vector<16x32xf32>
      %91 = arith.mulf %90, %42 : vector<16x32xf32>
      %c0_44 = arith.constant 0 : index
      %c1_45 = arith.constant 1 : index
      %92 = vector.load %arg12[%c0_44, %c1_45] : memref<16x4xf32, #tpu.memory_space<vmem>>, vector<16x1xf32>
      %93 = arith.mulf %92, %87 : vector<16x1xf32>
      %cst_46 = arith.constant dense<0.000000e+00> : vector<16xf32>
      %94 = vector.multi_reduction <add>, %91, %cst_46 [1] : vector<16x32xf32> to vector<16xf32>
      %95 = vector.shape_cast %94 : vector<16xf32> to vector<16x1xf32>
      %96 = arith.addf %93, %95 : vector<16x1xf32>
      %c0_47 = arith.constant 0 : index
      %c1_48 = arith.constant 1 : index
      %97 = vector.load %arg12[%c0_47, %c1_48] : memref<16x4xf32, #tpu.memory_space<vmem>>, vector<16x1xf32>
      tpu.vector_store %arg12[%c0_47, %c1_48], %96 {strides = array<i32>} : memref<16x4xf32, #tpu.memory_space<vmem>>, vector<16x1xf32>,
      %c0_49 = arith.constant 0 : index
      %c8 = arith.constant 8 : index
      %98 = vector.load %arg10[%c0_49, %c8] : memref<16x32xf32, #tpu.memory_space<vmem>>, vector<16x8xf32>
      %99 = vector.broadcast %87 : vector<16x1xf32> to vector<16x8xf32>
      %100 = arith.mulf %98, %99 : vector<16x8xf32>
      %101 = arith.truncf %91 : vector<16x32xf32> to vector<16x32xbf16>
      %102 = vector.extract_strided_slice %30 {offsets = [0, 8], sizes = [32, 8], strides = [1, 1]} : vector<32x32xbf16> to vector<32x8xbf16>
      %cst_50 = arith.constant dense<0.000000e+00> : vector<16x8xf32>
      %103 = tpu.matmul %101, %102, %cst_50 {dimension_numbers = #tpu.dot_dimension_numbers<[1], [0], [0], [1], [0, 0, 1, 1], [], []>} : vector<16x32xbf16>, vector<32x8xbf16>, vector<16x8xf32> -> vector<16x8xf32>
      %104 = arith.addf %100, %103 : vector<16x8xf32>
      %c0_51 = arith.constant 0 : index
      %c8_52 = arith.constant 8 : index
      %105 = vector.load %arg10[%c0_51, %c8_52] : memref<16x32xf32, #tpu.memory_space<vmem>>, vector<16x8xf32>
      tpu.vector_store %arg10[%c0_51, %c8_52], %104 {strides = array<i32>} : memref<16x32xf32, #tpu.memory_space<vmem>>, vector<16x8xf32>,
      %c0_53 = arith.constant 0 : index
      %c1_54 = arith.constant 1 : index
      %106 = vector.load %arg11[%c0_53, %c1_54] : memref<16x4xf32, #tpu.memory_space<vmem>>, vector<16x1xf32>
      tpu.vector_store %arg11[%c0_53, %c1_54], %85 {strides = array<i32>} : memref<16x4xf32, #tpu.memory_space<vmem>>, vector<16x1xf32>,
      %107 = vector.extract_strided_slice %31 {offsets = [0, 16], sizes = [16, 8], strides = [1, 1]} : vector<16x32xbf16> to vector<16x8xbf16>
      %108 = vector.extract_strided_slice %29 {offsets = [0, 16], sizes = [32, 8], strides = [1, 1]} : vector<32x32xbf16> to vector<32x8xbf16>
      %cst_55 = arith.constant dense<0.000000e+00> : vector<16x32xf32>
      %109 = tpu.matmul %107, %108, %cst_55 {dimension_numbers = #tpu.dot_dimension_numbers<[1], [1], [0], [0], [0, 0, 1, 0], [], []>} : vector<16x8xbf16>, vector<32x8xbf16>, vector<16x32xf32> -> vector<16x32xf32>
      %cst_56 = arith.constant 0.353553385 : f32
      %110 = vector.broadcast %cst_56 : f32 to vector<16x32xf32>
      %111 = arith.mulf %109, %110 : vector<16x32xf32>
      %cst_57 = arith.constant -1.000000e+30 : f32
      %112 = vector.broadcast %cst_57 : f32 to vector<16x32xf32>
      %113 = arith.select %40, %111, %112 : vector<16x32xi1>, vector<16x32xf32>
      %c0_58 = arith.constant 0 : index
      %c2_59 = arith.constant 2 : index
      %114 = vector.load %arg11[%c0_58, %c2_59] : memref<16x4xf32, #tpu.memory_space<vmem>>, vector<16x1xf32>
      %cst_60 = arith.constant dense<0xFF800000> : vector<16xf32>
      %115 = vector.multi_reduction <maximumf>, %113, %cst_60 [1] : vector<16x32xf32> to vector<16xf32>
      %116 = vector.shape_cast %115 : vector<16xf32> to vector<16x1xf32>
      %117 = arith.maximumf %114, %116 : vector<16x1xf32>
      %118 = arith.subf %114, %117 : vector<16x1xf32>
      %119 = math.exp %118 : vector<16x1xf32>
      %120 = vector.broadcast %117 : vector<16x1xf32> to vector<16x32xf32>
      %121 = arith.subf %113, %120 : vector<16x32xf32>
      %122 = math.exp %121 : vector<16x32xf32>
      %123 = arith.mulf %122, %42 : vector<16x32xf32>
      %c0_61 = arith.constant 0 : index
      %c2_62 = arith.constant 2 : index
      %124 = vector.load %arg12[%c0_61, %c2_62] : memref<16x4xf32, #tpu.memory_space<vmem>>, vector<16x1xf32>
      %125 = arith.mulf %124, %119 : vector<16x1xf32>
      %cst_63 = arith.constant dense<0.000000e+00> : vector<16xf32>
      %126 = vector.multi_reduction <add>, %123, %cst_63 [1] : vector<16x32xf32> to vector<16xf32>
      %127 = vector.shape_cast %126 : vector<16xf32> to vector<16x1xf32>
      %128 = arith.addf %125, %127 : vector<16x1xf32>
      %c0_64 = arith.constant 0 : index
      %c2_65 = arith.constant 2 : index
      %129 = vector.load %arg12[%c0_64, %c2_65] : memref<16x4xf32, #tpu.memory_space<vmem>>, vector<16x1xf32>
      tpu.vector_store %arg12[%c0_64, %c2_65], %128 {strides = array<i32>} : memref<16x4xf32, #tpu.memory_space<vmem>>, vector<16x1xf32>,
      %c0_66 = arith.constant 0 : index
      %c16 = arith.constant 16 : index
      %130 = vector.load %arg10[%c0_66, %c16] : memref<16x32xf32, #tpu.memory_space<vmem>>, vector<16x8xf32>
      %131 = vector.broadcast %119 : vector<16x1xf32> to vector<16x8xf32>
      %132 = arith.mulf %130, %131 : vector<16x8xf32>
      %133 = arith.truncf %123 : vector<16x32xf32> to vector<16x32xbf16>
      %134 = vector.extract_strided_slice %30 {offsets = [0, 16], sizes = [32, 8], strides = [1, 1]} : vector<32x32xbf16> to vector<32x8xbf16>
      %cst_67 = arith.constant dense<0.000000e+00> : vector<16x8xf32>
      %135 = tpu.matmul %133, %134, %cst_67 {dimension_numbers = #tpu.dot_dimension_numbers<[1], [0], [0], [1], [0, 0, 1, 1], [], []>} : vector<16x32xbf16>, vector<32x8xbf16>, vector<16x8xf32> -> vector<16x8xf32>
      %136 = arith.addf %132, %135 : vector<16x8xf32>
      %c0_68 = arith.constant 0 : index
      %c16_69 = arith.constant 16 : index
      %137 = vector.load %arg10[%c0_68, %c16_69] : memref<16x32xf32, #tpu.memory_space<vmem>>, vector<16x8xf32>
      tpu.vector_store %arg10[%c0_68, %c16_69], %136 {strides = array<i32>} : memref<16x32xf32, #tpu.memory_space<vmem>>, vector<16x8xf32>,
      %c0_70 = arith.constant 0 : index
      %c2_71 = arith.constant 2 : index
      %138 = vector.load %arg11[%c0_70, %c2_71] : memref<16x4xf32, #tpu.memory_space<vmem>>, vector<16x1xf32>
      tpu.vector_store %arg11[%c0_70, %c2_71], %117 {strides = array<i32>} : memref<16x4xf32, #tpu.memory_space<vmem>>, vector<16x1xf32>,
      %139 = vector.extract_strided_slice %31 {offsets = [0, 24], sizes = [16, 8], strides = [1, 1]} : vector<16x32xbf16> to vector<16x8xbf16>
      %140 = vector.extract_strided_slice %29 {offsets = [0, 24], sizes = [32, 8], strides = [1, 1]} : vector<32x32xbf16> to vector<32x8xbf16>
      %cst_72 = arith.constant dense<0.000000e+00> : vector<16x32xf32>
      %141 = tpu.matmul %139, %140, %cst_72 {dimension_numbers = #tpu.dot_dimension_numbers<[1], [1], [0], [0], [0, 0, 1, 0], [], []>} : vector<16x8xbf16>, vector<32x8xbf16>, vector<16x32xf32> -> vector<16x32xf32>
      %cst_73 = arith.constant 0.353553385 : f32
      %142 = vector.broadcast %cst_73 : f32 to vector<16x32xf32>
      %143 = arith.mulf %141, %142 : vector<16x32xf32>
      %cst_74 = arith.constant -1.000000e+30 : f32
      %144 = vector.broadcast %cst_74 : f32 to vector<16x32xf32>
      %145 = arith.select %40, %143, %144 : vector<16x32xi1>, vector<16x32xf32>
      %c0_75 = arith.constant 0 : index
      %c3_76 = arith.constant 3 : index
      %146 = vector.load %arg11[%c0_75, %c3_76] : memref<16x4xf32, #tpu.memory_space<vmem>>, vector<16x1xf32>
      %cst_77 = arith.constant dense<0xFF800000> : vector<16xf32>
      %147 = vector.multi_reduction <maximumf>, %145, %cst_77 [1] : vector<16x32xf32> to vector<16xf32>
      %148 = vector.shape_cast %147 : vector<16xf32> to vector<16x1xf32>
      %149 = arith.maximumf %146, %148 : vector<16x1xf32>
      %150 = arith.subf %146, %149 : vector<16x1xf32>
      %151 = math.exp %150 : vector<16x1xf32>
      %152 = vector.broadcast %149 : vector<16x1xf32> to vector<16x32xf32>
      %153 = arith.subf %145, %152 : vector<16x32xf32>
      %154 = math.exp %153 : vector<16x32xf32>
      %155 = arith.mulf %154, %42 : vector<16x32xf32>
      %c0_78 = arith.constant 0 : index
      %c3_79 = arith.constant 3 : index
      %156 = vector.load %arg12[%c0_78, %c3_79] : memref<16x4xf32, #tpu.memory_space<vmem>>, vector<16x1xf32>
      %157 = arith.mulf %156, %151 : vector<16x1xf32>
      %cst_80 = arith.constant dense<0.000000e+00> : vector<16xf32>
      %158 = vector.multi_reduction <add>, %155, %cst_80 [1] : vector<16x32xf32> to vector<16xf32>
      %159 = vector.shape_cast %158 : vector<16xf32> to vector<16x1xf32>
      %160 = arith.addf %157, %159 : vector<16x1xf32>
      %c0_81 = arith.constant 0 : index
      %c3_82 = arith.constant 3 : index
      %161 = vector.load %arg12[%c0_81, %c3_82] : memref<16x4xf32, #tpu.memory_space<vmem>>, vector<16x1xf32>
      tpu.vector_store %arg12[%c0_81, %c3_82], %160 {strides = array<i32>} : memref<16x4xf32, #tpu.memory_space<vmem>>, vector<16x1xf32>,
      %c0_83 = arith.constant 0 : index
      %c24 = arith.constant 24 : index
      %162 = vector.load %arg10[%c0_83, %c24] : memref<16x32xf32, #tpu.memory_space<vmem>>, vector<16x8xf32>
      %163 = vector.broadcast %151 : vector<16x1xf32> to vector<16x8xf32>
      %164 = arith.mulf %162, %163 : vector<16x8xf32>
      %165 = arith.truncf %155 : vector<16x32xf32> to vector<16x32xbf16>
      %166 = vector.extract_strided_slice %30 {offsets = [0, 24], sizes = [32, 8], strides = [1, 1]} : vector<32x32xbf16> to vector<32x8xbf16>
      %cst_84 = arith.constant dense<0.000000e+00> : vector<16x8xf32>
      %167 = tpu.matmul %165, %166, %cst_84 {dimension_numbers = #tpu.dot_dimension_numbers<[1], [0], [0], [1], [0, 0, 1, 1], [], []>} : vector<16x32xbf16>, vector<32x8xbf16>, vector<16x8xf32> -> vector<16x8xf32>
      %168 = arith.addf %164, %167 : vector<16x8xf32>
      %c0_85 = arith.constant 0 : index
      %c24_86 = arith.constant 24 : index
      %169 = vector.load %arg10[%c0_85, %c24_86] : memref<16x32xf32, #tpu.memory_space<vmem>>, vector<16x8xf32>
      tpu.vector_store %arg10[%c0_85, %c24_86], %168 {strides = array<i32>} : memref<16x32xf32, #tpu.memory_space<vmem>>, vector<16x8xf32>,
      %c0_87 = arith.constant 0 : index
      %c3_88 = arith.constant 3 : index
      %170 = vector.load %arg11[%c0_87, %c3_88] : memref<16x4xf32, #tpu.memory_space<vmem>>, vector<16x1xf32>
      tpu.vector_store %arg11[%c0_87, %c3_88], %149 {strides = array<i32>} : memref<16x4xf32, #tpu.memory_space<vmem>>, vector<16x1xf32>,
    } else {
    }
    %c3 = arith.constant 3 : index
    %10 = arith.index_cast %arg0 : i32 to index
    %11 = memref.load %arg1[%c3, %10] : memref<5x3xi32, #tpu.memory_space<smem>>
    %c1_i32_2 = arith.constant 1 : i32
    %12 = arith.cmpi eq, %11, %c1_i32_2 : i32
    %13 = arith.extui %12 : i1 to i32
    %c0_i32_3 = arith.constant 0 : i32
    %14 = arith.cmpi ne, %13, %c0_i32_3 : i32
    scf.if %14 {
      %c0 = arith.constant 0 : index
      %c0_4 = arith.constant 0 : index
      %15 = vector.load %arg12[%c0, %c0_4] : memref<16x4xf32, #tpu.memory_space<vmem>>, vector<16x1xf32>
      %cst = arith.constant 1.000000e-07 : f32
      %16 = vector.broadcast %cst : f32 to vector<16x1xf32>
      %17 = arith.addf %15, %16 : vector<16x1xf32>
      %18 = tpu.reciprocal %17 {approx = true} : vector<16x1xf32> -> vector<16x1xf32>
      %c0_5 = arith.constant 0 : index
      %c0_6 = arith.constant 0 : index
      %19 = vector.load %arg10[%c0_5, %c0_6] : memref<16x32xf32, #tpu.memory_space<vmem>>, vector<16x8xf32>
      %20 = vector.broadcast %18 : vector<16x1xf32> to vector<16x8xf32>
      %21 = arith.mulf %19, %20 : vector<16x8xf32>
      %c0_7 = arith.constant 0 : index
      %c0_8 = arith.constant 0 : index
      %22 = vector.load %arg10[%c0_7, %c0_8] : memref<16x32xf32, #tpu.memory_space<vmem>>, vector<16x8xf32>
      tpu.vector_store %arg10[%c0_7, %c0_8], %21 {strides = array<i32>} : memref<16x32xf32, #tpu.memory_space<vmem>>, vector<16x8xf32>,
      %c0_9 = arith.constant 0 : index
      %c1 = arith.constant 1 : index
      %23 = vector.load %arg12[%c0_9, %c1] : memref<16x4xf32, #tpu.memory_space<vmem>>, vector<16x1xf32>
      %cst_10 = arith.constant 1.000000e-07 : f32
      %24 = vector.broadcast %cst_10 : f32 to vector<16x1xf32>
      %25 = arith.addf %23, %24 : vector<16x1xf32>
      %26 = tpu.reciprocal %25 {approx = true} : vector<16x1xf32> -> vector<16x1xf32>
      %c0_11 = arith.constant 0 : index
      %c8 = arith.constant 8 : index
      %27 = vector.load %arg10[%c0_11, %c8] : memref<16x32xf32, #tpu.memory_space<vmem>>, vector<16x8xf32>
      %28 = vector.broadcast %26 : vector<16x1xf32> to vector<16x8xf32>
      %29 = arith.mulf %27, %28 : vector<16x8xf32>
      %c0_12 = arith.constant 0 : index
      %c8_13 = arith.constant 8 : index
      %30 = vector.load %arg10[%c0_12, %c8_13] : memref<16x32xf32, #tpu.memory_space<vmem>>, vector<16x8xf32>
      tpu.vector_store %arg10[%c0_12, %c8_13], %29 {strides = array<i32>} : memref<16x32xf32, #tpu.memory_space<vmem>>, vector<16x8xf32>,
      %c0_14 = arith.constant 0 : index
      %c2_15 = arith.constant 2 : index
      %31 = vector.load %arg12[%c0_14, %c2_15] : memref<16x4xf32, #tpu.memory_space<vmem>>, vector<16x1xf32>
      %cst_16 = arith.constant 1.000000e-07 : f32
      %32 = vector.broadcast %cst_16 : f32 to vector<16x1xf32>
      %33 = arith.addf %31, %32 : vector<16x1xf32>
      %34 = tpu.reciprocal %33 {approx = true} : vector<16x1xf32> -> vector<16x1xf32>
      %c0_17 = arith.constant 0 : index
      %c16 = arith.constant 16 : index
      %35 = vector.load %arg10[%c0_17, %c16] : memref<16x32xf32, #tpu.memory_space<vmem>>, vector<16x8xf32>
      %36 = vector.broadcast %34 : vector<16x1xf32> to vector<16x8xf32>
      %37 = arith.mulf %35, %36 : vector<16x8xf32>
      %c0_18 = arith.constant 0 : index
      %c16_19 = arith.constant 16 : index
      %38 = vector.load %arg10[%c0_18, %c16_19] : memref<16x32xf32, #tpu.memory_space<vmem>>, vector<16x8xf32>
      tpu.vector_store %arg10[%c0_18, %c16_19], %37 {strides = array<i32>} : memref<16x32xf32, #tpu.memory_space<vmem>>, vector<16x8xf32>,
      %c0_20 = arith.constant 0 : index
      %c3_21 = arith.constant 3 : index
      %39 = vector.load %arg12[%c0_20, %c3_21] : memref<16x4xf32, #tpu.memory_space<vmem>>, vector<16x1xf32>
      %cst_22 = arith.constant 1.000000e-07 : f32
      %40 = vector.broadcast %cst_22 : f32 to vector<16x1xf32>
      %41 = arith.addf %39, %40 : vector<16x1xf32>
      %42 = tpu.reciprocal %41 {approx = true} : vector<16x1xf32> -> vector<16x1xf32>
      %c0_23 = arith.constant 0 : index
      %c24 = arith.constant 24 : index
      %43 = vector.load %arg10[%c0_23, %c24] : memref<16x32xf32, #tpu.memory_space<vmem>>, vector<16x8xf32>
      %44 = vector.broadcast %42 : vector<16x1xf32> to vector<16x8xf32>
      %45 = arith.mulf %43, %44 : vector<16x8xf32>
      %c0_24 = arith.constant 0 : index
      %c24_25 = arith.constant 24 : index
      %46 = vector.load %arg10[%c0_24, %c24_25] : memref<16x32xf32, #tpu.memory_space<vmem>>, vector<16x8xf32>
      tpu.vector_store %arg10[%c0_24, %c24_25], %45 {strides = array<i32>} : memref<16x32xf32, #tpu.memory_space<vmem>>, vector<16x8xf32>,
    } else {
    }
    return
  }
  func.func @transform_0(%arg0: i32, %arg1: memref<5x3xi32, #tpu.memory_space<smem>>) -> (i32, i32) {
    %c1 = arith.constant 1 : index
    %0 = arith.index_cast %arg0 : i32 to index
    %1 = memref.load %arg1[%c1, %0] : memref<5x3xi32, #tpu.memory_space<smem>>
    %c0_i32 = arith.constant 0 : i32
    %c0_i32_0 = arith.constant 0 : i32
    return %1, %c0_i32 : i32, i32
  }
  func.func @transform_1(%arg0: i32, %arg1: memref<5x3xi32, #tpu.memory_space<smem>>) -> (i32, i32) {
    %c0 = arith.constant 0 : index
    %0 = arith.index_cast %arg0 : i32 to index
    %1 = memref.load %arg1[%c0, %0] : memref<5x3xi32, #tpu.memory_space<smem>>
    %c0_i32 = arith.constant 0 : i32
    %c0_i32_0 = arith.constant 0 : i32
    return %1, %c0_i32 : i32, i32
  }
  func.func @transform_2(%arg0: i32, %arg1: memref<5x3xi32, #tpu.memory_space<smem>>) -> (i32, i32) {
    %c1 = arith.constant 1 : index
    %0 = arith.index_cast %arg0 : i32 to index
    %1 = memref.load %arg1[%c1, %0] : memref<5x3xi32, #tpu.memory_space<smem>>
    %c0_i32 = arith.constant 0 : i32
    %c0_i32_0 = arith.constant 0 : i32
    return %1, %c0_i32 : i32, i32
  }
  func.func @transform_3(%arg0: i32, %arg1: memref<5x3xi32, #tpu.memory_space<smem>>) -> (i32, i32) {
    %c1 = arith.constant 1 : index
    %0 = arith.index_cast %arg0 : i32 to index
    %1 = memref.load %arg1[%c1, %0] : memref<5x3xi32, #tpu.memory_space<smem>>
    %c0_i32 = arith.constant 0 : i32
    %c0_i32_0 = arith.constant 0 : i32
    return %1, %c0_i32 : i32, i32
  }
  func.func @transform_4(%arg0: i32, %arg1: memref<5x3xi32, #tpu.memory_space<smem>>) -> (i32, i32) {
    %c0_i32 = arith.constant 0 : i32
    %c0_i32_0 = arith.constant 0 : i32
    %c0_i32_1 = arith.constant 0 : i32
    return %c0_i32, %c0_i32_0 : i32, i32
  }
  func.func @transform_5(%arg0: i32, %arg1: memref<5x3xi32, #tpu.memory_space<smem>>) -> (i32, i32) {
    %c0_i32 = arith.constant 0 : i32
    %c0_i32_0 = arith.constant 0 : i32
    %c0_i32_1 = arith.constant 0 : i32
    return %c0_i32, %c0_i32_0 : i32, i32
  }
  func.func @transform_6(%arg0: i32, %arg1: memref<5x3xi32, #tpu.memory_space<smem>>) -> (i32, i32) {
    %c0_i32 = arith.constant 0 : i32
    %c0_i32_0 = arith.constant 0 : i32
    %c0_i32_1 = arith.constant 0 : i32
    return %c0_i32, %c0_i32_0 : i32, i32
  }
  func.func @transform_7(%arg0: i32, %arg1: memref<5x3xi32, #tpu.memory_space<smem>>) -> (i32, i32) {
    %c0_i32 = arith.constant 0 : i32
    %c0_i32_0 = arith.constant 0 : i32
    %c0_i32_1 = arith.constant 0 : i32
    return %c0_i32, %c0_i32_0 : i32, i32
  }
  func.func @transform_8(%arg0: i32, %arg1: memref<5x3xi32, #tpu.memory_space<smem>>) -> (i32, i32) {
    %c0 = arith.constant 0 : index
    %0 = arith.index_cast %arg0 : i32 to index
    %1 = memref.load %arg1[%c0, %0] : memref<5x3xi32, #tpu.memory_space<smem>>
    %c0_i32 = arith.constant 0 : i32
    %c0_i32_0 = arith.constant 0 : i32
    return %1, %c0_i32 : i32, i32
  }
}

module attributes {stable_mosaic.version = 11 : i64} {
  func.func @_tail_kernel(%arg0: i32, %arg1: memref<16x32xf32, #tpu.memory_space<vmem>>, %arg2: memref<16x32xf32, #tpu.memory_space<vmem>>, %arg3: memref<16x32xf32, #tpu.memory_space<vmem>>, %arg4: memref<32x32xbf16, #tpu.memory_space<vmem>>, %arg5: memref<1x32xf32, #tpu.memory_space<vmem>>, %arg6: memref<1x32xf32, #tpu.memory_space<vmem>>, %arg7: memref<1x32xf32, #tpu.memory_space<vmem>>, %arg8: memref<32x32xbf16, #tpu.memory_space<vmem>>, %arg9: memref<32x32xbf16, #tpu.memory_space<vmem>>, %arg10: memref<1x32xf32, #tpu.memory_space<vmem>>, %arg11: memref<1x32xf32, #tpu.memory_space<vmem>>, %arg12: memref<1x32xf32, #tpu.memory_space<vmem>>, %arg13: memref<1x32xf32, #tpu.memory_space<vmem>>, %arg14: memref<1x32xf32, #tpu.memory_space<vmem>>, %arg15: memref<32x128xbf16, #tpu.memory_space<vmem>>, %arg16: memref<1x128xf32, #tpu.memory_space<vmem>>, %arg17: memref<128x32xbf16, #tpu.memory_space<vmem>>, %arg18: memref<1x32xf32, #tpu.memory_space<vmem>>, %arg19: memref<128x32xbf16, #tpu.memory_space<vmem>>, %arg20: memref<1x32xf32, #tpu.memory_space<vmem>>, %arg21: memref<1x32xf32, #tpu.memory_space<vmem>>, %arg22: memref<1x32xf32, #tpu.memory_space<vmem>>, %arg23: memref<32x64xbf16, #tpu.memory_space<vmem>>, %arg24: memref<32x64xbf16, #tpu.memory_space<vmem>>, %arg25: memref<64x32xbf16, #tpu.memory_space<vmem>>, %arg26: memref<1x32xf32, #tpu.memory_space<vmem>>, %arg27: memref<1x32xf32, #tpu.memory_space<vmem>>, %arg28: memref<16x32xf32, #tpu.memory_space<vmem>>) attributes {dimension_semantics = [#tpu.dimension_semantics<parallel>], iteration_bounds = array<i64: 1>, scalar_prefetch = 0 : i64, scratch_operands = 0 : i64, tpu.core_type = #tpu.core_type<tc>, window_params = [{transform_indices = @transform_0, window_bounds = array<i64: 16, 32>}, {transform_indices = @transform_1, window_bounds = array<i64: 16, 32>}, {transform_indices = @transform_2, window_bounds = array<i64: 16, 32>}, {pipeline_mode = #tpu.pipeline_mode<synchronous>, transform_indices = @transform_3, window_bounds = array<i64: 32, 32>}, {pipeline_mode = #tpu.pipeline_mode<synchronous>, transform_indices = @transform_4, window_bounds = array<i64: 1, 32>}, {pipeline_mode = #tpu.pipeline_mode<synchronous>, transform_indices = @transform_5, window_bounds = array<i64: 1, 32>}, {pipeline_mode = #tpu.pipeline_mode<synchronous>, transform_indices = @transform_6, window_bounds = array<i64: 1, 32>}, {pipeline_mode = #tpu.pipeline_mode<synchronous>, transform_indices = @transform_7, window_bounds = array<i64: 32, 32>}, {pipeline_mode = #tpu.pipeline_mode<synchronous>, transform_indices = @transform_8, window_bounds = array<i64: 32, 32>}, {pipeline_mode = #tpu.pipeline_mode<synchronous>, transform_indices = @transform_9, window_bounds = array<i64: 1, 32>}, {pipeline_mode = #tpu.pipeline_mode<synchronous>, transform_indices = @transform_10, window_bounds = array<i64: 1, 32>}, {pipeline_mode = #tpu.pipeline_mode<synchronous>, transform_indices = @transform_11, window_bounds = array<i64: 1, 32>}, {pipeline_mode = #tpu.pipeline_mode<synchronous>, transform_indices = @transform_12, window_bounds = array<i64: 1, 32>}, {pipeline_mode = #tpu.pipeline_mode<synchronous>, transform_indices = @transform_13, window_bounds = array<i64: 1, 32>}, {pipeline_mode = #tpu.pipeline_mode<synchronous>, transform_indices = @transform_14, window_bounds = array<i64: 32, 128>}, {pipeline_mode = #tpu.pipeline_mode<synchronous>, transform_indices = @transform_15, window_bounds = array<i64: 1, 128>}, {pipeline_mode = #tpu.pipeline_mode<synchronous>, transform_indices = @transform_16, window_bounds = array<i64: 128, 32>}, {pipeline_mode = #tpu.pipeline_mode<synchronous>, transform_indices = @transform_17, window_bounds = array<i64: 1, 32>}, {pipeline_mode = #tpu.pipeline_mode<synchronous>, transform_indices = @transform_18, window_bounds = array<i64: 128, 32>}, {pipeline_mode = #tpu.pipeline_mode<synchronous>, transform_indices = @transform_19, window_bounds = array<i64: 1, 32>}, {pipeline_mode = #tpu.pipeline_mode<synchronous>, transform_indices = @transform_20, window_bounds = array<i64: 1, 32>}, {pipeline_mode = #tpu.pipeline_mode<synchronous>, transform_indices = @transform_21, window_bounds = array<i64: 1, 32>}, {pipeline_mode = #tpu.pipeline_mode<synchronous>, transform_indices = @transform_22, window_bounds = array<i64: 32, 64>}, {pipeline_mode = #tpu.pipeline_mode<synchronous>, transform_indices = @transform_23, window_bounds = array<i64: 32, 64>}, {pipeline_mode = #tpu.pipeline_mode<synchronous>, transform_indices = @transform_24, window_bounds = array<i64: 64, 32>}, {pipeline_mode = #tpu.pipeline_mode<synchronous>, transform_indices = @transform_25, window_bounds = array<i64: 1, 32>}, {pipeline_mode = #tpu.pipeline_mode<synchronous>, transform_indices = @transform_26, window_bounds = array<i64: 1, 32>}, {transform_indices = @transform_27, window_bounds = array<i64: 16, 32>}]} {
    %c0 = arith.constant 0 : index
    %c0_0 = arith.constant 0 : index
    %0 = vector.load %arg2[%c0, %c0_0] : memref<16x32xf32, #tpu.memory_space<vmem>>, vector<16x32xf32>
    %c0_1 = arith.constant 0 : index
    %c0_2 = arith.constant 0 : index
    %1 = vector.load %arg1[%c0_1, %c0_2] : memref<16x32xf32, #tpu.memory_space<vmem>>, vector<16x32xf32>
    %2 = arith.truncf %1 : vector<16x32xf32> to vector<16x32xbf16>
    %c0_3 = arith.constant 0 : index
    %c0_4 = arith.constant 0 : index
    %3 = vector.load %arg4[%c0_3, %c0_4] : memref<32x32xbf16, #tpu.memory_space<vmem>>, vector<32x32xbf16>
    %cst = arith.constant dense<0.000000e+00> : vector<16x32xf32>
    %4 = tpu.matmul %2, %3, %cst {dimension_numbers = #tpu.dot_dimension_numbers<[1], [0], [0], [1], [0, 0, 1, 1], [], []>} : vector<16x32xbf16>, vector<32x32xbf16>, vector<16x32xf32> -> vector<16x32xf32>
    %c0_5 = arith.constant 0 : index
    %c0_6 = arith.constant 0 : index
    %5 = vector.load %arg5[%c0_5, %c0_6] : memref<1x32xf32, #tpu.memory_space<vmem>>, vector<1x32xf32>
    %6 = vector.broadcast %5 : vector<1x32xf32> to vector<16x32xf32>
    %7 = arith.addf %4, %6 : vector<16x32xf32>
    %c0_7 = arith.constant 0 : index
    %c0_8 = arith.constant 0 : index
    %8 = vector.load %arg6[%c0_7, %c0_8] : memref<1x32xf32, #tpu.memory_space<vmem>>, vector<1x32xf32>
    %c0_9 = arith.constant 0 : index
    %c0_10 = arith.constant 0 : index
    %9 = vector.load %arg7[%c0_9, %c0_10] : memref<1x32xf32, #tpu.memory_space<vmem>>, vector<1x32xf32>
    %cst_11 = arith.constant dense<0.000000e+00> : vector<16xf32>
    %10 = vector.multi_reduction <add>, %7, %cst_11 [1] : vector<16x32xf32> to vector<16xf32>
    %11 = vector.shape_cast %10 : vector<16xf32> to vector<16x1xf32>
    %cst_12 = arith.constant 3.200000e+01 : f32
    %12 = vector.broadcast %cst_12 : f32 to vector<16x1xf32>
    %13 = arith.divf %11, %12 : vector<16x1xf32>
    %14 = vector.broadcast %13 : vector<16x1xf32> to vector<16x32xf32>
    %15 = arith.subf %7, %14 : vector<16x32xf32>
    %16 = arith.mulf %15, %15 : vector<16x32xf32>
    %cst_13 = arith.constant dense<0.000000e+00> : vector<16xf32>
    %17 = vector.multi_reduction <add>, %16, %cst_13 [1] : vector<16x32xf32> to vector<16xf32>
    %18 = vector.shape_cast %17 : vector<16xf32> to vector<16x1xf32>
    %cst_14 = arith.constant 3.200000e+01 : f32
    %19 = vector.broadcast %cst_14 : f32 to vector<16x1xf32>
    %20 = arith.divf %18, %19 : vector<16x1xf32>
    %21 = vector.broadcast %13 : vector<16x1xf32> to vector<16x32xf32>
    %22 = arith.subf %7, %21 : vector<16x32xf32>
    %cst_15 = arith.constant 9.99999974E-6 : f32
    %23 = vector.broadcast %cst_15 : f32 to vector<16x1xf32>
    %24 = arith.addf %20, %23 : vector<16x1xf32>
    %25 = math.rsqrt %24 : vector<16x1xf32>
    %26 = vector.broadcast %25 : vector<16x1xf32> to vector<16x32xf32>
    %27 = arith.mulf %22, %26 : vector<16x32xf32>
    %28 = vector.broadcast %8 : vector<1x32xf32> to vector<16x32xf32>
    %29 = arith.mulf %27, %28 : vector<16x32xf32>
    %30 = vector.broadcast %9 : vector<1x32xf32> to vector<16x32xf32>
    %31 = arith.addf %29, %30 : vector<16x32xf32>
    %32 = arith.truncf %0 : vector<16x32xf32> to vector<16x32xbf16>
    %c0_16 = arith.constant 0 : index
    %c0_17 = arith.constant 0 : index
    %33 = vector.load %arg8[%c0_16, %c0_17] : memref<32x32xbf16, #tpu.memory_space<vmem>>, vector<32x32xbf16>
    %cst_18 = arith.constant dense<0.000000e+00> : vector<16x32xf32>
    %34 = tpu.matmul %32, %33, %cst_18 {dimension_numbers = #tpu.dot_dimension_numbers<[1], [0], [0], [1], [0, 0, 1, 1], [], []>} : vector<16x32xbf16>, vector<32x32xbf16>, vector<16x32xf32> -> vector<16x32xf32>
    %c0_19 = arith.constant 0 : index
    %c0_20 = arith.constant 0 : index
    %35 = vector.load %arg3[%c0_19, %c0_20] : memref<16x32xf32, #tpu.memory_space<vmem>>, vector<16x32xf32>
    %36 = arith.truncf %35 : vector<16x32xf32> to vector<16x32xbf16>
    %c0_21 = arith.constant 0 : index
    %c0_22 = arith.constant 0 : index
    %37 = vector.load %arg9[%c0_21, %c0_22] : memref<32x32xbf16, #tpu.memory_space<vmem>>, vector<32x32xbf16>
    %cst_23 = arith.constant dense<0.000000e+00> : vector<16x32xf32>
    %38 = tpu.matmul %36, %37, %cst_23 {dimension_numbers = #tpu.dot_dimension_numbers<[1], [0], [0], [1], [0, 0, 1, 1], [], []>} : vector<16x32xbf16>, vector<32x32xbf16>, vector<16x32xf32> -> vector<16x32xf32>
    %39 = arith.addf %34, %38 : vector<16x32xf32>
    %c0_24 = arith.constant 0 : index
    %c0_25 = arith.constant 0 : index
    %40 = vector.load %arg10[%c0_24, %c0_25] : memref<1x32xf32, #tpu.memory_space<vmem>>, vector<1x32xf32>
    %41 = vector.broadcast %40 : vector<1x32xf32> to vector<16x32xf32>
    %42 = arith.addf %39, %41 : vector<16x32xf32>
    %cst_26 = arith.constant 5.000000e-01 : f32
    %43 = vector.broadcast %cst_26 : f32 to vector<16x32xf32>
    %44 = arith.mulf %43, %42 : vector<16x32xf32>
    %cst_27 = arith.constant 0.707106769 : f32
    %45 = vector.broadcast %cst_27 : f32 to vector<16x32xf32>
    %46 = arith.mulf %42, %45 : vector<16x32xf32>
    %47 = math.erf %46 : vector<16x32xf32>
    %cst_28 = arith.constant 1.000000e+00 : f32
    %48 = vector.broadcast %cst_28 : f32 to vector<16x32xf32>
    %49 = arith.addf %48, %47 : vector<16x32xf32>
    %50 = arith.mulf %44, %49 : vector<16x32xf32>
    %c0_29 = arith.constant 0 : index
    %c0_30 = arith.constant 0 : index
    %51 = vector.load %arg11[%c0_29, %c0_30] : memref<1x32xf32, #tpu.memory_space<vmem>>, vector<1x32xf32>
    %c0_31 = arith.constant 0 : index
    %c0_32 = arith.constant 0 : index
    %52 = vector.load %arg12[%c0_31, %c0_32] : memref<1x32xf32, #tpu.memory_space<vmem>>, vector<1x32xf32>
    %cst_33 = arith.constant dense<0.000000e+00> : vector<16xf32>
    %53 = vector.multi_reduction <add>, %50, %cst_33 [1] : vector<16x32xf32> to vector<16xf32>
    %54 = vector.shape_cast %53 : vector<16xf32> to vector<16x1xf32>
    %cst_34 = arith.constant 3.200000e+01 : f32
    %55 = vector.broadcast %cst_34 : f32 to vector<16x1xf32>
    %56 = arith.divf %54, %55 : vector<16x1xf32>
    %57 = vector.broadcast %56 : vector<16x1xf32> to vector<16x32xf32>
    %58 = arith.subf %50, %57 : vector<16x32xf32>
    %59 = arith.mulf %58, %58 : vector<16x32xf32>
    %cst_35 = arith.constant dense<0.000000e+00> : vector<16xf32>
    %60 = vector.multi_reduction <add>, %59, %cst_35 [1] : vector<16x32xf32> to vector<16xf32>
    %61 = vector.shape_cast %60 : vector<16xf32> to vector<16x1xf32>
    %cst_36 = arith.constant 3.200000e+01 : f32
    %62 = vector.broadcast %cst_36 : f32 to vector<16x1xf32>
    %63 = arith.divf %61, %62 : vector<16x1xf32>
    %64 = vector.broadcast %56 : vector<16x1xf32> to vector<16x32xf32>
    %65 = arith.subf %50, %64 : vector<16x32xf32>
    %cst_37 = arith.constant 9.99999974E-6 : f32
    %66 = vector.broadcast %cst_37 : f32 to vector<16x1xf32>
    %67 = arith.addf %63, %66 : vector<16x1xf32>
    %68 = math.rsqrt %67 : vector<16x1xf32>
    %69 = vector.broadcast %68 : vector<16x1xf32> to vector<16x32xf32>
    %70 = arith.mulf %65, %69 : vector<16x32xf32>
    %71 = vector.broadcast %51 : vector<1x32xf32> to vector<16x32xf32>
    %72 = arith.mulf %70, %71 : vector<16x32xf32>
    %73 = vector.broadcast %52 : vector<1x32xf32> to vector<16x32xf32>
    %74 = arith.addf %72, %73 : vector<16x32xf32>
    %75 = arith.addf %31, %74 : vector<16x32xf32>
    %c0_38 = arith.constant 0 : index
    %c0_39 = arith.constant 0 : index
    %76 = vector.load %arg13[%c0_38, %c0_39] : memref<1x32xf32, #tpu.memory_space<vmem>>, vector<1x32xf32>
    %c0_40 = arith.constant 0 : index
    %c0_41 = arith.constant 0 : index
    %77 = vector.load %arg14[%c0_40, %c0_41] : memref<1x32xf32, #tpu.memory_space<vmem>>, vector<1x32xf32>
    %cst_42 = arith.constant dense<0.000000e+00> : vector<16xf32>
    %78 = vector.multi_reduction <add>, %75, %cst_42 [1] : vector<16x32xf32> to vector<16xf32>
    %79 = vector.shape_cast %78 : vector<16xf32> to vector<16x1xf32>
    %cst_43 = arith.constant 3.200000e+01 : f32
    %80 = vector.broadcast %cst_43 : f32 to vector<16x1xf32>
    %81 = arith.divf %79, %80 : vector<16x1xf32>
    %82 = vector.broadcast %81 : vector<16x1xf32> to vector<16x32xf32>
    %83 = arith.subf %75, %82 : vector<16x32xf32>
    %84 = arith.mulf %83, %83 : vector<16x32xf32>
    %cst_44 = arith.constant dense<0.000000e+00> : vector<16xf32>
    %85 = vector.multi_reduction <add>, %84, %cst_44 [1] : vector<16x32xf32> to vector<16xf32>
    %86 = vector.shape_cast %85 : vector<16xf32> to vector<16x1xf32>
    %cst_45 = arith.constant 3.200000e+01 : f32
    %87 = vector.broadcast %cst_45 : f32 to vector<16x1xf32>
    %88 = arith.divf %86, %87 : vector<16x1xf32>
    %89 = vector.broadcast %81 : vector<16x1xf32> to vector<16x32xf32>
    %90 = arith.subf %75, %89 : vector<16x32xf32>
    %cst_46 = arith.constant 9.99999974E-6 : f32
    %91 = vector.broadcast %cst_46 : f32 to vector<16x1xf32>
    %92 = arith.addf %88, %91 : vector<16x1xf32>
    %93 = math.rsqrt %92 : vector<16x1xf32>
    %94 = vector.broadcast %93 : vector<16x1xf32> to vector<16x32xf32>
    %95 = arith.mulf %90, %94 : vector<16x32xf32>
    %96 = vector.broadcast %76 : vector<1x32xf32> to vector<16x32xf32>
    %97 = arith.mulf %95, %96 : vector<16x32xf32>
    %98 = vector.broadcast %77 : vector<1x32xf32> to vector<16x32xf32>
    %99 = arith.addf %97, %98 : vector<16x32xf32>
    %100 = arith.truncf %99 : vector<16x32xf32> to vector<16x32xbf16>
    %c0_47 = arith.constant 0 : index
    %c0_48 = arith.constant 0 : index
    %101 = vector.load %arg15[%c0_47, %c0_48] : memref<32x128xbf16, #tpu.memory_space<vmem>>, vector<32x128xbf16>
    %cst_49 = arith.constant dense<0.000000e+00> : vector<16x128xf32>
    %102 = tpu.matmul %100, %101, %cst_49 {dimension_numbers = #tpu.dot_dimension_numbers<[1], [0], [0], [1], [0, 0, 1, 1], [], []>} : vector<16x32xbf16>, vector<32x128xbf16>, vector<16x128xf32> -> vector<16x128xf32>
    %c0_50 = arith.constant 0 : index
    %c0_51 = arith.constant 0 : index
    %103 = vector.load %arg16[%c0_50, %c0_51] : memref<1x128xf32, #tpu.memory_space<vmem>>, vector<1x128xf32>
    %104 = vector.broadcast %103 : vector<1x128xf32> to vector<16x128xf32>
    %105 = arith.addf %102, %104 : vector<16x128xf32>
    %cst_52 = arith.constant 5.000000e-01 : f32
    %106 = vector.broadcast %cst_52 : f32 to vector<16x128xf32>
    %107 = arith.mulf %106, %105 : vector<16x128xf32>
    %cst_53 = arith.constant 0.707106769 : f32
    %108 = vector.broadcast %cst_53 : f32 to vector<16x128xf32>
    %109 = arith.mulf %105, %108 : vector<16x128xf32>
    %110 = math.erf %109 : vector<16x128xf32>
    %cst_54 = arith.constant 1.000000e+00 : f32
    %111 = vector.broadcast %cst_54 : f32 to vector<16x128xf32>
    %112 = arith.addf %111, %110 : vector<16x128xf32>
    %113 = arith.mulf %107, %112 : vector<16x128xf32>
    %114 = arith.truncf %113 : vector<16x128xf32> to vector<16x128xbf16>
    %c0_55 = arith.constant 0 : index
    %c0_56 = arith.constant 0 : index
    %115 = vector.load %arg17[%c0_55, %c0_56] : memref<128x32xbf16, #tpu.memory_space<vmem>>, vector<128x32xbf16>
    %cst_57 = arith.constant dense<0.000000e+00> : vector<16x32xf32>
    %116 = tpu.matmul %114, %115, %cst_57 {dimension_numbers = #tpu.dot_dimension_numbers<[1], [0], [0], [1], [0, 0, 1, 1], [], []>} : vector<16x128xbf16>, vector<128x32xbf16>, vector<16x32xf32> -> vector<16x32xf32>
    %c0_58 = arith.constant 0 : index
    %c0_59 = arith.constant 0 : index
    %117 = vector.load %arg18[%c0_58, %c0_59] : memref<1x32xf32, #tpu.memory_space<vmem>>, vector<1x32xf32>
    %118 = vector.broadcast %117 : vector<1x32xf32> to vector<16x32xf32>
    %119 = arith.addf %116, %118 : vector<16x32xf32>
    %c0_60 = arith.constant 0 : index
    %c0_61 = arith.constant 0 : index
    %120 = vector.load %arg19[%c0_60, %c0_61] : memref<128x32xbf16, #tpu.memory_space<vmem>>, vector<128x32xbf16>
    %cst_62 = arith.constant dense<0.000000e+00> : vector<16x32xf32>
    %121 = tpu.matmul %114, %120, %cst_62 {dimension_numbers = #tpu.dot_dimension_numbers<[1], [0], [0], [1], [0, 0, 1, 1], [], []>} : vector<16x128xbf16>, vector<128x32xbf16>, vector<16x32xf32> -> vector<16x32xf32>
    %c0_63 = arith.constant 0 : index
    %c0_64 = arith.constant 0 : index
    %122 = vector.load %arg20[%c0_63, %c0_64] : memref<1x32xf32, #tpu.memory_space<vmem>>, vector<1x32xf32>
    %123 = vector.broadcast %122 : vector<1x32xf32> to vector<16x32xf32>
    %124 = arith.addf %121, %123 : vector<16x32xf32>
    %125 = arith.maximumf %119, %124 : vector<16x32xf32>
    %126 = arith.subf %119, %125 : vector<16x32xf32>
    %127 = math.exp %126 : vector<16x32xf32>
    %128 = arith.subf %124, %125 : vector<16x32xf32>
    %129 = math.exp %128 : vector<16x32xf32>
    %130 = arith.addf %127, %129 : vector<16x32xf32>
    %131 = tpu.reciprocal %130 {approx = true} : vector<16x32xf32> -> vector<16x32xf32>
    %132 = arith.mulf %127, %131 : vector<16x32xf32>
    %133 = arith.mulf %31, %132 : vector<16x32xf32>
    %134 = arith.addf %0, %133 : vector<16x32xf32>
    %135 = arith.mulf %129, %131 : vector<16x32xf32>
    %136 = arith.mulf %74, %135 : vector<16x32xf32>
    %137 = arith.addf %134, %136 : vector<16x32xf32>
    %c0_65 = arith.constant 0 : index
    %c0_66 = arith.constant 0 : index
    %138 = vector.load %arg21[%c0_65, %c0_66] : memref<1x32xf32, #tpu.memory_space<vmem>>, vector<1x32xf32>
    %c0_67 = arith.constant 0 : index
    %c0_68 = arith.constant 0 : index
    %139 = vector.load %arg22[%c0_67, %c0_68] : memref<1x32xf32, #tpu.memory_space<vmem>>, vector<1x32xf32>
    %cst_69 = arith.constant dense<0.000000e+00> : vector<16xf32>
    %140 = vector.multi_reduction <add>, %137, %cst_69 [1] : vector<16x32xf32> to vector<16xf32>
    %141 = vector.shape_cast %140 : vector<16xf32> to vector<16x1xf32>
    %cst_70 = arith.constant 3.200000e+01 : f32
    %142 = vector.broadcast %cst_70 : f32 to vector<16x1xf32>
    %143 = arith.divf %141, %142 : vector<16x1xf32>
    %144 = vector.broadcast %143 : vector<16x1xf32> to vector<16x32xf32>
    %145 = arith.subf %137, %144 : vector<16x32xf32>
    %146 = arith.mulf %145, %145 : vector<16x32xf32>
    %cst_71 = arith.constant dense<0.000000e+00> : vector<16xf32>
    %147 = vector.multi_reduction <add>, %146, %cst_71 [1] : vector<16x32xf32> to vector<16xf32>
    %148 = vector.shape_cast %147 : vector<16xf32> to vector<16x1xf32>
    %cst_72 = arith.constant 3.200000e+01 : f32
    %149 = vector.broadcast %cst_72 : f32 to vector<16x1xf32>
    %150 = arith.divf %148, %149 : vector<16x1xf32>
    %151 = vector.broadcast %143 : vector<16x1xf32> to vector<16x32xf32>
    %152 = arith.subf %137, %151 : vector<16x32xf32>
    %cst_73 = arith.constant 9.99999974E-6 : f32
    %153 = vector.broadcast %cst_73 : f32 to vector<16x1xf32>
    %154 = arith.addf %150, %153 : vector<16x1xf32>
    %155 = math.rsqrt %154 : vector<16x1xf32>
    %156 = vector.broadcast %155 : vector<16x1xf32> to vector<16x32xf32>
    %157 = arith.mulf %152, %156 : vector<16x32xf32>
    %158 = vector.broadcast %138 : vector<1x32xf32> to vector<16x32xf32>
    %159 = arith.mulf %157, %158 : vector<16x32xf32>
    %160 = vector.broadcast %139 : vector<1x32xf32> to vector<16x32xf32>
    %161 = arith.addf %159, %160 : vector<16x32xf32>
    %162 = arith.truncf %161 : vector<16x32xf32> to vector<16x32xbf16>
    %c0_74 = arith.constant 0 : index
    %c0_75 = arith.constant 0 : index
    %163 = vector.load %arg23[%c0_74, %c0_75] : memref<32x64xbf16, #tpu.memory_space<vmem>>, vector<32x64xbf16>
    %cst_76 = arith.constant dense<0.000000e+00> : vector<16x64xf32>
    %164 = tpu.matmul %162, %163, %cst_76 {dimension_numbers = #tpu.dot_dimension_numbers<[1], [0], [0], [1], [0, 0, 1, 1], [], []>} : vector<16x32xbf16>, vector<32x64xbf16>, vector<16x64xf32> -> vector<16x64xf32>
    %c0_77 = arith.constant 0 : index
    %c0_78 = arith.constant 0 : index
    %165 = vector.load %arg24[%c0_77, %c0_78] : memref<32x64xbf16, #tpu.memory_space<vmem>>, vector<32x64xbf16>
    %cst_79 = arith.constant dense<0.000000e+00> : vector<16x64xf32>
    %166 = tpu.matmul %162, %165, %cst_79 {dimension_numbers = #tpu.dot_dimension_numbers<[1], [0], [0], [1], [0, 0, 1, 1], [], []>} : vector<16x32xbf16>, vector<32x64xbf16>, vector<16x64xf32> -> vector<16x64xf32>
    %cst_80 = arith.constant 5.000000e-01 : f32
    %167 = vector.broadcast %cst_80 : f32 to vector<16x64xf32>
    %168 = arith.mulf %167, %166 : vector<16x64xf32>
    %cst_81 = arith.constant 0.707106769 : f32
    %169 = vector.broadcast %cst_81 : f32 to vector<16x64xf32>
    %170 = arith.mulf %166, %169 : vector<16x64xf32>
    %171 = math.erf %170 : vector<16x64xf32>
    %cst_82 = arith.constant 1.000000e+00 : f32
    %172 = vector.broadcast %cst_82 : f32 to vector<16x64xf32>
    %173 = arith.addf %172, %171 : vector<16x64xf32>
    %174 = arith.mulf %168, %173 : vector<16x64xf32>
    %175 = arith.mulf %174, %164 : vector<16x64xf32>
    %176 = arith.truncf %175 : vector<16x64xf32> to vector<16x64xbf16>
    %c0_83 = arith.constant 0 : index
    %c0_84 = arith.constant 0 : index
    %177 = vector.load %arg25[%c0_83, %c0_84] : memref<64x32xbf16, #tpu.memory_space<vmem>>, vector<64x32xbf16>
    %cst_85 = arith.constant dense<0.000000e+00> : vector<16x32xf32>
    %178 = tpu.matmul %176, %177, %cst_85 {dimension_numbers = #tpu.dot_dimension_numbers<[1], [0], [0], [1], [0, 0, 1, 1], [], []>} : vector<16x64xbf16>, vector<64x32xbf16>, vector<16x32xf32> -> vector<16x32xf32>
    %179 = arith.addf %161, %178 : vector<16x32xf32>
    %c0_86 = arith.constant 0 : index
    %c0_87 = arith.constant 0 : index
    %180 = vector.load %arg26[%c0_86, %c0_87] : memref<1x32xf32, #tpu.memory_space<vmem>>, vector<1x32xf32>
    %c0_88 = arith.constant 0 : index
    %c0_89 = arith.constant 0 : index
    %181 = vector.load %arg27[%c0_88, %c0_89] : memref<1x32xf32, #tpu.memory_space<vmem>>, vector<1x32xf32>
    %cst_90 = arith.constant dense<0.000000e+00> : vector<16xf32>
    %182 = vector.multi_reduction <add>, %179, %cst_90 [1] : vector<16x32xf32> to vector<16xf32>
    %183 = vector.shape_cast %182 : vector<16xf32> to vector<16x1xf32>
    %cst_91 = arith.constant 3.200000e+01 : f32
    %184 = vector.broadcast %cst_91 : f32 to vector<16x1xf32>
    %185 = arith.divf %183, %184 : vector<16x1xf32>
    %186 = vector.broadcast %185 : vector<16x1xf32> to vector<16x32xf32>
    %187 = arith.subf %179, %186 : vector<16x32xf32>
    %188 = arith.mulf %187, %187 : vector<16x32xf32>
    %cst_92 = arith.constant dense<0.000000e+00> : vector<16xf32>
    %189 = vector.multi_reduction <add>, %188, %cst_92 [1] : vector<16x32xf32> to vector<16xf32>
    %190 = vector.shape_cast %189 : vector<16xf32> to vector<16x1xf32>
    %cst_93 = arith.constant 3.200000e+01 : f32
    %191 = vector.broadcast %cst_93 : f32 to vector<16x1xf32>
    %192 = arith.divf %190, %191 : vector<16x1xf32>
    %193 = vector.broadcast %185 : vector<16x1xf32> to vector<16x32xf32>
    %194 = arith.subf %179, %193 : vector<16x32xf32>
    %cst_94 = arith.constant 9.99999974E-6 : f32
    %195 = vector.broadcast %cst_94 : f32 to vector<16x1xf32>
    %196 = arith.addf %192, %195 : vector<16x1xf32>
    %197 = math.rsqrt %196 : vector<16x1xf32>
    %198 = vector.broadcast %197 : vector<16x1xf32> to vector<16x32xf32>
    %199 = arith.mulf %194, %198 : vector<16x32xf32>
    %200 = vector.broadcast %180 : vector<1x32xf32> to vector<16x32xf32>
    %201 = arith.mulf %199, %200 : vector<16x32xf32>
    %202 = vector.broadcast %181 : vector<1x32xf32> to vector<16x32xf32>
    %203 = arith.addf %201, %202 : vector<16x32xf32>
    %c0_95 = arith.constant 0 : index
    %c0_96 = arith.constant 0 : index
    %204 = vector.load %arg28[%c0_95, %c0_96] : memref<16x32xf32, #tpu.memory_space<vmem>>, vector<16x32xf32>
    tpu.vector_store %arg28[%c0_95, %c0_96], %203 {strides = array<i32>} : memref<16x32xf32, #tpu.memory_space<vmem>>, vector<16x32xf32>,
    return
  }
  func.func @transform_0(%arg0: i32) -> (i32, i32) {
    %c0_i32 = arith.constant 0 : i32
    %c0_i32_0 = arith.constant 0 : i32
    return %arg0, %c0_i32 : i32, i32
  }
  func.func @transform_1(%arg0: i32) -> (i32, i32) {
    %c0_i32 = arith.constant 0 : i32
    %c0_i32_0 = arith.constant 0 : i32
    return %arg0, %c0_i32 : i32, i32
  }
  func.func @transform_2(%arg0: i32) -> (i32, i32) {
    %c0_i32 = arith.constant 0 : i32
    %c0_i32_0 = arith.constant 0 : i32
    return %arg0, %c0_i32 : i32, i32
  }
  func.func @transform_3(%arg0: i32) -> (i32, i32) {
    %c0_i32 = arith.constant 0 : i32
    %c0_i32_0 = arith.constant 0 : i32
    %c0_i32_1 = arith.constant 0 : i32
    return %c0_i32, %c0_i32_0 : i32, i32
  }
  func.func @transform_4(%arg0: i32) -> (i32, i32) {
    %c0_i32 = arith.constant 0 : i32
    %c0_i32_0 = arith.constant 0 : i32
    %c0_i32_1 = arith.constant 0 : i32
    return %c0_i32, %c0_i32_0 : i32, i32
  }
  func.func @transform_5(%arg0: i32) -> (i32, i32) {
    %c0_i32 = arith.constant 0 : i32
    %c0_i32_0 = arith.constant 0 : i32
    %c0_i32_1 = arith.constant 0 : i32
    return %c0_i32, %c0_i32_0 : i32, i32
  }
  func.func @transform_6(%arg0: i32) -> (i32, i32) {
    %c0_i32 = arith.constant 0 : i32
    %c0_i32_0 = arith.constant 0 : i32
    %c0_i32_1 = arith.constant 0 : i32
    return %c0_i32, %c0_i32_0 : i32, i32
  }
  func.func @transform_7(%arg0: i32) -> (i32, i32) {
    %c0_i32 = arith.constant 0 : i32
    %c0_i32_0 = arith.constant 0 : i32
    %c0_i32_1 = arith.constant 0 : i32
    return %c0_i32, %c0_i32_0 : i32, i32
  }
  func.func @transform_8(%arg0: i32) -> (i32, i32) {
    %c0_i32 = arith.constant 0 : i32
    %c0_i32_0 = arith.constant 0 : i32
    %c0_i32_1 = arith.constant 0 : i32
    return %c0_i32, %c0_i32_0 : i32, i32
  }
  func.func @transform_9(%arg0: i32) -> (i32, i32) {
    %c0_i32 = arith.constant 0 : i32
    %c0_i32_0 = arith.constant 0 : i32
    %c0_i32_1 = arith.constant 0 : i32
    return %c0_i32, %c0_i32_0 : i32, i32
  }
  func.func @transform_10(%arg0: i32) -> (i32, i32) {
    %c0_i32 = arith.constant 0 : i32
    %c0_i32_0 = arith.constant 0 : i32
    %c0_i32_1 = arith.constant 0 : i32
    return %c0_i32, %c0_i32_0 : i32, i32
  }
  func.func @transform_11(%arg0: i32) -> (i32, i32) {
    %c0_i32 = arith.constant 0 : i32
    %c0_i32_0 = arith.constant 0 : i32
    %c0_i32_1 = arith.constant 0 : i32
    return %c0_i32, %c0_i32_0 : i32, i32
  }
  func.func @transform_12(%arg0: i32) -> (i32, i32) {
    %c0_i32 = arith.constant 0 : i32
    %c0_i32_0 = arith.constant 0 : i32
    %c0_i32_1 = arith.constant 0 : i32
    return %c0_i32, %c0_i32_0 : i32, i32
  }
  func.func @transform_13(%arg0: i32) -> (i32, i32) {
    %c0_i32 = arith.constant 0 : i32
    %c0_i32_0 = arith.constant 0 : i32
    %c0_i32_1 = arith.constant 0 : i32
    return %c0_i32, %c0_i32_0 : i32, i32
  }
  func.func @transform_14(%arg0: i32) -> (i32, i32) {
    %c0_i32 = arith.constant 0 : i32
    %c0_i32_0 = arith.constant 0 : i32
    %c0_i32_1 = arith.constant 0 : i32
    return %c0_i32, %c0_i32_0 : i32, i32
  }
  func.func @transform_15(%arg0: i32) -> (i32, i32) {
    %c0_i32 = arith.constant 0 : i32
    %c0_i32_0 = arith.constant 0 : i32
    %c0_i32_1 = arith.constant 0 : i32
    return %c0_i32, %c0_i32_0 : i32, i32
  }
  func.func @transform_16(%arg0: i32) -> (i32, i32) {
    %c0_i32 = arith.constant 0 : i32
    %c0_i32_0 = arith.constant 0 : i32
    %c0_i32_1 = arith.constant 0 : i32
    return %c0_i32, %c0_i32_0 : i32, i32
  }
  func.func @transform_17(%arg0: i32) -> (i32, i32) {
    %c0_i32 = arith.constant 0 : i32
    %c0_i32_0 = arith.constant 0 : i32
    %c0_i32_1 = arith.constant 0 : i32
    return %c0_i32, %c0_i32_0 : i32, i32
  }
  func.func @transform_18(%arg0: i32) -> (i32, i32) {
    %c0_i32 = arith.constant 0 : i32
    %c0_i32_0 = arith.constant 0 : i32
    %c0_i32_1 = arith.constant 0 : i32
    return %c0_i32, %c0_i32_0 : i32, i32
  }
  func.func @transform_19(%arg0: i32) -> (i32, i32) {
    %c0_i32 = arith.constant 0 : i32
    %c0_i32_0 = arith.constant 0 : i32
    %c0_i32_1 = arith.constant 0 : i32
    return %c0_i32, %c0_i32_0 : i32, i32
  }
  func.func @transform_20(%arg0: i32) -> (i32, i32) {
    %c0_i32 = arith.constant 0 : i32
    %c0_i32_0 = arith.constant 0 : i32
    %c0_i32_1 = arith.constant 0 : i32
    return %c0_i32, %c0_i32_0 : i32, i32
  }
  func.func @transform_21(%arg0: i32) -> (i32, i32) {
    %c0_i32 = arith.constant 0 : i32
    %c0_i32_0 = arith.constant 0 : i32
    %c0_i32_1 = arith.constant 0 : i32
    return %c0_i32, %c0_i32_0 : i32, i32
  }
  func.func @transform_22(%arg0: i32) -> (i32, i32) {
    %c0_i32 = arith.constant 0 : i32
    %c0_i32_0 = arith.constant 0 : i32
    %c0_i32_1 = arith.constant 0 : i32
    return %c0_i32, %c0_i32_0 : i32, i32
  }
  func.func @transform_23(%arg0: i32) -> (i32, i32) {
    %c0_i32 = arith.constant 0 : i32
    %c0_i32_0 = arith.constant 0 : i32
    %c0_i32_1 = arith.constant 0 : i32
    return %c0_i32, %c0_i32_0 : i32, i32
  }
  func.func @transform_24(%arg0: i32) -> (i32, i32) {
    %c0_i32 = arith.constant 0 : i32
    %c0_i32_0 = arith.constant 0 : i32
    %c0_i32_1 = arith.constant 0 : i32
    return %c0_i32, %c0_i32_0 : i32, i32
  }
  func.func @transform_25(%arg0: i32) -> (i32, i32) {
    %c0_i32 = arith.constant 0 : i32
    %c0_i32_0 = arith.constant 0 : i32
    %c0_i32_1 = arith.constant 0 : i32
    return %c0_i32, %c0_i32_0 : i32, i32
  }
  func.func @transform_26(%arg0: i32) -> (i32, i32) {
    %c0_i32 = arith.constant 0 : i32
    %c0_i32_0 = arith.constant 0 : i32
    %c0_i32_1 = arith.constant 0 : i32
    return %c0_i32, %c0_i32_0 : i32, i32
  }
  func.func @transform_27(%arg0: i32) -> (i32, i32) {
    %c0_i32 = arith.constant 0 : i32
    %c0_i32_0 = arith.constant 0 : i32
    return %arg0, %c0_i32 : i32, i32
  }
}

</mosaic_0001>

<bundles_post_ra>
// kernel: custom-call
= control target key start
LH: loop header
LB: loop body
LE: loop exit
PB: predicated region body
PF: predicated region fallthrough
CT: control target
= control target key end

     0   :  { %s6_s0 = inlined_call_operand.vmem [shape: u32[3], index: 0, kind: output, shape index: {}]  }

// kernel: node_update_forward.4
= control target key start
LH: loop header
LB: loop body
LE: loop exit
PB: predicated region body
PF: predicated region fallthrough
CT: control target
= control target key end

     0   :  { %vm61_vm0 = vcmask 261120   ;;  %vm81_vm1 = vcmask 257024   ;;  %s462_s1 = inlined_call_operand.vmem [shape: bf16[32,32], index: 1, kind: input, shape index: {}]   ;;  %s463_s4 = inlined_call_operand.vmem [shape: bf16[32,32], index: 4, kind: input, shape index: {}]   ;;  %s464_s5 = inlined_call_operand.vmem [shape: bf16[32,32], index: 5, kind: input, shape index: {}]   ;;  %s465_s0 = inlined_call_operand.vmem [shape: f32[16,32], index: 0, kind: input, shape index: {}]   ;;  %s466_s7 = inlined_call_operand.vmem [shape: bf16[32,32], index: 7, kind: input, shape index: {}]   ;;  %s467_s3 = inlined_call_operand.vmem [shape: bf16[32,32], index: 3, kind: input, shape index: {}]   ;;  %s468_s2 = inlined_call_operand.vmem [shape: f32[1,32], index: 2, kind: input, shape index: {}]   ;;  %s469_s6 = inlined_call_operand.vmem [shape: f32[1,32], index: 6, kind: input, shape index: {}]   ;;  %s470_s8 = inlined_call_operand.vmem [shape: f32[1,32], index: 8, kind: input, shape index: {}]   ;;  %s471_s9 = inlined_call_operand.vmem [shape: bf16[16,32], index: 9, kind: output, shape index: {0}]   ;;  %s472_s10 = inlined_call_operand.vmem [shape: bf16[16,32], index: 10, kind: output, shape index: {1}]   ;;  %s473_s11 = inlined_call_operand.vmem [shape: bf16[16,32], index: 11, kind: output, shape index: {2}]   ;;  %s474_s12 = inlined_call_operand.vmem [shape: f32[16,32], index: 12, kind: output, shape index: {3}]   ;;  %s475_s13 = inlined_call_operand.vmem [shape: f32[16,32], index: 13, kind: output, shape index: {4}]  }
   0x1   :  { %v290_v0 = vld [vmem:[%s462_s1 + $0x8] sm:$0xff]  ;;  %v289_v3 = vld [vmem:[%s462_s1] sm:$0xff] }
   0x2   :  { %v294_v1 = vld [vmem:[%s463_s4 + $0x8] sm:$0xff]  ;;  %71 = vmatpush.bf16.msra.mxu0 %v290_v0  ;;  %v293_v4 = vld [vmem:[%s463_s4] sm:$0xff] }
   0x3   :  { %v296_v2 = vld [vmem:[%s464_s5 + $0x8] sm:$0xff]  ;;  %140 = vmatpush.bf16.msra.mxu2 %v294_v1  ;;  %v38_v5 = vld [vmem:[%s465_s0] sm:$0xff] }
   0x4   :  { %v39_v6 = vld [vmem:[%s465_s0 + $0x8] sm:$0xff]  ;;  %178 = vmatpush.bf16.msra.mxu3 %v296_v2  ;;  %v295_v7 = vld [vmem:[%s464_s5] sm:$0xff] }
   0x5   :  { %v298_v8 = vld [vmem:[%s466_s7 + $0x8] sm:$0xff]  ;;  %v40_v10 = vpack.c.bf16 %v39_v6, %v38_v5  ;;  %v291_v11 = vld [vmem:[%s467_s3] sm:$0xff] }
   0x6   :  { %v292_v9 = vld [vmem:[%s467_s3 + $0x8] sm:$0xff]  ;;  %72 = vmatpush.bf16.msra.mxu0 %v289_v3  ;;  %v297_v12 = vld [vmem:[%s466_s7] sm:$0xff] }
   0x7   :  { %106 = vmatpush.bf16.msra.mxu1 %v292_v9  ;;  %141 = vmatpush.bf16.msra.mxu2 %v293_v4  ;;  %v299_v13 = vld [vmem:[%s468_s2] ss:$0 sm:$0xff] }
   0x8   :  { %179 = vmatpush.bf16.msra.mxu3 %v295_v7  ;;  %v300_v18 = vld [vmem:[%s469_s6] ss:$0 sm:$0xff] }
   0x9   :  { %252 = vmatmul.msk.bf16.vlgmr.msra.gmra.mxu0 %vm61_vm0, %v40_v10  ;;  %v301_v29 = vld [vmem:[%s470_s8] ss:$0 sm:$0xff] }
   0xa   :  { %214 = vmatpush.bf16.msrb.mxu0 %v298_v8  ;;  %270 = vmatmul.msk.bf16.vlgmr.msra.gmra.mxu2 %vm61_vm0, %v40_v10 }
   0xb   :  { %279 = vmatmul.msk.bf16.vlgmr.msra.gmra.mxu3 %vm61_vm0, %v40_v10  ;;  %107 = vmatpush.bf16.msra.mxu1 %v291_v11 }
   0xe   :  { %215 = vmatpush.bf16.msrb.mxu0 %v297_v12  ;;  %261 = vmatmul.msk.bf16.vlgmr.msra.gmra.mxu1 %vm61_vm0, %v40_v10 }
  0x19   :  { %288 = vmatmul.msk.bf16.vlgmr.msrb.gmra.mxu0 %vm61_vm0, %v40_v10 }
  0x86   :  { %v74_v14 = vpop.f32.mrf.mxu0 }
  0x87   :  { %v75_v15 = vadd.f32 %v299_v13, %v74_v14 }
  0x89   :  { %v79_v16 = vpack.c.bf16 %v75_v15, %v75_v15 }
  0x8b   :  { %v109_v17 = vpop.f32.mrf.mxu1  ;;  %82 = vst.msk [vmem:[%s471_s9] sm:$0xf] %vm81_vm1, %v79_v16 }
  0x8c   :  { %v114_v19 = vpack.c.bf16 %v109_v17, %v109_v17 }
  0x8d   :  { %v143_v20 = vpop.f32.mrf.mxu2 }
  0x8e   :  { %116 = vst.msk [vmem:[%s472_s10] sm:$0xf] %vm81_vm1, %v114_v19  ;;  %v148_v21 = vpack.c.bf16 %v143_v20, %v143_v20  ;;  %v181_v22 = vpop.f32.mrf.mxu3  ;;  %v76_v23 = vpop.f32.mrf.mxu0 }
  0x8f   :  { %v182_v24 = vadd.f32 %v300_v18, %v181_v22  ;;  %v77_v25 = vadd.f32 %v299_v13, %v76_v23 }
  0x90   :  { %150 = vst.msk [vmem:[%s473_s11] sm:$0xf] %vm81_vm1, %v148_v21 }
  0x91   :  { %186 = vst.msk [vmem:[%s474_s12] sm:$0xff] %vm61_vm0, %v182_v24  ;;  %v80_v26 = vpack.c.bf16 %v77_v25, %v77_v25 }
  0x93   :  { %v111_v27 = vpop.f32.mrf.mxu1  ;;  %83 = vst.msk [vmem:[%s471_s9 + $0x4] sm:$0xf] %vm81_vm1, %v80_v26 }
  0x94   :  { %v115_v28 = vpack.c.bf16 %v111_v27, %v111_v27 }
  0x95   :  { %v145_v30 = vpop.f32.mrf.mxu2 }
  0x96   :  { %117 = vst.msk [vmem:[%s472_s10 + $0x4] sm:$0xf] %vm81_vm1, %v115_v28  ;;  %v149_v31 = vpack.c.bf16 %v145_v30, %v145_v30  ;;  %v183_v32 = vpop.f32.mrf.mxu3  ;;  %v217_v34 = vpop.f32.mrf.mxu0 }
  0x97   :  { %v184_v33 = vadd.f32 %v300_v18, %v183_v32  ;;  %v218_v35 = vadd.f32 %v301_v29, %v217_v34 }
  0x98   :  { %151 = vst.msk [vmem:[%s473_s11 + $0x4] sm:$0xf] %vm81_vm1, %v149_v31 }
  0x99   :  { %187 = vst.msk [vmem:[%s474_s12 + $0x8] sm:$0xff] %vm61_vm0, %v184_v33 }
  0x9a   :  { %222 = vst.msk [vmem:[%s475_s13] sm:$0xff] %vm61_vm0, %v218_v35 }
  0x9e   :  { %v219_v36 = vpop.f32.mrf.mxu0 }
  0x9f   :  { %v220_v37 = vadd.f32 %v301_v29, %v219_v36 }
  0xa1   :  { %223 = vst.msk [vmem:[%s475_s13 + $0x8] sm:$0xff] %vm61_vm0, %v220_v37 }

// kernel: node_update_forward.6
= control target key start
LH: loop header
LB: loop body
LE: loop exit
PB: predicated region body
PF: predicated region fallthrough
CT: control target
= control target key end

     0   :  { %vm25_vm0 = vcmask 253952   ;;  %vm54_vm1 = vcmask 261120   ;;  %v204_v0 = vmov -1e+30   ;;  %vm27_vm2 = vcmask 254976   ;;  %s282_s1 = inlined_call_operand.vmem [shape: f32[16,32], index: 1, kind: input, shape index: {}]   ;;  %s283_s0 = inlined_call_operand.vmem [shape: s32[1,16], index: 0, kind: input, shape index: {}]   ;;  %s284_s5 = inlined_call_operand.vmem [shape: f32[2,32], index: 5, kind: output, shape index: {}]   ;;  %s285_s2 = inlined_call_operand.vmem [shape: f32[16,32], index: 2, kind: input, shape index: {}]   ;;  %s286_s3 = inlined_call_operand.vmem [shape: f32[1,32], index: 3, kind: input, shape index: {}]   ;;  %s287_s4 = inlined_call_operand.vmem [shape: f32[1,32], index: 4, kind: input, shape index: {}]  }
   0x1   :  { %26 = vst.msk [vmem:[#allocation2] sm:$0x1] %vm25_vm0, %v204_v0  ;;  %v45_v1 = vld [vmem:[%s282_s1] sm:$0xff]  ;;  %v46_v2 = vld [vmem:[%s282_s1 + $0x8] sm:$0xff]  ;;  %v205_v7 = vmov 0.0   ;;  %v31_v17 = vlaneseq  ;;  %vm87_vm4 = vcmask 130048  }
   0x2   :  { %v55_v3 = vsel %vm54_vm1, %v45_v1, -inf  ;;  %v56_v4 = vsel %vm54_vm1, %v46_v2, -inf  ;;  %28 = vst.msk [vmem:[#allocation3] sm:$0x3] %vm27_vm2, %v205_v7  ;;  %v189_v23 = vld [vmem:[%s283_s0] ss:$0 sm:$0xff] }
   0x3   :  { %v57_v5 = vmax.f32 %v55_v3, %v56_v4  ;;  %29 = vst.msk [vmem:[%s284_s5] sm:$0x3] %vm27_vm2, %v205_v7  ;;  %v32_v22 = vshrl.u32 %v31_v17, 7  ;;  %v109_v24 = vld [vmem:[%s285_s2] sm:$0xff]  ;;  %v110_v25 = vld [vmem:[%s285_s2 + $0x8] sm:$0xff]  ;;  %v206_v53 = vmov 32.0  }
   0x5   :  { %v58_v6 = vrot.slane %v57_v5, 4  ;;  %vm34_vm3 = vcmp.eq.s32.totalorder %v189_v23, %v32_v22 }
   0x6   :  { %v183_v27 = vsel %vm34_vm3, 1.0, %v205_v7 }
   0x7   :  { %v59_v8 = vmax.f32 %v57_v5, %v58_v6  ;;  %v37_v32 = vpack.c.bf16 %v183_v27, %v183_v27 }
   0x8   :  { %v53_v12 = vld [vmem:[#allocation2] sm:$0x1] }
   0x9   :  { %v60_v9 = vrot.slane %v59_v8, 2  ;;  %v81_v37 = vld [vmem:[#allocation3] sm:$0x3] }
   0xa   :  { %v107_v38 = vld [vmem:[%s284_s5] sm:$0x3] }
   0xb   :  { %v61_v10 = vmax.f32 %v59_v8, %v60_v9 }
   0xd   :  { %v62_v11 = vrot.slane %v61_v10, 1 }
   0xf   :  { %v63_v13 = vmax.f32 %v61_v10, %v62_v11  ;;  %v190_v10 = vld [vmem:[%s286_s3] ss:$0 sm:$0xff] }
  0x11   :  { %v64_v14 = vmax.f32 %v53_v12, %v63_v13 }
  0x13   :  { %v69_v15 = vperm.slane %v64_v14, 0  ;;  %130 = vst.msk [vmem:[#allocation2] sm:$0x1] %vm25_vm0, %v64_v14  ;;  %v65_v16 = vsub.f32 %v53_v12, %v64_v14  ;;  %v191_v12 = vld [vmem:[%s287_s4] ss:$0 sm:$0xff] }
  0x15   :  { %v71_v18 = vsub.f32 %v45_v1, %v69_v15  ;;  %v72_v19 = vsub.f32 %v46_v2, %v69_v15  ;;  %v66_v34 = vmul.f32 1.442695, %v65_v16 }
  0x17   :  { %v73_v20 = vmul.f32 1.442695, %v71_v18  ;;  %v75_v21 = vmul.f32 1.442695, %v72_v19 }
  0x19   :  { %192 = vpow2.f32 %v73_v20 }
  0x1a   :  { %194 = vpow2.f32 %v75_v21 }
  0x1b   :  { %196 = vpow2.f32 %v66_v34 }
  0x1f   :  { %v193_v26 = vpop.eup %192 }
  0x20   :  { %v195_v28 = vpop.eup %194  ;;  %v111_v29 = vmul.f32 %v193_v26, %v109_v24 }
  0x21   :  { %v86_v30 = vpack.c.bf16 %v195_v28, %v193_v26  ;;  %v112_v31 = vmul.f32 %v195_v28, %v110_v25  ;;  %v197_v35 = vpop.eup %196 }
  0x22   :  { %v83_v36 = vperm.slane %v197_v35, 0 }
  0x23   :  { %98 = vmatpush.bf16.msra.mxu0 %v86_v30  ;;  %v113_v33 = vpack.c.bf16 %v112_v31, %v111_v29 }
  0x24   :  { %v85_v39 = vmul.f32 %v83_v36, %v81_v37  ;;  %v108_v40 = vmul.f32 %v107_v38, %v83_v36 }
  0x25   :  { %121 = vmatpush.bf16.msra.mxu1 %v113_v33 }
  0x26   :  { %184 = vmatmul.msk.bf16.vlgmr.msra.gmra.mxu0 %vm87_vm4, %v37_v32 }
  0x28   :  { %185 = vmatmul.msk.bf16.vlgmr.msra.gmra.mxu1 %vm87_vm4, %v37_v32 }
  0xa3   :  { %v100_v41 = vpop.f32.mrf.mxu0 }
  0xa4   :  { %v104_v42 = vadd.f32 %v100_v41, %v85_v39 }
  0xa5   :  { %v123_v43 = vpop.f32.mrf.mxu1 }
  0xa6   :  { %106 = vst.msk [vmem:[#allocation3] sm:$0x3] %vm27_vm2, %v104_v42  ;;  %v127_v44 = vadd.f32 %v123_v43, %v108_v40 }
  0xa8   :  { %128 = vst.msk [vmem:[%s284_s5] sm:$0x3] %vm27_vm2, %v127_v44 }
  0xab   :  { %v102_v45 = vpop.f32.mrf.mxu0 }
  0xad   :  { %v125_v46 = vpop.f32.mrf.mxu1  ;;  %v135_v47 = vld [vmem:[#allocation3] sm:$0x3] }
  0xae   :  { %v136_v48 = vadd.f32 1e-07, %v135_v47 }
  0xaf   :  { %v134_v49 = vld [vmem:[%s284_s5] sm:$0x3] }
  0xb0   :  { %198 = vrcp.f32 %v136_v48 }
  0xb1   :  { %200 = vrcp.f32 %v206_v53 }
  0xb6   :  { %v199_v50 = vpop.eup %198 }
  0xb7   :  { %v138_v51 = vmul.f32 %v199_v50, %v134_v49  ;;  %v201_v54 = vpop.eup %200 }
  0xb8   :  { %v145_v55 = vmul.f32 32.0, %v201_v54  ;;  %vm149_vm5 = vweird.f32 %v201_v54 }
  0xb9   :  { %v141_v52 = vsel %vm27_vm2, %v138_v51, 0.0 }
  0xba   :  { %142 = vadd.xlane.f32.xlu0 %v141_v52  ;;  %v146_v56 = vsub.f32 1.0, %v145_v55 }
  0xbc   :  { %v147_v57 = vmul.f32 %v201_v54, %v146_v56 }
  0xbe   :  { %v148_v58 = vadd.f32 %v201_v54, %v147_v57 }
  0xc0   :  { %v150_v59 = vsel %vm149_vm5, %v201_v54, %v148_v58 }
 0x12d   :  { %v143_v60 = vpop.xlane.xlu0 %142 }
 0x12e   :  { %v151_v61 = vmul.f32 %v150_v59, %v143_v60 }
 0x130   :  { %v152_v62 = vsub.f32 %v138_v51, %v151_v61 }
 0x132   :  { %v153_v63 = vmul.f32 %v152_v62, %v152_v62 }
 0x134   :  { %v154_v0 = vsel %vm27_vm2, %v153_v63, 0.0 }
 0x135   :  { %155 = vadd.xlane.f32.xlu0 %v154_v0 }
 0x1a8   :  { %v156_v1 = vpop.xlane.xlu0 %155 }
 0x1a9   :  { %v157_v2 = vmul.f32 %v156_v1, %v150_v59 }
 0x1ab   :  { %v158_v3 = vadd.f32 1e-05, %v157_v2 }
 0x1ad   :  { %202 = vrsqrt.f32 %v158_v3  ;;  %vm165_vm7 = vweird.f32 %v158_v3 }
 0x1b3   :  { %v203_v4 = vpop.eup %202 }
 0x1b4   :  { %v160_v5 = vmul.f32 %v203_v4, %v158_v3  ;;  %vm166_vm6 = vweird.f32 %v203_v4 }
 0x1b5   :  { %vm167_vm8 = vmor %vm165_vm7, %vm166_vm6 }
 0x1b6   :  { %v161_v6 = vmul.f32 %v203_v4, %v160_v5 }
 0x1b8   :  { %v162_v7 = vmul.f32 0.5, %v161_v6 }
 0x1ba   :  { %v163_v8 = vsub.f32 1.5, %v162_v7 }
 0x1bc   :  { %v164_v9 = vmul.f32 %v203_v4, %v163_v8 }
 0x1be   :  { %v168_v11 = vsel %vm167_vm8, %v203_v4, %v164_v9 }
 0x1bf   :  { %v169_v13 = vmul.f32 %v168_v11, %v152_v62 }
 0x1c1   :  { %v173_v14 = vmul.f32 %v190_v10, %v169_v13 }
 0x1c3   :  { %v177_v15 = vadd.f32 %v191_v12, %v173_v14 }
 0x1c5   :  { %178 = vst.msk [vmem:[%s284_s5] sm:$0x3] %vm27_vm2, %v177_v15 }

// kernel: node_update_forward.5
= control target key start
LH: loop header
LB: loop body
LE: loop exit
PB: predicated region body
PF: predicated region fallthrough
CT: control target
= control target key end

     0   :  { %s1682_s12 = smov [#allocation5]   ;;  %s2126_s0 = inlined_call_operand.vmem [shape: s32[5,3], index: 0, kind: input, shape index: {}]   ;;  %s2127_s1 = inlined_call_operand.vmem [shape: s32[1,32], index: 1, kind: input, shape index: {}]   ;;  %s2128_s2 = inlined_call_operand.vmem [shape: bf16[16,32], index: 2, kind: input, shape index: {}]   ;;  %s2129_s3 = inlined_call_operand.vmem [shape: bf16[32,32], index: 3, kind: input, shape index: {}]   ;;  %s2130_s4 = inlined_call_operand.vmem [shape: bf16[32,32], index: 4, kind: input, shape index: {}]   ;;  %s2131_s5 = inlined_call_operand.vmem [shape: bf16[32,32], index: 5, kind: input, shape index: {}]   ;;  %s2132_s6 = inlined_call_operand.vmem [shape: f32[1,32], index: 6, kind: input, shape index: {}]   ;;  %s2133_s7 = inlined_call_operand.vmem [shape: bf16[32,32], index: 7, kind: input, shape index: {}]   ;;  %s2134_s8 = inlined_call_operand.vmem [shape: f32[1,32], index: 8, kind: input, shape index: {}]   ;;  %s2135_s9 = inlined_call_operand.vmem [shape: f32[16,32], index: 9, kind: output, shape index: {}]  }
   0x1   :  { %s15_s11 = sshll.u32 %s2126_s0, 4  ;;  %s16_s11 = int_to_ptr.vmem [resolvable:$true] %s15_s11 }
   0x2   :  { %18 = dma.vmem_to_smem %s16_s11, 128, %s1682_s12, [#allocation4] }
   0x3   :  { %1676 = dma.done.wait [#allocation4], 128 }
   0x4   :  { %1677 = vsyncadd [#allocation4], 4294967168 }
   0x5   :  { %21 = sfence }
   0x6   :  { %s1753_s13 = smov 0  }
   0x7 LB: > { %s1759_s14 = sadd.s32 4294967295, %s1680_s13   ;;  %p1474_p0 = scmp.ge.s32.totalorder %s1680_s13, 1  ;;  %s1680_s13 = sphi %s1753_s13, %s27_s13  }
   0x8   : > { %p404_p1 = scmp.lt.s32.totalorder %s1680_s13, 4 }
   0xa   : > { %p405_p2 = pnand %p1474_p0, %p404_p1 }
   0xb   : > { %s477_s0 = sshra.s32 (!%p405_p2), %s1759_s14, 7  ;;  %s1765_s15 = sand.u32 (!%p405_p2), 127, %s1759_s14 }
   0xc   : > { %408 = sbr.rel (%p405_p2) target bundleno = 1558 (0x616), region = 52  ;;  %s1767_s16 = sshll.u32 (!%p405_p2), %s477_s0, 7 }
   0xd   : > { %s496_s17 = sld [smem:[#allocation5 + %s1759_s14]] (!%p405_p2)  ;;  %s1550_s18 = sadd.s32 (!%p405_p2), 128, %s1767_s16 }
   0xe   : > { %s548_s19 = sld [smem:[#allocation5 + %s1759_s14]] (!%p405_p2)  ;;  %s483_s20 = sadd.s32 (!%p405_p2), %s1550_s18, %s1765_s15 }
   0xf   : > { %s1556_s21 = sadd.s32 (!%p405_p2), 256, %s1767_s16  ;;  %s484_s22 = sld [smem:[#allocation5 + %s483_s20]] (!%p405_p2) }
  0x10   : > { %s563_s23 = sadd.s32 (!%p405_p2), %s1556_s21, %s1765_s15  ;;  %s511_s24 = sld [smem:[#allocation5 + %s483_s20]] (!%p405_p2) }
  0x11   : > { %s533_s25 = sld [smem:[#allocation5 + %s483_s20]] }
  0x12   : > { %s564_s27 = sld [smem:[#allocation5 + %s563_s23]] }
  0x13   : > { %s1476_s26 = sshll.u32 %s496_s17, 1 }
  0x14   : > { %p498_p3 = scmp.lt.s32.totalorder %s1476_s26, 1  ;;  %s1484_s28 = sshll.u32 %s548_s19, 1 }
  0x15   : > { %p485_p4 = scmp.lt.s32.totalorder %s484_s22, 0  ;;  %p550_p7 = scmp.lt.s32.totalorder %s1484_s28, 1 }
  0x16   : > { %s2142_s26 = smov (!%p498_p3, %s1476_s26), 1  ;;  %s1479_s30 = sshll.u32 %s511_s24, 2 }
  0x17   : > { %s2144_s22 = smov (!%p485_p4, %s484_s22), 0  ;;  %s1477_s29 = sshll.u32 %s2142_s26, 2 }
  0x18   : > { %s1784_s21 = scalar_lea.vmem %s2128_s2, %s1477_s29  ;;  %p513_p5 = scmp.lt.s32.totalorder %s1479_s30, 3 }
  0x19   : > { %s1482_s17 = sshll.u32 %s533_s25, 2  ;;  %s2150_s28 = smov (!%p550_p7, %s1484_s28), 1 }
  0x1a   : > { %p535_p6 = scmp.lt.s32.totalorder %s1482_s17, 3  ;;  %s2146_s30 = smov (!%p513_p5, %s1479_s30), 3 }
  0x1b   : > { %s1480_s19 = sshll.u32 %s2146_s30, 2  ;;  %s1485_s29 = sshll.u32 %s2150_s28, 3 }
  0x1c   : > { %s2148_s17 = smov (!%p535_p6, %s1482_s17), 3  ;;  %s1789_s24 = scalar_lea.vmem %s2129_s3, %s1480_s19 }
  0x1d   : > { %s1483_s26 = sshll.u32 %s2148_s17, 2  ;;  %s1799_s18 = scalar_lea.vmem %s2135_s9, %s1485_s29 }
  0x1e   : > { %s1794_s12 = scalar_lea.vmem %s2130_s4, %s1483_s26  ;;  %p1487_p8 = scmp.ne.s32.totalorder %s564_s27, 1 }
  0x20   : > { %568 = sbr.rel (%p1487_p8) target bundleno = 44 (0x2c), region = 56 }
  0x25   : > { %vm574_vm0 = vcmask 261120   ;;  %vm569_vm1 = vcmask 31744   ;;  %v1683_v0 = vmov 0.0   ;;  %v1684_v1 = vmov -1e+30  }
  0x26   : > { %575 = vst.msk [vmem:[%s1799_s18] sm:$0xff] %vm574_vm0, %v1683_v0 }
  0x27   : > { %576 = vst.msk [vmem:[%s1799_s18 + $0x8] sm:$0xff] %vm574_vm0, %v1683_v0 }
  0x28   : > { %570 = vst.msk [vmem:[#allocation2] sm:$0xff] %vm569_vm1, %v1684_v1 }
  0x29   : > { %571 = vst.msk [vmem:[#allocation2 + $0x8] sm:$0xff] %vm569_vm1, %v1684_v1 }
  0x2a   : > { %572 = vst.msk [vmem:[#allocation3] sm:$0xff] %vm569_vm1, %v1683_v0 }
  0x2b   : > { %573 = vst.msk [vmem:[#allocation3 + $0x8] sm:$0xff] %vm569_vm1, %v1683_v0 }
  0x2c PF: > { %s1558_s28 = sadd.s32 512, %s1767_s16 }
  0x2d   : > { %s579_s30 = sadd.s32 %s1558_s28, %s1765_s15 }
  0x2e   : > { %s580_s17 = sld [smem:[#allocation5 + %s579_s30]] }
  0x34   : > { %p1489_p9 = scmp.ne.s32.totalorder %s580_s17, 1 }
  0x35   : > { %s2136_s20 = scalar_lea.vmem (!%p1489_p9), %s2127_s1, %s2144_s22  ;;  %s1693_s22 = smov (!%p1489_p9), 8  }
  0x36   : > { %584 = sbr.rel (%p1489_p9) target bundleno = 1377 (0x561), region = 60  ;;  %s1694_s23 = smov (!%p1489_p9), 16  }
  0x37   : > { %s1695_s26 = smov (!%p1489_p9), 24  }
  0x3b   : > { %v1562_v2 = vld [vmem:[%s2131_s5 + $0x8] sm:$0xff]  ;;  %v1561_v4 = vld [vmem:[%s2131_s5] sm:$0xff]  ;;  %vm619_vm2 = vcmask 261120   ;;  %vm740_vm3 = vcmask 64512   ;;  %vm814_vm6 = vcmask 7168   ;;  %vm946_vm7 = vcmask 15368  }
  0x3c   : > { %v1564_v3 = vld [vmem:[%s2133_s7 + $0x8] sm:$0xff]  ;;  %632 = vmatpush.bf16.msra.mxu0 %v1562_v2  ;;  %v1563_v5 = vld [vmem:[%s2133_s7] sm:$0xff]  ;;  %v715_v2 = vlaneseq  ;;  %vm1081_vm8 = vcmask 23568   ;;  %vm1216_vm9 = vcmask 31768   ;;  %vm997_vm10 = vcmask 130112  }
  0x3d   : > { %675 = vmatpush.bf16.msra.mxu1 %v1564_v3  ;;  %v1559_v6 = vld [vmem:[%s1789_s24] sm:$0xff]  ;;  %v1560_v7 = vld [vmem:[%s1789_s24 + $0x8] sm:$0xff]  ;;  %s1685_s24 = smov 120   ;;  %vm1132_vm11 = vcmask 195712   ;;  %vm1267_vm12 = vcmask 261312  }
  0x3e   : > { %v1617_v11 = vld [vmem:[%s2132_s6] ss:$0 sm:$0xff]  ;;  %v1576_v29 = vld [vmem:[%s1794_s12 + $0x8] sm:$0xff]   ;;  %v716_v3 = vshrl.u32 %v715_v2, 7 }
  0x3f   : > { %v1569_v31 = vld [vmem:[%s1794_s12] sm:$0xff]   ;;  %v1574_v32 = vunpack.c.l.bf16 %v1576_v29  ;;  %v1575_v43 = vunpack.c.h.bf16 %v1576_v29  ;;  %s1686_s12 = smov 104  }
  0x40   : > { %633 = vmatpush.bf16.msra.mxu0 %v1561_v4  ;;  %v1570_v33 = vunpack.c.l.bf16 %v1569_v31  ;;  %v1571_v34 = vunpack.c.h.bf16 %v1569_v31  ;;  %v1618_v37 = vld [vmem:[%s2134_s8] ss:$0 sm:$0xff] }
  0x41   : > { %676 = vmatpush.bf16.msra.mxu1 %v1563_v5  ;;  %v1844_v41 = vld [vmem:[%s1784_s21] sm:$0xff]  ;;  %s710_s21 = sld [smem:[#allocation5 + %s1759_s14]]  ;;  %s1688_s14 = smov 112  }
  0x42   : > { %v712_v63 = vld [vmem:[%s2136_s20] sm:$0x1] }
  0x43   : > { %1506 = vmatmul.msk.bf16.vlgmr.msra.gmra.mxu0 %vm619_vm2, %v1559_v6 }
  0x44   : > { %1516 = vmatmul.msk.bf16.vlgmr.msra.gmra.mxu1 %vm619_vm2, %v1559_v6  ;;  %v1690_v6 = vmov 1  }
  0x45   : > { %1605 = vset.pattern.permute.xlu0 %v1690_v6 }
  0x47   : > { %s1518_s17 = sshll.u32 %s710_s21, 4 }
  0x48   : > { %v713_v0 = vstv %s1518_s17 }
  0x49   : > { %v714_v1 = vsub.s32 %v712_v63, %v713_v0 }
  0x4b   : > { %v718_v4 = vperm.slane %v714_v1, 0 }
  0x4d   : > { %vm1868_vm4 = vcmp.eq.s32.totalorder %v718_v4, %v716_v3 }
  0x53   : > { %1507 = vmatmul.msk.bf16.gmra.mxu0 %vm619_vm2, %v1560_v7 }
  0x54   : > { %1517 = vmatmul.msk.bf16.gmra.mxu1 %vm619_vm2, %v1560_v7 }
  0xc0   : > { %v635_v8 = vpop.f32.mrf.mxu0 }
  0xc1   : > { %v678_v17 = vpop.f32.mrf.mxu1  ;;  %v636_v18 = vadd.f32 %v1617_v11, %v635_v8 }
  0xc2   : > { %v688_v39 = vadd.f32 %v1570_v33, %v678_v17  ;;  %v1885_v17 = vld [vmem:[#allocation2] sm:$0xff] }
  0xc3   : > { %v700_v23 = vpack.c.bf16 %v636_v18, %v636_v18 }
  0xc4   : > { %v696_v44 = vadd.f32 %v1618_v37, %v688_v39 }
  0xc5   : > { %v734_v28 = vunpack.c.l.b16 %v700_v23 }
  0xc6   : > { %v704_v49 = vpack.c.bf16 %v696_v44, %v696_v44 }
  0xc8   : > { %v637_v9 = vpop.f32.mrf.mxu0  ;;  %v836_v54 = vunpack.c.l.b16 %v704_v49 }
  0xc9   : > { %v638_v14 = vadd.f32 %v1617_v11, %v637_v9  ;;  %v680_v27 = vpop.f32.mrf.mxu1 }
  0xca   : > { %v689_v40 = vadd.f32 %v1571_v34, %v680_v27 }
  0xcb   : > { %v701_v20 = vpack.c.bf16 %v638_v14, %v638_v14 }
  0xcc   : > { %v697_v45 = vadd.f32 %v1618_v37, %v689_v40 }
  0xcd   : > { %v735_v25 = vunpack.c.l.b16 %v701_v20 }
  0xce   : > { %v705_v50 = vpack.c.bf16 %v697_v45, %v697_v45 }
  0xcf   : > { %v1833_v30 = vpack.c.b16 %v735_v25, %v734_v28 }
  0xd0   : > { %v640_v10 = vpop.f32.mrf.mxu0  ;;  %v837_v55 = vunpack.c.l.b16 %v705_v50 }
  0xd1   : > { %v641_v12 = vadd.f32 %v1617_v11, %v640_v10  ;;  %v745_v35 = vsel %vm740_vm3, %v1833_v30, 0  ;;  %v683_v36 = vpop.f32.mrf.mxu1  ;;  %v717_v10 = vadd.s32 8, %v716_v3 }
  0xd2   : > { %v690_v38 = vadd.f32 %v1574_v32, %v683_v36  ;;  %v1854_v58 = vpack.c.b16 %v837_v55, %v836_v54  ;;  %v1689_v36 = vmov 0.0  }
  0xd3   : > { %v702_v15 = vpack.c.bf16 %v641_v12, %v641_v12  ;;  %vm1875_vm5 = vcmp.eq.s32.totalorder %v718_v4, %v717_v10 }
  0xd4   : > { %v698_v42 = vadd.f32 %v1618_v37, %v690_v38 }
  0xd5   : > { %v736_v21 = vunpack.c.l.b16 %v702_v15 }
  0xd6   : > { %v706_v47 = vpack.c.bf16 %v698_v42, %v698_v42 }
  0xd8   : > { %v642_v13 = vpop.f32.mrf.mxu0  ;;  %v838_v52 = vunpack.c.l.b16 %v706_v47 }
  0xd9   : > { %v643_v16 = vadd.f32 %v1617_v11, %v642_v13  ;;  %v685_v46 = vpop.f32.mrf.mxu1 }
  0xda   : > { %v691_v48 = vadd.f32 %v1575_v43, %v685_v46 }
  0xdb   : > { %v703_v19 = vpack.c.bf16 %v643_v16, %v643_v16  ;;  %v1687_v16 = vmov 0  }
  0xdc   : > { %v699_v51 = vadd.f32 %v1618_v37, %v691_v48  ;;  %1603 = vset.pattern.permute.xlu1 %v1687_v16 }
  0xdd   : > { %v737_v22 = vunpack.c.l.b16 %v703_v19 }
  0xde   : > { %v707_v53 = vpack.c.bf16 %v699_v51, %v699_v51 }
  0xdf   : > { %v1826_v24 = vpack.c.b16 %v737_v22, %v736_v21  ;;  %v1895_v21 = vld [vmem:[#allocation2 + $0x8] sm:$0xff] }
  0xe0   : > { %v839_v56 = vunpack.c.l.b16 %v707_v53 }
  0xe1   : > { %871 = vrot.lane.b32.xlu2 %v1826_v24, %s1685_s24  ;;  %v748_v26 = vsel %vm740_vm3, %v1826_v24, 0 }
  0xe2   : > { %756 = vmatpush.bf16.xpose.msra.mxu2 %v748_v26  ;;  %v1852_v57 = vpack.c.b16 %v839_v56, %v838_v52 }
  0xe4   : > { %853 = vmatpush.bf16.msra.mxu3 %v1852_v57 }
  0xe8   : > { %854 = vmatpush.bf16.msra.mxu3 %v1854_v58 }
  0xe9   : > { %869 = vrot.lane.b32.xlu2 %v1833_v30, %s1685_s24 }
  0xea   : > { %757 = vmatpush.bf16.xpose.msra.mxu2 %v745_v35 }
  0xf1   : > { %1141 = vrot.lane.b32.xlu2 %v1826_v24, %s1686_s12  ;;  %1525 = vmatmul.msk.bf16.vlgmr.msra.gmra.mxu2 %vm740_vm3, %v1844_v41 }
  0xf9   : > { %1139 = vrot.lane.b32.xlu2 %v1833_v30, %s1686_s12 }
 0x101   : > { %1137 = vrot.lane.b32.xlu2 %v1844_v41, %s1686_s12 }
 0x13b   : > { %v872_v59 = vpop.permute.xlu2 %871 }
 0x13c   : > { %v880_v60 = vsel %vm740_vm3, %v872_v59, 0 }
 0x13d   : > { %888 = vmatpush.bf16.xpose.msrb.mxu3 %v880_v60 }
 0x143   : > { %v870_v61 = vpop.permute.xlu2 %869 }
 0x144   : > { %v877_v62 = vsel %vm740_vm3, %v870_v61, 0 }
 0x145   : > { %889 = vmatpush.bf16.xpose.msrb.mxu3 %v877_v62 }
 0x14b   : > { %v1142_v38 = vpop.permute.xlu2 %1141 }
 0x14c   : > { %v1150_v42 = vsel %vm740_vm3, %v1142_v38, 0 }
 0x153   : > { %v1140_v45 = vpop.permute.xlu2 %1139 }
 0x154   : > { %v1147_v46 = vsel %vm740_vm3, %v1140_v45, 0 }
 0x15b   : > { %v1138_v49 = vpop.permute.xlu2 %1137 }
 0x174   : > { %v759_v5 = vpop.f32.mrf.mxu2 }
 0x175   : > { %v764_v7 = vmul.f32 0.35355338, %v759_v5 }
 0x177   : > { %v766_v8 = vsel %vm1868_vm4, %v764_v7, -1e+30 }
 0x178   : > { %v770_v9 = vsel %vm619_vm2, %v766_v8, -inf }
 0x179   : > { %771 = vmax.xlane.f32.xlu0 %v770_v9 }
 0x17c   : > { %v761_v11 = vpop.f32.mrf.mxu2 }
 0x17d   : > { %v765_v13 = vmul.f32 0.35355338, %v761_v11 }
 0x17f   : > { %v767_v14 = vsel %vm1875_vm5, %v765_v13, -1e+30 }
 0x180   : > { %v773_v15 = vsel %vm619_vm2, %v767_v14, -inf }
 0x181   : > { %774 = vmax.xlane.f32.xlu0 %v773_v15 }
 0x195   : > { %867 = vrot.lane.b32.xlu0 %v1844_v41, %s1685_s24 }
 0x1ec   : > { %v772_v18 = vpop.xlane.xlu0 %771 }
 0x1ed   : > { %v1888_v19 = vmax.f32 %v1885_v17, %v772_v18 }
 0x1ef   : > { %v778_v20 = vsub.f32 %v1885_v17, %v1888_v19  ;;  %865 = vst.msk [vmem:[#allocation2] sm:$0xff] %vm814_vm6, %v1888_v19  ;;  %786 = vperm.xlu1 %1603, %v1888_v19  }
 0x1f4   : > { %v775_v22 = vpop.xlane.xlu0 %774 }
 0x1f5   : > { %v1898_v23 = vmax.f32 %v1895_v21, %v775_v22 }
 0x1f6   : > { %v900_v38 = vld [vmem:[#allocation2] sm:$0xff] }
 0x1f7   : > { %v779_v25 = vsub.f32 %v1895_v21, %v1898_v23  ;;  %866 = vst.msk [vmem:[#allocation2 + $0x8] sm:$0xff] %vm814_vm6, %v1898_v23  ;;  %791 = vperm.xlu1 %1603, %v1898_v23   ;;  %v802_v23 = vld [vmem:[#allocation3] sm:$0xff] }
 0x1fe   : > { %v1987_v19 = vld [vmem:[#allocation2 + $0x8] sm:$0xff] }
 0x1ff   : > { %1006 = vrot.lane.b32.xlu1 %v1826_v24, %s1688_s14  ;;  %v1914_v24 = vsel %vm1868_vm4, 1.0, %v1689_v36 }
 0x200   : > { %1604 = vset.pattern.permute.xlu1 %v1690_v6 }
 0x207   : > { %1004 = vrot.lane.b32.xlu1 %v1833_v30, %s1688_s14  ;;  %v1918_v30 = vsel %vm1875_vm5, 1.0, %v1689_v36  ;;  %v868_v48 = vpop.permute.xlu0 %867 }
 0x20f   : > { %1002 = vrot.lane.b32.xlu1 %v1844_v41, %s1688_s14 }
 0x261   : > { %v787_v26 = vpop.permute.xlu1 %786 }
 0x262   : > { %v794_v27 = vsub.f32 %v766_v8, %v787_v26  ;;  %v782_v26 = vmul.f32 1.442695, %v779_v25 }
 0x264   : > { %v796_v28 = vmul.f32 1.442695, %v794_v27  ;;  %v780_v27 = vmul.f32 1.442695, %v778_v20 }
 0x266   : > { %1619 = vpow2.f32 %v796_v28 }
 0x269   : > { %v792_v29 = vpop.permute.xlu1 %791 }
 0x26a   : > { %v795_v31 = vsub.f32 %v767_v14, %v792_v29  ;;  %v803_v29 = vld [vmem:[#allocation3 + $0x8] sm:$0xff] }
 0x26c   : > { %v798_v32 = vmul.f32 1.442695, %v795_v31  ;;  %v1620_v34 = vpop.eup %1619  ;;  %v1691_v31 = vmov 2  }
 0x26d   : > { %v800_v39 = vmul.f32 %v1620_v34, %v1914_v24  ;;  %1606 = vset.pattern.permute.xlu2 %v1691_v31 }
 0x26e   : > { %1621 = vpow2.f32 %v798_v32 }
 0x26f   : > { %v806_v0 = vsel %vm619_vm2, %v800_v39, 0.0  ;;  %1623 = vpow2.f32 %v782_v26 }
 0x270   : > { %1625 = vpow2.f32 %v780_v27 }
 0x271   : > { %v1007_v33 = vpop.permute.xlu1 %1006 }
 0x272   : > { %v1015_v35 = vsel %vm740_vm3, %v1007_v33, 0 }
 0x273   : > { %1023 = vmatpush.bf16.xpose.msrb.mxu0 %v1015_v35 }
 0x274   : > { %v1622_v37 = vpop.eup %1621 }
 0x275   : > { %v801_v40 = vmul.f32 %v1622_v37, %v1918_v30  ;;  %v1981_v28 = vpop.eup %1623 }
 0x276   : > { %v805_v32 = vmul.f32 %v1981_v28, %v803_v29  ;;  %v1626_v21 = vpop.eup %1625 }
 0x277   : > { %v831_v41 = vpack.c.bf16 %v801_v40, %v800_v39  ;;  %v809_v61 = vsel %vm619_vm2, %v801_v40, 0.0  ;;  %v804_v25 = vmul.f32 %v1626_v21, %v802_v23 }
 0x279   : > { %1526 = vmatmul.msk.bf16.vlgmr.msra.gmra.mxu3 %vm619_vm2, %v831_v41  ;;  %v1005_v43 = vpop.permute.xlu1 %1004 }
 0x27a   : > { %1158 = vmatpush.bf16.xpose.msra.mxu3 %v1150_v42  ;;  %v1012_v44 = vsel %vm740_vm3, %v1005_v43, 0 }
 0x27b   : > { %1024 = vmatpush.bf16.xpose.msrb.mxu0 %v1012_v44 }
 0x281   : > { %v1003_v47 = vpop.permute.xlu1 %1002 }
 0x282   : > { %1159 = vmatpush.bf16.xpose.msra.mxu3 %v1147_v46  ;;  %1529 = vmatmul.msk.bf16.vlgmr.msrb.gmra.mxu0 %vm740_vm3, %v1003_v47 }
 0x289   : > { %1527 = vmatmul.msk.bf16.vlgmr.msrb.gmra.mxu3 %vm740_vm3, %v868_v48 }
 0x299   : > { %1531 = vmatmul.msk.bf16.vlgmr.msra.gmra.mxu3 %vm740_vm3, %v1138_v49 }
 0x2fc   : > { %v1929_v50 = vpop.f32.mrf.mxu3 }
 0x2ff   : > { %v1026_v51 = vpop.f32.mrf.mxu0 }
 0x300   : > { %v1031_v52 = vmul.f32 0.35355338, %v1026_v51 }
 0x302   : > { %v1933_v53 = vsel %vm1868_vm4, %v1031_v52, -1e+30 }
 0x303   : > { %v1037_v54 = vsel %vm619_vm2, %v1933_v53, -inf }
 0x304   : > { %v1937_v55 = vpop.f32.mrf.mxu3  ;;  %1038 = vmax.xlane.f32.xlu2 %v1037_v54 }
 0x307   : > { %v1028_v56 = vpop.f32.mrf.mxu0 }
 0x308   : > { %v1032_v59 = vmul.f32 0.35355338, %v1028_v56 }
 0x30a   : > { %v1941_v60 = vsel %vm1875_vm5, %v1032_v59, -1e+30 }
 0x30b   : > { %v1040_v62 = vsel %vm619_vm2, %v1941_v60, -inf }
 0x30c   : > { %810 = vadd.xlane.f32.xlu2 %v809_v61  ;;  %1041 = vmax.xlane.f32.xlu0 %v1040_v62  ;;  %v891_v63 = vpop.f32.mrf.mxu3  ;;  %v1692_v61 = vmov 3  }
 0x30d   : > { %v896_v1 = vmul.f32 0.35355338, %v891_v63 }
 0x30f   : > { %v1955_v7 = vsel %vm1868_vm4, %v896_v1, -1e+30 }
 0x310   : > { %v902_v8 = vsel %vm619_vm2, %v1955_v7, -inf }
 0x314   : > { %807 = vadd.xlane.f32.xlu0 %v806_v0  ;;  %v893_v2 = vpop.f32.mrf.mxu3 }
 0x315   : > { %v897_v3 = vmul.f32 0.35355338, %v893_v2 }
 0x317   : > { %v1949_v4 = vsel %vm1875_vm5, %v897_v3, -1e+30 }
 0x318   : > { %v905_v5 = vsel %vm619_vm2, %v1949_v4, -inf }
 0x319   : > { %906 = vmax.xlane.f32.xlu1 %v905_v5 }
 0x31c   : > { %903 = vmax.xlane.f32.xlu0 %v902_v8  ;;  %v1161_v9 = vpop.f32.mrf.mxu3 }
 0x31d   : > { %v1166_v10 = vmul.f32 0.35355338, %v1161_v9 }
 0x31f   : > { %v1961_v11 = vsel %vm1868_vm4, %v1166_v10, -1e+30 }
 0x320   : > { %v1172_v13 = vsel %vm619_vm2, %v1961_v11, -inf }
 0x321   : > { %1173 = vmax.xlane.f32.xlu2 %v1172_v13 }
 0x324   : > { %v1163_v14 = vpop.f32.mrf.mxu3 }
 0x325   : > { %v1167_v15 = vmul.f32 0.35355338, %v1163_v14 }
 0x327   : > { %v1967_v18 = vsel %vm1875_vm5, %v1167_v15, -1e+30 }
 0x328   : > { %v1175_v22 = vsel %vm619_vm2, %v1967_v18, -inf }
 0x329   : > { %1176 = vmax.xlane.f32.xlu1 %v1175_v22 }
 0x339   : > { %966 = vrot.lane.b32.xlu2 %v1852_v57, %s1685_s24 }
 0x377   : > { %v1039_v12 = vpop.xlane.xlu2 %1038 }
 0x37f   : > { %v811_v33 = vpop.xlane.xlu2 %810  ;;  %v1042_v34 = vpop.xlane.xlu0 %1041 }
 0x380   : > { %v813_v35 = vadd.f32 %v811_v33, %v805_v32 }
 0x382   : > { %816 = vst.msk [vmem:[#allocation3 + $0x8] sm:$0xff] %vm814_vm6, %v813_v35  ;;  %v817_v35 = vld [vmem:[%s1799_s18] sm:$0xff] }
 0x387   : > { %v808_v36 = vpop.xlane.xlu0 %807 }
 0x388   : > { %v812_v17 = vadd.f32 %v808_v36, %v804_v25 }
 0x38a   : > { %815 = vst.msk [vmem:[#allocation3] sm:$0xff] %vm814_vm6, %v812_v17 }
 0x38c   : > { %v907_v20 = vpop.xlane.xlu1 %906 }
 0x38d   : > { %v909_v37 = vmax.f32 %v1987_v19, %v907_v20  ;;  %v818_v20 = vld [vmem:[%s1799_s18 + $0x8] sm:$0xff] }
 0x38f   : > { %1001 = vst.msk [vmem:[#allocation2 + $0x8] sm:$0xff] %vm946_vm7, %v909_v37  ;;  %923 = vperm.xlu0 %1605, %v909_v37   ;;  %v904_v39 = vpop.xlane.xlu0 %903  ;;  %v911_v5 = vsub.f32 %v1987_v19, %v909_v37 }
 0x390   : > { %v908_v40 = vmax.f32 %v900_v38, %v904_v39 }
 0x391   : > { %v914_v8 = vmul.f32 1.442695, %v911_v5 }
 0x392   : > { %1000 = vst.msk [vmem:[#allocation2] sm:$0xff] %vm946_vm7, %v908_v40  ;;  %918 = vperm.xlu1 %1604, %v908_v40   ;;  %v910_v2 = vsub.f32 %v900_v38, %v908_v40 }
 0x394   : > { %v1174_v41 = vpop.xlane.xlu2 %1173  ;;  %v912_v3 = vmul.f32 1.442695, %v910_v2 }
 0x396   : > { %v1036_v42 = vld [vmem:[#allocation2 + $0x8] sm:$0xff] }
 0x397   : > { %v1044_v43 = vmax.f32 %v1036_v42, %v1042_v34  ;;  %1101 = vrot.lane.b32.xlu0 %v1852_v57, %s1688_s14 }
 0x398   : > { %1614 = vset.pattern.permute.xlu0 %v1691_v31 }
 0x399   : > { %v1035_v44 = vld [vmem:[#allocation2] sm:$0xff]  ;;  %1136 = vst.msk [vmem:[#allocation2 + $0x8] sm:$0xff] %vm1081_vm8, %v1044_v43  ;;  %v1046_v45 = vsub.f32 %v1036_v42, %v1044_v43 }
 0x39a   : > { %v1043_v46 = vmax.f32 %v1035_v44, %v1039_v12  ;;  %964 = vrot.lane.b32.xlu1 %v1854_v58, %s1685_s24 }
 0x39b   : > { %1607 = vset.pattern.permute.xlu1 %v1691_v31  ;;  %v1049_v48 = vmul.f32 1.442695, %v1046_v45 }
 0x39c   : > { %1135 = vst.msk [vmem:[#allocation2] sm:$0xff] %vm1081_vm8, %v1043_v46  ;;  %v967_v47 = vpop.permute.xlu2 %966  ;;  %1053 = vperm.xlu2 %1606, %v1043_v46   ;;  %v1177_v49 = vpop.xlane.xlu1 %1176  ;;  %v1045_v0 = vsub.f32 %v1035_v44, %v1043_v46 }
 0x39d   : > { %979 = vmatpush.bf16.msrb.mxu2 %v967_v47  ;;  %1627 = vpow2.f32 %v1049_v48 }
 0x39e   : > { %v1047_v1 = vmul.f32 1.442695, %v1045_v0 }
 0x39f   : > { %1234 = vrot.lane.b32.xlu0 %v1854_v58, %s1686_s12 }
 0x3a0   : > { %v2002_v51 = vld [vmem:[#allocation2 + $0x8] sm:$0xff]  ;;  %1629 = vpow2.f32 %v1047_v1 }
 0x3a1   : > { %v2005_v52 = vmax.f32 %v2002_v51, %v1177_v49  ;;  %1631 = vpow2.f32 %v912_v3 }
 0x3a2   : > { %1058 = vperm.xlu1 %1607, %v1044_v43   ;;  %1633 = vpow2.f32 %v914_v8 }
 0x3a3   : > { %v2007_v54 = vld [vmem:[#allocation2] sm:$0xff]  ;;  %v1181_v56 = vsub.f32 %v2002_v51, %v2005_v52  ;;  %1271 = vst.msk [vmem:[#allocation2 + $0x8] sm:$0xff] %vm1216_vm9, %v2005_v52  ;;  %v2016_v62 = vpop.eup %1627 }
 0x3a4   : > { %v2014_v59 = vmax.f32 %v2007_v54, %v1174_v41  ;;  %1608 = vset.pattern.permute.xlu2 %v1692_v61 }
 0x3a5   : > { %v1184_v2 = vmul.f32 1.442695, %v1181_v56 }
 0x3a6   : > { %v1180_v63 = vsub.f32 %v2007_v54, %v2014_v59  ;;  %1270 = vst.msk [vmem:[#allocation2] sm:$0xff] %vm1216_vm9, %v2014_v59  ;;  %1188 = vperm.xlu2 %1608, %v2014_v59  }
 0x3a7   : > { %1093 = vperm.xlu0 %1614, %v2016_v62  }
 0x3aa   : > { %1609 = vset.pattern.permute.xlu1 %v1692_v61 }
 0x3ab   : > { %1193 = vperm.xlu1 %1609, %v2005_v52  }
 0x3ae   : > { %1099 = vrot.lane.b32.xlu2 %v1854_v58, %s1688_s14  ;;  %v2033_v58 = vpop.eup %1629 }
 0x3af   : > { %1610 = vset.pattern.permute.xlu2 %v1687_v16  ;;  %1616 = vset.pattern.permute.xlu0 %v1692_v61 }
 0x3b3   : > { %1236 = vrot.lane.b32.xlu1 %v1852_v57, %s1686_s12  ;;  %v2037_v57 = vpop.eup %1631 }
 0x3b4   : > { %1611 = vset.pattern.permute.xlu1 %v1687_v16  ;;  %v2041_v16 = vpop.eup %1633 }
 0x3b6   : > { %821 = vperm.xlu2 %1610, %v1626_v21  }
 0x3bb   : > { %826 = vperm.xlu1 %1611, %v1981_v28  }
 0x3be   : > { %1613 = vset.pattern.permute.xlu2 %v1691_v31 }
 0x3bf   : > { %1088 = vperm.xlu2 %1613, %v2033_v58  }
 0x3c3   : > { %1612 = vset.pattern.permute.xlu1 %v1690_v6 }
 0x3c4   : > { %953 = vperm.xlu1 %1612, %v2037_v57  }
 0x3cc   : > { %958 = vperm.xlu1 %1612, %v2041_v16  }
 0x3d4   : > { %1615 = vset.pattern.permute.xlu1 %v1692_v61 }
 0x3f6   : > { %v1054_v9 = vpop.permute.xlu2 %1053 }
 0x3f7   : > { %v1061_v10 = vsub.f32 %v1933_v53, %v1054_v9 }
 0x3f9   : > { %v1063_v13 = vmul.f32 1.442695, %v1061_v10 }
 0x3fb   : > { %1635 = vpow2.f32 %v1063_v13  ;;  %v935_v13 = vld [vmem:[#allocation3 + $0x8] sm:$0xff] }
 0x3fc   : > { %v937_v51 = vmul.f32 %v2041_v16, %v935_v13 }
 0x400   : > { %v1189_v14 = vpop.permute.xlu2 %1188 }
 0x401   : > { %v1636_v15 = vpop.eup %1635  ;;  %v924_v22 = vpop.permute.xlu0 %923  ;;  %v1196_v41 = vsub.f32 %v1961_v11, %v1189_v14  ;;  %v934_v14 = vld [vmem:[#allocation3] sm:$0xff] }
 0x402   : > { %v927_v26 = vsub.f32 %v1949_v4, %v924_v22  ;;  %v1067_v6 = vmul.f32 %v1636_v15, %v1914_v24  ;;  %v936_v15 = vmul.f32 %v2037_v57, %v934_v14 }
 0x403   : > { %v1198_v42 = vmul.f32 1.442695, %v1196_v41 }
 0x404   : > { %v930_v12 = vmul.f32 1.442695, %v927_v26  ;;  %v919_v27 = vpop.permute.xlu1 %918  ;;  %v1073_v28 = vsel %vm619_vm2, %v1067_v6, 0.0 }
 0x405   : > { %v926_v29 = vsub.f32 %v1955_v7, %v919_v27  ;;  %1074 = vadd.xlane.f32.xlu1 %v1073_v28 }
 0x406   : > { %1637 = vpow2.f32 %v930_v12 }
 0x407   : > { %v928_v31 = vmul.f32 1.442695, %v926_v29 }
 0x408   : > { %v1100_v53 = vpop.permute.xlu2 %1099 }
 0x409   : > { %1639 = vpow2.f32 %v928_v31  ;;  %v1102_v32 = vpop.permute.xlu0 %1101 }
 0x40a   : > { %1114 = vmatpush.bf16.msrb.mxu1 %v1102_v32 }
 0x40c   : > { %v1638_v33 = vpop.eup %1637  ;;  %v965_v34 = vpop.permute.xlu1 %964 }
 0x40d   : > { %980 = vmatpush.bf16.msrb.mxu2 %v965_v34  ;;  %v933_v4 = vmul.f32 %v1638_v33, %v1918_v30 }
 0x40e   : > { %1115 = vmatpush.bf16.msrb.mxu1 %v1100_v53 }
 0x40f   : > { %v1640_v21 = vpop.eup %1639  ;;  %v941_v23 = vsel %vm619_vm2, %v933_v4, 0.0 }
 0x410   : > { %v822_v7 = vpop.permute.xlu2 %821  ;;  %942 = vadd.xlane.f32.xlu2 %v941_v23  ;;  %v932_v25 = vmul.f32 %v1640_v21, %v1914_v24 }
 0x411   : > { %v829_v36 = vmul.f32 %v822_v7, %v817_v35  ;;  %v1182_v35 = vmul.f32 1.442695, %v1180_v63 }
 0x412   : > { %v938_v17 = vsel %vm619_vm2, %v932_v25, 0.0  ;;  %v963_v19 = vpack.c.bf16 %v933_v4, %v932_v25 }
 0x413   : > { %v861_v37 = vadd.f32 %v1929_v50, %v829_v36  ;;  %939 = vadd.xlane.f32.xlu0 %v938_v17 }
 0x414   : > { %v1059_v38 = vpop.permute.xlu1 %1058  ;;  %1528 = vmatmul.msk.bf16.vlgmr.msrb.gmra.mxu2 %vm619_vm2, %v963_v19 }
 0x415   : > { %v1062_v39 = vsub.f32 %v1941_v60, %v1059_v38  ;;  %863 = vst.msk [vmem:[%s1799_s18] sm:$0xff] %vm740_vm3, %v861_v37 }
 0x417   : > { %v1065_v40 = vmul.f32 1.442695, %v1062_v39 }
 0x419   : > { %1641 = vpow2.f32 %v1065_v40 }
 0x41a   : > { %1643 = vpow2.f32 %v1198_v42 }
 0x41c   : > { %v949_v7 = vld [vmem:[%s1799_s18] sm:$0xff] }
 0x41d   : > { %v1194_v43 = vpop.permute.xlu1 %1193 }
 0x41e   : > { %v1197_v44 = vsub.f32 %v1967_v18, %v1194_v43  ;;  %v1235_v18 = vpop.permute.xlu0 %1234 }
 0x41f   : > { %v1642_v45 = vpop.eup %1641 }
 0x420   : > { %v1200_v46 = vmul.f32 1.442695, %v1197_v44  ;;  %v1068_v50 = vmul.f32 %v1642_v45, %v1918_v30  ;;  %v1644_v11 = vpop.eup %1643 }
 0x421   : > { %v1202_v61 = vmul.f32 %v1644_v11, %v1914_v24  ;;  %v1089_v24 = vpop.permute.xlu2 %1088 }
 0x422   : > { %1645 = vpow2.f32 %v1200_v46  ;;  %v1076_v47 = vsel %vm619_vm2, %v1068_v50, 0.0  ;;  %v1098_v48 = vpack.c.bf16 %v1068_v50, %v1067_v6 }
 0x423   : > { %1077 = vadd.xlane.f32.xlu0 %v1076_v47  ;;  %1647 = vpow2.f32 %v1184_v2 }
 0x424   : > { %1530 = vmatmul.msk.bf16.vlgmr.msrb.gmra.mxu1 %vm619_vm2, %v1098_v48  ;;  %1649 = vpow2.f32 %v1182_v35 }
 0x425   : > { %v1237_v60 = vpop.permute.xlu1 %1236 }
 0x426   : > { %1249 = vmatpush.bf16.msra.mxu2 %v1237_v60 }
 0x428   : > { %v1646_v49 = vpop.eup %1645 }
 0x429   : > { %v1203_v0 = vmul.f32 %v1646_v49, %v1918_v30  ;;  %v2074_v9 = vpop.eup %1647  ;;  %v1094_v30 = vpop.permute.xlu0 %1093 }
 0x42a   : > { %1250 = vmatpush.bf16.msra.mxu2 %v1235_v18  ;;  %v1650_v21 = vpop.eup %1649 }
 0x42b   : > { %v1233_v1 = vpack.c.bf16 %v1203_v0, %v1202_v61  ;;  %v1211_v4 = vsel %vm619_vm2, %v1203_v0, 0.0 }
 0x42d   : > { %v827_v3 = vpop.permute.xlu1 %826  ;;  %1532 = vmatmul.msk.bf16.vlgmr.msra.gmra.mxu2 %vm619_vm2, %v1233_v1 }
 0x42e   : > { %v830_v5 = vmul.f32 %v827_v3, %v818_v20 }
 0x430   : > { %v862_v8 = vadd.f32 %v1937_v55, %v830_v5 }
 0x432   : > { %864 = vst.msk [vmem:[%s1799_s18 + $0x8] sm:$0xff] %vm740_vm3, %v862_v8 }
 0x436   : > { %v954_v10 = vpop.permute.xlu1 %953 }
 0x437   : > { %1228 = vperm.xlu0 %1616, %v2074_v9   ;;  %v961_v25 = vmul.f32 %v954_v10, %v949_v7 }
 0x439   : > { %v950_v19 = vld [vmem:[%s1799_s18 + $0x8] sm:$0xff] }
 0x43e   : > { %v959_v26 = vpop.permute.xlu1 %958 }
 0x43f   : > { %v962_v20 = vmul.f32 %v959_v26, %v950_v19 }
 0x478   : > { %v1075_v27 = vpop.xlane.xlu1 %1074 }
 0x483   : > { %v943_v52 = vpop.xlane.xlu2 %942 }
 0x484   : > { %v945_v56 = vadd.f32 %v943_v52, %v937_v51 }
 0x486   : > { %948 = vst.msk [vmem:[#allocation3 + $0x8] sm:$0xff] %vm946_vm7, %v945_v56  ;;  %v940_v55 = vpop.xlane.xlu0 %939 }
 0x487   : > { %v944_v22 = vadd.f32 %v940_v55, %v936_v15 }
 0x489   : > { %947 = vst.msk [vmem:[#allocation3] sm:$0xff] %vm946_vm7, %v944_v22 }
 0x48d   : > { %v1070_v28 = vld [vmem:[#allocation3 + $0x8] sm:$0xff] }
 0x48e   : > { %v1072_v16 = vmul.f32 %v2016_v62, %v1070_v28  ;;  %v1208_v62 = vsel %vm619_vm2, %v1202_v61, 0.0 }
 0x490   : > { %v1069_v6 = vld [vmem:[#allocation3] sm:$0xff] }
 0x491   : > { %v1071_v12 = vmul.f32 %v2033_v58, %v1069_v6 }
 0x493   : > { %v1079_v29 = vadd.f32 %v1075_v27, %v1071_v12 }
 0x495   : > { %1082 = vst.msk [vmem:[#allocation3] sm:$0xff] %vm1081_vm8, %v1079_v29 }
 0x496   : > { %v1078_v31 = vpop.xlane.xlu0 %1077 }
 0x497   : > { %v1080_v53 = vadd.f32 %v1078_v31, %v1072_v16  ;;  %v982_v57 = vpop.f32.mrf.mxu2 }
 0x498   : > { %989 = vrot.lane.b32.xlu1 %v982_v57, %s1693_s22 }
 0x499   : > { %1083 = vst.msk [vmem:[#allocation3 + $0x8] sm:$0xff] %vm1081_vm8, %v1080_v53 }
 0x49c   : > { %v1204_v44 = vld [vmem:[#allocation3] sm:$0xff] }
 0x49d   : > { %v1206_v45 = vmul.f32 %v1650_v21, %v1204_v44 }
 0x49f   : > { %v984_v32 = vpop.f32.mrf.mxu2 }
 0x4a0   : > { %991 = vrot.lane.b32.xlu1 %v984_v32, %s1693_s22  ;;  %v1205_v47 = vld [vmem:[#allocation3 + $0x8] sm:$0xff] }
 0x4a1   : > { %v1117_v33 = vpop.f32.mrf.mxu1  ;;  %v1207_v48 = vmul.f32 %v2074_v9, %v1205_v47 }
 0x4a2   : > { %1124 = vrot.lane.b32.xlu2 %v1117_v33, %s1694_s23 }
 0x4a9   : > { %v1119_v58 = vpop.f32.mrf.mxu1  ;;  %v1229_v49 = vpop.permute.xlu0 %1228 }
 0x4aa   : > { %1126 = vrot.lane.b32.xlu2 %v1119_v58, %s1694_s23 }
 0x4b0   : > { %v1252_v34 = vpop.f32.mrf.mxu2 }
 0x4b1   : > { %1259 = vrot.lane.b32.xlu0 %v1252_v34, %s1695_s26 }
 0x4b8   : > { %v1254_v23 = vpop.f32.mrf.mxu2 }
 0x4ca   : > { %1209 = vadd.xlane.f32.xlu1 %v1208_v62 }
 0x4d3   : > { %1212 = vadd.xlane.f32.xlu2 %v1211_v4 }
 0x4e3   : > { %1223 = vperm.xlu1 %1615, %v1650_v21  }
 0x4eb   : > { %1261 = vrot.lane.b32.xlu1 %v1254_v23, %s1695_s26 }
 0x4fc   : > { %v1125_v63 = vpop.permute.xlu2 %1124 }
 0x504   : > { %v1127_v41 = vpop.permute.xlu2 %1126 }
 0x50a   : > { %v990_v36 = vpop.permute.xlu1 %989 }
 0x50b   : > { %v995_v17 = vadd.f32 %v990_v36, %v961_v25 }
 0x50d   : > { %998 = vst.msk [vmem:[%s1799_s18] sm:$0xff] %vm997_vm10, %v995_v17 }
 0x512   : > { %v992_v54 = vpop.permute.xlu1 %991 }
 0x513   : > { %v996_v59 = vadd.f32 %v992_v54, %v962_v20 }
 0x514   : > { %v1084_v37 = vld [vmem:[%s1799_s18] sm:$0xff] }
 0x515   : > { %999 = vst.msk [vmem:[%s1799_s18 + $0x8] sm:$0xff] %vm997_vm10, %v996_v59  ;;  %v1096_v39 = vmul.f32 %v1089_v24, %v1084_v37 }
 0x517   : > { %v1130_v42 = vadd.f32 %v1125_v63, %v1096_v39 }
 0x519   : > { %1133 = vst.msk [vmem:[%s1799_s18] sm:$0xff] %vm1132_vm11, %v1130_v42 }
 0x51c   : > { %v1085_v38 = vld [vmem:[%s1799_s18 + $0x8] sm:$0xff] }
 0x51d   : > { %v1097_v40 = vmul.f32 %v1094_v30, %v1085_v38 }
 0x51f   : > { %v1131_v43 = vadd.f32 %v1127_v41, %v1097_v40 }
 0x520   : > { %v1219_v18 = vld [vmem:[%s1799_s18] sm:$0xff] }
 0x521   : > { %1134 = vst.msk [vmem:[%s1799_s18 + $0x8] sm:$0xff] %vm1132_vm11, %v1131_v43 }
 0x523   : > { %v1260_v1 = vpop.permute.xlu0 %1259 }
 0x528   : > { %v1220_v3 = vld [vmem:[%s1799_s18 + $0x8] sm:$0xff] }
 0x529   : > { %v1232_v5 = vmul.f32 %v1229_v49, %v1220_v3 }
 0x53d   : > { %v1210_v46 = vpop.xlane.xlu1 %1209 }
 0x53e   : > { %v1214_v50 = vadd.f32 %v1210_v46, %v1206_v45 }
 0x540   : > { %1217 = vst.msk [vmem:[#allocation3] sm:$0xff] %vm1216_vm9, %v1214_v50 }
 0x546   : > { %v1213_v60 = vpop.xlane.xlu2 %1212 }
 0x547   : > { %v1215_v11 = vadd.f32 %v1213_v60, %v1207_v48 }
 0x549   : > { %1218 = vst.msk [vmem:[#allocation3 + $0x8] sm:$0xff] %vm1216_vm9, %v1215_v11 }
 0x555   : > { %v1224_v61 = vpop.permute.xlu1 %1223 }
 0x556   : > { %v1231_v0 = vmul.f32 %v1224_v61, %v1219_v18 }
 0x558   : > { %v1265_v2 = vadd.f32 %v1260_v1, %v1231_v0 }
 0x55a   : > { %1268 = vst.msk [vmem:[%s1799_s18] sm:$0xff] %vm1267_vm12, %v1265_v2 }
 0x55d   : > { %v1262_v8 = vpop.permute.xlu1 %1261 }
 0x55e   : > { %v1266_v24 = vadd.f32 %v1262_v8, %v1232_v5 }
 0x560   : > { %1269 = vst.msk [vmem:[%s1799_s18 + $0x8] sm:$0xff] %vm1267_vm12, %v1266_v24 }
 0x561 PF: > { %s1567_s10 = sadd.s32 384, %s1767_s16 }
 0x562   : > { %s1274_s11 = sadd.s32 %s1567_s10, %s1765_s15 }
 0x563   : > { %s1275_s29 = sld [smem:[#allocation5 + %s1274_s11]] }
 0x569   : > { %p1534_p10 = scmp.ne.s32.totalorder %s1275_s29, 1 }
 0x56b   : > { %1279 = sbr.rel (%p1534_p10) target bundleno = 1558 (0x616), region = 64 }
 0x570   : > { %v1280_v9 = vld [vmem:[#allocation3] sm:$0xff]  ;;  %v1696_v30 = vmov 0   ;;  %v1697_v13 = vmov 1   ;;  %v1281_v51 = vld [vmem:[#allocation3 + $0x8] sm:$0xff]  ;;  %v1698_v52 = vmov 2   ;;  %v1699_v55 = vmov 3  }
 0x571   : > { %1651 = vset.pattern.permute.xlu0 %v1696_v30  ;;  %v1282_v10 = vadd.f32 1e-07, %v1280_v9  ;;  %1652 = vset.pattern.permute.xlu1 %v1697_v13  ;;  %v1283_v56 = vadd.f32 1e-07, %v1281_v51  ;;  %v1286_v22 = vld [vmem:[%s1799_s18] sm:$0xff]  ;;  %v1287_v6 = vld [vmem:[%s1799_s18 + $0x8] sm:$0xff] }
 0x572   : > { %1653 = vset.pattern.permute.xlu2 %v1698_v52  ;;  %vm1300_vm13 = vcmask 64512   ;;  %vm1323_vm14 = vcmask 130112   ;;  %vm1346_vm15 = vcmask 195712   ;;  %vm1369_vm0 = vcmask 261312  }
 0x573   : > { %1656 = vrcp.f32 %v1282_v10 }
 0x574   : > { %1658 = vrcp.f32 %v1283_v56 }
 0x579   : > { %v1657_v14 = vpop.eup %1656 }
 0x57a   : > { %1290 = vperm.xlu0 %1651, %v1657_v14   ;;  %1313 = vperm.xlu1 %1652, %v1657_v14   ;;  %v1659_v15 = vpop.eup %1658 }
 0x57b   : > { %1336 = vperm.xlu2 %1653, %v1657_v14  }
 0x582   : > { %1295 = vperm.xlu0 %1651, %v1659_v15   ;;  %1318 = vperm.xlu1 %1652, %v1659_v15  }
 0x583   : > { %1341 = vperm.xlu2 %1653, %v1659_v15  }
 0x58a   : > { %1655 = vset.pattern.permute.xlu1 %v1699_v55  ;;  %1654 = vset.pattern.permute.xlu0 %v1699_v55 }
 0x58b   : > { %1364 = vperm.xlu1 %1655, %v1659_v15   ;;  %1359 = vperm.xlu0 %1654, %v1657_v14  }
 0x5d5   : > { %v1337_v33 = vpop.permute.xlu2 %1336 }
 0x5dd   : > { %v1342_v34 = vpop.permute.xlu2 %1341 }
 0x5ec   : > { %v1291_v26 = vpop.permute.xlu0 %1290  ;;  %v1314_v27 = vpop.permute.xlu1 %1313 }
 0x5ed   : > { %v1298_v12 = vmul.f32 %v1291_v26, %v1286_v22 }
 0x5ef   : > { %1301 = vst.msk [vmem:[%s1799_s18] sm:$0xff] %vm1300_vm13, %v1298_v12 }
 0x5f4   : > { %v1296_v28 = vpop.permute.xlu0 %1295  ;;  %v1319_v16 = vpop.permute.xlu1 %1318 }
 0x5f5   : > { %v1299_v29 = vmul.f32 %v1296_v28, %v1287_v6 }
 0x5f6   : > { %v1309_v31 = vld [vmem:[%s1799_s18] sm:$0xff] }
 0x5f7   : > { %1302 = vst.msk [vmem:[%s1799_s18 + $0x8] sm:$0xff] %vm1300_vm13, %v1299_v29  ;;  %v1321_v57 = vmul.f32 %v1314_v27, %v1309_v31 }
 0x5f9   : > { %1324 = vst.msk [vmem:[%s1799_s18] sm:$0xff] %vm1323_vm14, %v1321_v57 }
 0x5fd   : > { %v1365_v21 = vpop.permute.xlu1 %1364  ;;  %v1360_v23 = vpop.permute.xlu0 %1359 }
 0x5fe   : > { %v1310_v53 = vld [vmem:[%s1799_s18 + $0x8] sm:$0xff] }
 0x5ff   : > { %v1322_v32 = vmul.f32 %v1319_v16, %v1310_v53 }
 0x600   : > { %v1332_v58 = vld [vmem:[%s1799_s18] sm:$0xff] }
 0x601   : > { %1325 = vst.msk [vmem:[%s1799_s18 + $0x8] sm:$0xff] %vm1323_vm14, %v1322_v32  ;;  %v1344_v4 = vmul.f32 %v1337_v33, %v1332_v58 }
 0x603   : > { %1347 = vst.msk [vmem:[%s1799_s18] sm:$0xff] %vm1346_vm15, %v1344_v4 }
 0x608   : > { %v1333_v62 = vld [vmem:[%s1799_s18 + $0x8] sm:$0xff] }
 0x609   : > { %v1345_v35 = vmul.f32 %v1342_v34, %v1333_v62 }
 0x60a   : > { %v1355_v25 = vld [vmem:[%s1799_s18] sm:$0xff] }
 0x60b   : > { %1348 = vst.msk [vmem:[%s1799_s18 + $0x8] sm:$0xff] %vm1346_vm15, %v1345_v35  ;;  %v1367_v17 = vmul.f32 %v1360_v23, %v1355_v25 }
 0x60d   : > { %1370 = vst.msk [vmem:[%s1799_s18] sm:$0xff] %vm1369_vm0, %v1367_v17 }
 0x612   : > { %v1356_v7 = vld [vmem:[%s1799_s18 + $0x8] sm:$0xff] }
 0x613   : > { %v1368_v36 = vmul.f32 %v1365_v21, %v1356_v7 }
 0x615   : > { %1371 = vst.msk [vmem:[%s1799_s18 + $0x8] sm:$0xff] %vm1369_vm0, %v1368_v36 }
 0x616 PF: > { %s27_s13 = sadd.s32 1, %s1680_s13  }
 0x617   : > { %p24_p11 = scmp.ge.s32.totalorder %s27_s13, 5  }
 0x619   :  { %26 = sbr.rel (!%p24_p11) target bundleno = 7 (0x7), region = 103 }

// kernel: node_update_forward.7
= control target key start
LH: loop header
LB: loop body
LE: loop exit
PB: predicated region body
PF: predicated region fallthrough
CT: control target
= control target key end

     0   :  { %s1880_s0 = inlined_call_operand.vmem [shape: f32[16,32], index: 0, kind: input, shape index: {}]   ;;  %s1881_s1 = inlined_call_operand.vmem [shape: f32[16,32], index: 1, kind: input, shape index: {}]   ;;  %s1882_s2 = inlined_call_operand.vmem [shape: f32[16,32], index: 2, kind: input, shape index: {}]   ;;  %s1883_s3 = inlined_call_operand.vmem [shape: bf16[32,32], index: 3, kind: input, shape index: {}]   ;;  %s1884_s4 = inlined_call_operand.vmem [shape: f32[1,32], index: 4, kind: input, shape index: {}]   ;;  %s1885_s5 = inlined_call_operand.vmem [shape: f32[1,32], index: 5, kind: input, shape index: {}]   ;;  %s1886_s6 = inlined_call_operand.vmem [shape: f32[1,32], index: 6, kind: input, shape index: {}]   ;;  %s1887_s7 = inlined_call_operand.vmem [shape: bf16[32,32], index: 7, kind: input, shape index: {}]   ;;  %s1888_s8 = inlined_call_operand.vmem [shape: bf16[32,32], index: 8, kind: input, shape index: {}]   ;;  %s1889_s9 = inlined_call_operand.vmem [shape: f32[1,32], index: 9, kind: input, shape index: {}]   ;;  %s1890_s10 = inlined_call_operand.vmem [shape: f32[1,32], index: 10, kind: input, shape index: {}]   ;;  %s1891_s11 = inlined_call_operand.vmem [shape: f32[1,32], index: 11, kind: input, shape index: {}]   ;;  %s1892_s12 = inlined_call_operand.vmem [shape: f32[1,32], index: 12, kind: input, shape index: {}]   ;;  %s1893_s13 = inlined_call_operand.vmem [shape: f32[1,32], index: 13, kind: input, shape index: {}]   ;;  %s1894_s14 = inlined_call_operand.vmem [shape: bf16[32,128], index: 14, kind: input, shape index: {}]   ;;  %s1895_s15 = inlined_call_operand.vmem [shape: f32[1,128], index: 15, kind: input, shape index: {}]   ;;  %s1896_s16 = inlined_call_operand.vmem [shape: bf16[128,32], index: 16, kind: input, shape index: {}]   ;;  %s1897_s17 = inlined_call_operand.vmem [shape: f32[1,32], index: 17, kind: input, shape index: {}]   ;;  %s1898_s18 = inlined_call_operand.vmem [shape: bf16[128,32], index: 18, kind: input, shape index: {}]   ;;  %s1899_s19 = inlined_call_operand.vmem [shape: f32[1,32], index: 19, kind: input, shape index: {}]   ;;  %s1900_s20 = inlined_call_operand.vmem [shape: f32[1,32], index: 20, kind: input, shape index: {}]   ;;  %s1901_s21 = inlined_call_operand.vmem [shape: f32[1,32], index: 21, kind: input, shape index: {}]   ;;  %s1902_s22 = inlined_call_operand.vmem [shape: bf16[32,64], index: 22, kind: input, shape index: {}]   ;;  %s1903_s23 = inlined_call_operand.vmem [shape: bf16[32,64], index: 23, kind: input, shape index: {}]   ;;  %s1904_s24 = inlined_call_operand.vmem [shape: bf16[64,32], index: 24, kind: input, shape index: {}]   ;;  %s1905_s25 = inlined_call_operand.vmem [shape: f32[1,32], index: 25, kind: input, shape index: {}]   ;;  %s1906_s26 = inlined_call_operand.vmem [shape: f32[1,32], index: 26, kind: input, shape index: {}]   ;;  %s1907_s27 = inlined_call_operand.hbm [shape: f32[16,32], index: 27, kind: output, shape index: {}]  }
   0x1   :  { %1914 = sst [smem:[#allocation5_spill]] %s1880_s0 }
   0x2   :  { %1915 = sst [smem:[#allocation6_spill]] %s1881_s1 }
   0x3   :  { %1916 = sst [smem:[#allocation7_spill]] %s1882_s2 }
   0x4   :  { %1917 = sst [smem:[#allocation8_spill]] %s1883_s3 }
   0x5   :  { %1918 = sst [smem:[#allocation9_spill]] %s1884_s4 }
   0x6   :  { %1919 = sst [smem:[#allocation10_spill]] %s1885_s5 }
   0x7   :  { %1920 = sst [smem:[#allocation11_spill]] %s1886_s6 }
   0x8   :  { %1921 = sst [smem:[#allocation12_spill]] %s1887_s7 }
   0x9   :  { %1922 = sst [smem:[#allocation13_spill]] %s1888_s8 }
   0xa   :  { %1923 = sst [smem:[#allocation14_spill]] %s1889_s9 }
   0xb   :  { %1924 = sst [smem:[#allocation15_spill]] %s1890_s10 }
   0xc   :  { %1925 = sst [smem:[#allocation16_spill]] %s1891_s11 }
   0xd   :  { %1926 = sst [smem:[#allocation17_spill]] %s1901_s21 }
   0xe   :  { %s1927_s8 = sld [smem:[#allocation8_spill]]  ;;  %vm113_vm0 = vcmask 261120  }
   0xf   :  { %s1928_s21 = sld [smem:[#allocation13_spill]] }
  0x10   :  { %s1929_s0 = sld [smem:[#allocation12_spill]] }
  0x11   :  { %s1930_s4 = sld [smem:[#allocation5_spill]] }
  0x12   :  { %s1931_s28 = sld [smem:[#allocation7_spill]] }
  0x13   :  { %s1932_s1 = sld [smem:[#allocation6_spill]] }
  0x14   :  { %v1274_v0 = vld [vmem:[%s1927_s8 + $0x8] sm:$0xff]  ;;  %v1273_v3 = vld [vmem:[%s1927_s8] sm:$0xff] }
  0x15   :  { %v1278_v1 = vld [vmem:[%s1928_s21 + $0x8] sm:$0xff]  ;;  %v1277_v4 = vld [vmem:[%s1928_s21] sm:$0xff]  ;;  %123 = vmatpush.bf16.msra.mxu0 %v1274_v0 }
  0x16   :  { %v1276_v2 = vld [vmem:[%s1929_s0 + $0x8] sm:$0xff]  ;;  %v1275_v5 = vld [vmem:[%s1929_s0] sm:$0xff]  ;;  %227 = vmatpush.bf16.msra.mxu1 %v1278_v1 }
  0x17   :  { %v90_v6 = vld [vmem:[%s1930_s4] sm:$0xff]  ;;  %v91_v7 = vld [vmem:[%s1930_s4 + $0x8] sm:$0xff]  ;;  %256 = vmatpush.bf16.msra.mxu2 %v1276_v2 }
  0x18   :  { %v199_v8 = vld [vmem:[%s1931_s28] sm:$0xff]  ;;  %v200_v9 = vld [vmem:[%s1931_s28 + $0x8] sm:$0xff]  ;;  %v92_v12 = vpack.c.bf16 %v91_v7, %v90_v6 }
  0x19   :  { %v1573_v10 = vld [vmem:[%s1932_s1] sm:$0xff]  ;;  %v1578_v11 = vld [vmem:[%s1932_s1 + $0x8] sm:$0xff]  ;;  %v201_v13 = vpack.c.bf16 %v200_v9, %v199_v8  ;;  %124 = vmatpush.bf16.msra.mxu0 %v1273_v3 }
  0x1a   :  { %228 = vmatpush.bf16.msra.mxu1 %v1277_v4  ;;  %v194_v14 = vpack.c.bf16 %v1578_v11, %v1573_v10 }
  0x1b   :  { %257 = vmatpush.bf16.msra.mxu2 %v1275_v5 }
  0x1c   :  { %1140 = vmatmul.msk.bf16.vlgmr.msra.gmra.mxu0 %vm113_vm0, %v92_v12 }
  0x1d   :  { %1149 = vmatmul.msk.bf16.vlgmr.msra.gmra.mxu1 %vm113_vm0, %v201_v13 }
  0x1e   :  { %32 = vsyncpa [#allocation3], 0  ;;  %1158 = vmatmul.msk.bf16.vlgmr.msra.gmra.mxu2 %vm113_vm0, %v194_v14  ;;  %s1933_s7 = sld [smem:[#allocation9_spill]] }
  0x1f   :  { %s1934_s9 = sld [smem:[#allocation14_spill]] }
  0x20   :  { %s1935_s28 = sld [smem:[#allocation10_spill]] }
  0x21   :  { %s1936_s0 = sld [smem:[#allocation15_spill]] }
  0x22   :  { %s1937_s6 = sld [smem:[#allocation11_spill]] }
  0x23   :  { %s1938_s3 = sld [smem:[#allocation16_spill]] }
  0x24   :  { %v1309_v15 = vld [vmem:[%s1933_s7] ss:$0 sm:$0xff]  ;;  %s1939_s29 = sld [smem:[#allocation17_spill]] }
  0x25   :  { %v1310_v20 = vld [vmem:[%s1934_s9] ss:$0 sm:$0xff] }
  0x99   :  { %v126_v16 = vpop.f32.mrf.mxu0 }
  0x9a   :  { %v1588_v17 = vadd.f32 %v1309_v15, %v126_v16  ;;  %v230_v19 = vpop.f32.mrf.mxu1 }
  0x9c   :  { %v133_v18 = vsel %vm113_vm0, %v1588_v17, 0.0 }
  0x9d   :  { %134 = vadd.xlane.f32.xlu0 %v133_v18 }
  0xa1   :  { %v259_v21 = vpop.f32.mrf.mxu2  ;;  %v128_v23 = vpop.f32.mrf.mxu0 }
  0xa2   :  { %v260_v22 = vadd.f32 %v259_v21, %v230_v19  ;;  %v1595_v24 = vadd.f32 %v1309_v15, %v128_v23  ;;  %v232_v29 = vpop.f32.mrf.mxu1 }
  0xa4   :  { %v1597_v25 = vadd.f32 %v1310_v20, %v260_v22  ;;  %v136_v26 = vsel %vm113_vm0, %v1595_v24, 0.0 }
  0xa5   :  { %137 = vadd.xlane.f32.xlu0 %v136_v26 }
  0xa6   :  { %v1602_v27 = vmul.f32 0.70710677, %v1597_v25 }
  0xa8   :  { %v274_v28 = vmul.f32 %v1602_v27, %v1602_v27 }
  0xa9   :  { %v261_v30 = vpop.f32.mrf.mxu2 }
  0xaa   :  { %v275_v31 = vmin.f32 %v274_v28, 16.0  ;;  %v262_v32 = vadd.f32 %v261_v30, %v232_v29 }
  0xac   :  { %v276_v33 = vmul.f32 2.1237322e-06, %v275_v31  ;;  %v1606_v34 = vadd.f32 %v1310_v20, %v262_v32  ;;  %v287_v35 = vmul.f32 3.8918573e-05, %v275_v31 }
  0xae   :  { %v277_v36 = vadd.f32 0.00028619796, %v276_v33  ;;  %v1609_v37 = vmul.f32 0.70710677, %v1606_v34  ;;  %v288_v38 = vadd.f32 0.001143296, %v287_v35 }
  0xb0   :  { %v278_v39 = vmul.f32 %v277_v36, %v275_v31  ;;  %v314_v40 = vmul.f32 %v1609_v37, %v1609_v37  ;;  %v289_v41 = vmul.f32 %v288_v38, %v275_v31 }
  0xb2   :  { %v315_v42 = vmin.f32 %v314_v40, 16.0  ;;  %v290_v43 = vadd.f32 0.014752088, %v289_v41  ;;  %v279_v44 = vadd.f32 0.0036580483, %v278_v39  ;;  %v270_v40 = vmul.f32 0.5, %v1597_v25 }
  0xb4   :  { %v316_v45 = vmul.f32 2.1237322e-06, %v315_v42  ;;  %v291_v46 = vmul.f32 %v290_v43, %v275_v31  ;;  %v327_v47 = vmul.f32 3.8918573e-05, %v315_v42  ;;  %v280_v50 = vmul.f32 %v279_v44, %v275_v31 }
  0xb6   :  { %v317_v48 = vadd.f32 0.00028619796, %v316_v45  ;;  %v292_v49 = vadd.f32 0.112945676, %v291_v46  ;;  %v328_v51 = vadd.f32 0.001143296, %v327_v47 }
  0xb7   :  { %v281_v56 = vadd.f32 0.05243302, %v280_v50  ;;  %v271_v50 = vmul.f32 0.5, %v1606_v34 }
  0xb8   :  { %v318_v52 = vmul.f32 %v317_v48, %v315_v42  ;;  %v293_v53 = vmul.f32 %v292_v49, %v275_v31  ;;  %v329_v54 = vmul.f32 %v328_v51, %v315_v42 }
  0xb9   :  { %v282_v62 = vmul.f32 %v281_v56, %v275_v31 }
  0xba   :  { %v294_v55 = vadd.f32 0.4994258, %v293_v53  ;;  %v330_v57 = vadd.f32 0.014752088, %v329_v54  ;;  %v319_v58 = vadd.f32 0.0036580483, %v318_v52 }
  0xbb   :  { %v283_v2 = vadd.f32 0.18741608, %v282_v62  ;;  %v1396_v53 = vmov 32.0  }
  0xbc   :  { %v295_v59 = vmul.f32 %v294_v55, %v275_v31  ;;  %v331_v60 = vmul.f32 %v330_v57, %v315_v42  ;;  %v320_v0 = vmul.f32 %v319_v58, %v315_v42 }
  0xbd   :  { %v284_v7 = vmul.f32 %v283_v2, %v275_v31 }
  0xbe   :  { %v296_v61 = vadd.f32 1.0, %v295_v59  ;;  %v332_v63 = vadd.f32 0.112945676, %v331_v60  ;;  %v321_v4 = vadd.f32 0.05243302, %v320_v0 }
  0xbf   :  { %v285_v15 = vadd.f32 1.1283791, %v284_v7 }
  0xc0   :  { %1324 = vrcp.f32 %v296_v61  ;;  %v333_v1 = vmul.f32 %v332_v63, %v315_v42  ;;  %v322_v12 = vmul.f32 %v321_v4, %v315_v42  ;;  %v308_v14 = vand.u32 2147483648, %v296_v61 }
  0xc1   :  { %v306_v18 = vand.u32 2147483647, %v296_v61  ;;  %vm302_vm2 = vweird.f32 %v296_v61  ;;  %v286_v23 = vmul.f32 %v285_v15, %v1602_v27 }
  0xc2   :  { %v334_v3 = vadd.f32 0.4994258, %v333_v1  ;;  %v323_v19 = vadd.f32 0.18741608, %v322_v12  ;;  %v309_v21 = vor.u32 1.1754944e-38, %v308_v14 }
  0xc3   :  { %vm307_vm4 = vcmp.eq.f32.partialorder %v306_v18, 8.507059e+37 }
  0xc4   :  { %v335_v5 = vmul.f32 %v334_v3, %v315_v42  ;;  %v324_v28 = vmul.f32 %v323_v19, %v315_v42 }
  0xc6   :  { %v1325_v6 = vpop.eup %1324  ;;  %v336_v9 = vadd.f32 1.0, %v335_v5  ;;  %v325_v36 = vadd.f32 1.1283791, %v324_v28 }
  0xc7   :  { %v298_v8 = vmul.f32 %v1325_v6, %v296_v61  ;;  %vm303_vm1 = vweird.f32 %v1325_v6 }
  0xc8   :  { %1326 = vrcp.f32 %v336_v9  ;;  %vm304_vm3 = vmor %vm302_vm2, %vm303_vm1  ;;  %v348_v35 = vand.u32 2147483648, %v336_v9  ;;  %v346_v39 = vand.u32 2147483647, %v336_v9  ;;  %vm342_vm6 = vweird.f32 %v336_v9 }
  0xc9   :  { %v299_v13 = vsub.f32 1.0, %v298_v8  ;;  %v326_v42 = vmul.f32 %v325_v36, %v1609_v37  ;;  %1328 = vrcp.f32 %v1396_v53  ;;  %v1313_v53 = vld [vmem:[%s1936_s0] ss:$0 sm:$0xff] }
  0xca   :  { %v349_v27 = vor.u32 1.1754944e-38, %v348_v35  ;;  %vm347_vm8 = vcmp.eq.f32.partialorder %v346_v39, 8.507059e+37 }
  0xcb   :  { %v300_v16 = vmul.f32 %v1325_v6, %v299_v13 }
  0xcd   :  { %v301_v20 = vadd.f32 %v1325_v6, %v300_v16 }
  0xce   :  { %v1327_v22 = vpop.eup %1326 }
  0xcf   :  { %v305_v26 = vsel %vm304_vm3, %v1325_v6, %v301_v20  ;;  %v338_v30 = vmul.f32 %v1327_v22, %v336_v9  ;;  %vm343_vm5 = vweird.f32 %v1327_v22  ;;  %v1329_v54 = vpop.eup %1328 }
  0xd0   :  { %v310_v29 = vsel %vm307_vm4, %v309_v21, %v305_v26  ;;  %vm344_vm7 = vmor %vm342_vm6, %vm343_vm5  ;;  %v140_v55 = vmul.f32 32.0, %v1329_v54  ;;  %vm144_vm9 = vweird.f32 %v1329_v54 }
  0xd1   :  { %v311_v31 = vmul.f32 %v310_v29, %v286_v23  ;;  %v339_v32 = vsub.f32 1.0, %v338_v30 }
  0xd2   :  { %v141_v37 = vsub.f32 1.0, %v140_v55 }
  0xd3   :  { %v1159_v33 = vclamps-f32 %v311_v31, 1.0  ;;  %v340_v38 = vmul.f32 %v1327_v22, %v339_v32 }
  0xd4   :  { %v142_v56 = vmul.f32 %v1329_v54, %v141_v37 }
  0xd5   :  { %v354_v41 = vadd.f32 1.0, %v1159_v33  ;;  %v341_v43 = vadd.f32 %v1327_v22, %v340_v38 }
  0xd6   :  { %v143_v57 = vadd.f32 %v1329_v54, %v142_v56  ;;  %v1312_v56 = vld [vmem:[%s1937_s6] ss:$0 sm:$0xff] }
  0xd7   :  { %v356_v44 = vmul.f32 %v354_v41, %v270_v40  ;;  %v345_v45 = vsel %vm344_vm7, %v1327_v22, %v341_v43 }
  0xd8   :  { %v350_v47 = vsel %vm347_vm8, %v349_v27, %v345_v45  ;;  %v1619_v58 = vsel %vm144_vm9, %v1329_v54, %v143_v57 }
  0xd9   :  { %v360_v46 = vsel %vm113_vm0, %v356_v44, 0.0  ;;  %v351_v48 = vmul.f32 %v350_v47, %v326_v42 }
  0xda   :  { %361 = vadd.xlane.f32.xlu1 %v360_v46 }
  0xdb   :  { %v1160_v49 = vclamps-f32 %v351_v48, 1.0 }
  0xdd   :  { %v355_v51 = vadd.f32 1.0, %v1160_v49  ;;  %v1311_v49 = vld [vmem:[%s1935_s28] ss:$0 sm:$0xff] }
  0xdf   :  { %v357_v25 = vmul.f32 %v355_v51, %v271_v50 }
  0xe1   :  { %v363_v52 = vsel %vm113_vm0, %v357_v25, 0.0 }
  0xe2   :  { %364 = vadd.xlane.f32.xlu1 %v363_v52 }
 0x110   :  { %v135_v59 = vpop.xlane.xlu0 %134 }
 0x111   :  { %v146_v60 = vmul.f32 %v1619_v58, %v135_v59  ;;  %v1314_v59 = vld [vmem:[%s1938_s3] ss:$0 sm:$0xff] }
 0x113   :  { %v148_v34 = vsub.f32 %v1588_v17, %v146_v60 }
 0x115   :  { %v150_v61 = vmul.f32 %v148_v34, %v148_v34 }
 0x117   :  { %v152_v62 = vsel %vm113_vm0, %v150_v61, 0.0 }
 0x118   :  { %153 = vadd.xlane.f32.xlu2 %v152_v62  ;;  %v138_v63 = vpop.xlane.xlu0 %137 }
 0x119   :  { %v147_v0 = vmul.f32 %v1619_v58, %v138_v63 }
 0x11b   :  { %v1626_v1 = vsub.f32 %v1595_v24, %v147_v0 }
 0x11d   :  { %v151_v2 = vmul.f32 %v1626_v1, %v1626_v1 }
 0x11f   :  { %v155_v3 = vsel %vm113_vm0, %v151_v2, 0.0 }
 0x120   :  { %156 = vadd.xlane.f32.xlu2 %v155_v3 }
 0x14d   :  { %v362_v4 = vpop.xlane.xlu1 %361 }
 0x14e   :  { %v366_v5 = vmul.f32 %v362_v4, %v1619_v58 }
 0x150   :  { %v368_v17 = vsub.f32 %v356_v44, %v366_v5 }
 0x152   :  { %v370_v6 = vmul.f32 %v368_v17, %v368_v17 }
 0x154   :  { %v372_v7 = vsel %vm113_vm0, %v370_v6, 0.0 }
 0x155   :  { %373 = vadd.xlane.f32.xlu0 %v372_v7  ;;  %v365_v8 = vpop.xlane.xlu1 %364 }
 0x156   :  { %v367_v9 = vmul.f32 %v365_v8, %v1619_v58 }
 0x158   :  { %v1634_v12 = vsub.f32 %v357_v25, %v367_v9 }
 0x15a   :  { %v371_v24 = vmul.f32 %v1634_v12, %v1634_v12 }
 0x15c   :  { %v375_v13 = vsel %vm113_vm0, %v371_v24, 0.0 }
 0x15d   :  { %376 = vadd.xlane.f32.xlu1 %v375_v13 }
 0x18b   :  { %v154_v14 = vpop.xlane.xlu2 %153 }
 0x18c   :  { %v158_v15 = vmul.f32 %v154_v14, %v1619_v58 }
 0x18e   :  { %v160_v16 = vadd.f32 1e-05, %v158_v15 }
 0x190   :  { %1330 = vrsqrt.f32 %v160_v16  ;;  %vm168_vm11 = vweird.f32 %v160_v16 }
 0x193   :  { %v157_v18 = vpop.xlane.xlu2 %156 }
 0x194   :  { %v159_v19 = vmul.f32 %v157_v18, %v1619_v58 }
 0x196   :  { %v161_v20 = vadd.f32 1e-05, %v159_v19  ;;  %v1331_v21 = vpop.eup %1330 }
 0x197   :  { %v163_v22 = vmul.f32 %v1331_v21, %v160_v16  ;;  %vm169_vm10 = vweird.f32 %v1331_v21 }
 0x198   :  { %1332 = vrsqrt.f32 %v161_v20  ;;  %vm170_vm12 = vmor %vm168_vm11, %vm169_vm10  ;;  %vm178_vm2 = vweird.f32 %v161_v20 }
 0x199   :  { %v164_v23 = vmul.f32 %v1331_v21, %v163_v22 }
 0x19b   :  { %v165_v31 = vmul.f32 0.5, %v164_v23 }
 0x19d   :  { %v166_v33 = vsub.f32 1.5, %v165_v31 }
 0x19e   :  { %v1333_v29 = vpop.eup %1332 }
 0x19f   :  { %v173_v32 = vmul.f32 %v1333_v29, %v161_v20  ;;  %v167_v40 = vmul.f32 %v1331_v21, %v166_v33  ;;  %vm179_vm15 = vweird.f32 %v1333_v29 }
 0x1a0   :  { %vm180_vm3 = vmor %vm178_vm2, %vm179_vm15 }
 0x1a1   :  { %v174_v35 = vmul.f32 %v1333_v29, %v173_v32  ;;  %v171_v42 = vsel %vm170_vm12, %v1331_v21, %v167_v40 }
 0x1a2   :  { %v182_v48 = vmul.f32 %v171_v42, %v148_v34 }
 0x1a3   :  { %v175_v44 = vmul.f32 0.5, %v174_v35 }
 0x1a4   :  { %v187_v37 = vmul.f32 %v1311_v49, %v182_v48 }
 0x1a5   :  { %v176_v46 = vsub.f32 1.5, %v175_v44 }
 0x1a6   :  { %v1655_v63 = vadd.f32 %v1312_v56, %v187_v37 }
 0x1a7   :  { %v177_v25 = vmul.f32 %v1333_v29, %v176_v46 }
 0x1a9   :  { %v181_v60 = vsel %vm180_vm3, %v1333_v29, %v177_v25 }
 0x1aa   :  { %v183_v2 = vmul.f32 %v181_v60, %v1626_v1 }
 0x1ac   :  { %v188_v6 = vmul.f32 %v1311_v49, %v183_v2  ;;  %v1315_v49 = vld [vmem:[%s1892_s12] ss:$0 sm:$0xff] }
 0x1ae   :  { %v1664_v9 = vadd.f32 %v1312_v56, %v188_v6 }
 0x1c8   :  { %v374_v26 = vpop.xlane.xlu0 %373 }
 0x1c9   :  { %v378_v28 = vmul.f32 %v374_v26, %v1619_v58 }
 0x1cb   :  { %v380_v30 = vadd.f32 1e-05, %v378_v28  ;;  %v1280_v28 = vld [vmem:[%s1894_s14 + $0x8] sm:$0xff] }
 0x1cc   :  { %502 = vmatpush.bf16.msra.mxu3 %v1280_v28  ;;  %v1284_v28 = vld [vmem:[%s1896_s16 + $0x18] sm:$0xff] }
 0x1cd   :  { %1334 = vrsqrt.f32 %v380_v30  ;;  %vm388_vm14 = vweird.f32 %v380_v30 }
 0x1d0   :  { %v377_v36 = vpop.xlane.xlu1 %376 }
 0x1d1   :  { %v379_v38 = vmul.f32 %v377_v36, %v1619_v58 }
 0x1d3   :  { %v1335_v39 = vpop.eup %1334  ;;  %v381_v43 = vadd.f32 1e-05, %v379_v38 }
 0x1d4   :  { %v383_v41 = vmul.f32 %v1335_v39, %v380_v30  ;;  %vm389_vm13 = vweird.f32 %v1335_v39  ;;  %v1279_v30 = vld [vmem:[%s1894_s14] sm:$0xff] }
 0x1d5   :  { %1336 = vrsqrt.f32 %v381_v43  ;;  %vm390_vm1 = vmor %vm388_vm14, %vm389_vm13  ;;  %vm398_vm5 = vweird.f32 %v381_v43  ;;  %503 = vmatpush.bf16.msra.mxu3 %v1279_v30 }
 0x1d6   :  { %v384_v27 = vmul.f32 %v1335_v39, %v383_v41 }
 0x1d8   :  { %v385_v45 = vmul.f32 0.5, %v384_v27 }
 0x1da   :  { %v386_v47 = vsub.f32 1.5, %v385_v45 }
 0x1db   :  { %v1337_v50 = vpop.eup %1336 }
 0x1dc   :  { %v387_v51 = vmul.f32 %v1335_v39, %v386_v47  ;;  %v393_v52 = vmul.f32 %v1337_v50, %v381_v43  ;;  %vm399_vm4 = vweird.f32 %v1337_v50 }
 0x1dd   :  { %vm400_vm6 = vmor %vm398_vm5, %vm399_vm4 }
 0x1de   :  { %v391_v54 = vsel %vm390_vm1, %v1335_v39, %v387_v51  ;;  %v394_v55 = vmul.f32 %v1337_v50, %v393_v52 }
 0x1df   :  { %v402_v57 = vmul.f32 %v391_v54, %v368_v17 }
 0x1e0   :  { %v395_v34 = vmul.f32 0.5, %v394_v55 }
 0x1e1   :  { %v407_v61 = vmul.f32 %v1313_v53, %v402_v57  ;;  %v1317_v57 = vld [vmem:[%s1895_s15] ss:$0 sm:$0xff] }
 0x1e2   :  { %v396_v62 = vsub.f32 1.5, %v395_v34  ;;  %v1288_v34 = vld [vmem:[%s1896_s16 + $0x38] sm:$0xff] }
 0x1e3   :  { %v1657_v0 = vadd.f32 %v1314_v59, %v407_v61  ;;  %v1296_v61 = vld [vmem:[%s1898_s18 + $0x38] sm:$0xff]  ;;  %667 = vmatpush.bf16.msrb.mxu0 %v1288_v34 }
 0x1e4   :  { %v397_v3 = vmul.f32 %v1337_v50, %v396_v62  ;;  %749 = vmatpush.bf16.msrb.mxu1 %v1296_v61 }
 0x1e5   :  { %v414_v4 = vadd.f32 %v1657_v0, %v1655_v63 }
 0x1e6   :  { %v401_v5 = vsel %vm400_vm6, %v1337_v50, %v397_v3  ;;  %v1287_v3 = vld [vmem:[%s1896_s16 + $0x30] sm:$0xff] }
 0x1e7   :  { %v418_v17 = vsel %vm113_vm0, %v414_v4, 0.0  ;;  %v403_v7 = vmul.f32 %v401_v5, %v1634_v12  ;;  %668 = vmatpush.bf16.msrb.mxu0 %v1287_v3 }
 0x1e8   :  { %419 = vadd.xlane.f32.xlu2 %v418_v17 }
 0x1e9   :  { %v408_v8 = vmul.f32 %v1313_v53, %v403_v7  ;;  %v1316_v53 = vld [vmem:[%s1893_s13] ss:$0 sm:$0xff] }
 0x1eb   :  { %v1666_v24 = vadd.f32 %v1314_v59, %v408_v8 }
 0x1ed   :  { %v415_v1 = vadd.f32 %v1666_v24, %v1664_v9 }
 0x1ef   :  { %v421_v13 = vsel %vm113_vm0, %v415_v1, 0.0 }
 0x1f0   :  { %422 = vadd.xlane.f32.xlu0 %v421_v13  ;;  %v1294_v13 = vld [vmem:[%s1898_s18 + $0x28] sm:$0xff] }
 0x25b   :  { %v420_v14 = vpop.xlane.xlu2 %419 }
 0x25c   :  { %v424_v15 = vmul.f32 %v420_v14, %v1619_v58 }
 0x25e   :  { %v426_v16 = vsub.f32 %v414_v4, %v424_v15  ;;  %v1295_v4 = vld [vmem:[%s1898_s18 + $0x30] sm:$0xff] }
 0x25f   :  { %750 = vmatpush.bf16.msrb.mxu1 %v1295_v4 }
 0x260   :  { %v428_v18 = vmul.f32 %v426_v16, %v426_v16 }
 0x262   :  { %v430_v19 = vsel %vm113_vm0, %v428_v18, 0.0 }
 0x263   :  { %431 = vadd.xlane.f32.xlu1 %v430_v19  ;;  %v423_v12 = vpop.xlane.xlu0 %422  ;;  %751 = vmatpush.bf16.msrb.mxu1 %v1294_v13  ;;  %v1285_v19 = vld [vmem:[%s1896_s16 + $0x20] sm:$0xff] }
 0x264   :  { %v425_v20 = vmul.f32 %v423_v12, %v1619_v58  ;;  %v1293_v12 = vld [vmem:[%s1898_s18 + $0x20] sm:$0xff] }
 0x266   :  { %v427_v21 = vsub.f32 %v415_v1, %v425_v20  ;;  %v1286_v1 = vld [vmem:[%s1896_s16 + $0x28] sm:$0xff] }
 0x267   :  { %669 = vmatpush.bf16.msrb.mxu0 %v1286_v1  ;;  %752 = vmatpush.bf16.msrb.mxu1 %v1293_v12 }
 0x268   :  { %v429_v22 = vmul.f32 %v427_v21, %v427_v21 }
 0x26a   :  { %v433_v23 = vsel %vm113_vm0, %v429_v22, 0.0 }
 0x26b   :  { %434 = vadd.xlane.f32.xlu2 %v433_v23  ;;  %670 = vmatpush.bf16.msrb.mxu0 %v1285_v19 }
 0x26f   :  { %671 = vmatpush.bf16.msrb.mxu0 %v1284_v28 }
 0x2d6   :  { %v432_v26 = vpop.xlane.xlu1 %431 }
 0x2d7   :  { %v436_v29 = vmul.f32 %v432_v26, %v1619_v58 }
 0x2d9   :  { %v438_v31 = vadd.f32 1e-05, %v436_v29  ;;  %v1292_v29 = vld [vmem:[%s1898_s18 + $0x18] sm:$0xff] }
 0x2da   :  { %753 = vmatpush.bf16.msrb.mxu1 %v1292_v29 }
 0x2db   :  { %1338 = vrsqrt.f32 %v438_v31  ;;  %vm446_vm8 = vweird.f32 %v438_v31 }
 0x2de   :  { %v435_v32 = vpop.xlane.xlu2 %434 }
 0x2df   :  { %v437_v33 = vmul.f32 %v435_v32, %v1619_v58 }
 0x2e1   :  { %v1339_v35 = vpop.eup %1338  ;;  %v439_v38 = vadd.f32 1e-05, %v437_v33 }
 0x2e2   :  { %v441_v36 = vmul.f32 %v1339_v35, %v438_v31  ;;  %vm447_vm7 = vweird.f32 %v1339_v35 }
 0x2e3   :  { %1340 = vrsqrt.f32 %v439_v38  ;;  %vm448_vm9 = vmor %vm446_vm8, %vm447_vm7  ;;  %vm456_vm11 = vweird.f32 %v439_v38 }
 0x2e4   :  { %v442_v39 = vmul.f32 %v1339_v35, %v441_v36 }
 0x2e6   :  { %v443_v40 = vmul.f32 0.5, %v442_v39  ;;  %v1283_v39 = vld [vmem:[%s1896_s16 + $0x10] sm:$0xff] }
 0x2e7   :  { %672 = vmatpush.bf16.msrb.mxu0 %v1283_v39 }
 0x2e8   :  { %v444_v41 = vsub.f32 1.5, %v443_v40  ;;  %v1291_v40 = vld [vmem:[%s1898_s18 + $0x10] sm:$0xff] }
 0x2e9   :  { %v1341_v43 = vpop.eup %1340  ;;  %754 = vmatpush.bf16.msrb.mxu1 %v1291_v40 }
 0x2ea   :  { %v445_v44 = vmul.f32 %v1339_v35, %v444_v41  ;;  %v451_v27 = vmul.f32 %v1341_v43, %v439_v38  ;;  %vm457_vm10 = vweird.f32 %v1341_v43 }
 0x2eb   :  { %vm458_vm12 = vmor %vm456_vm11, %vm457_vm10 }
 0x2ec   :  { %v452_v42 = vmul.f32 %v1341_v43, %v451_v27  ;;  %v449_v45 = vsel %vm448_vm9, %v1339_v35, %v445_v44 }
 0x2ed   :  { %v460_v48 = vmul.f32 %v449_v45, %v426_v16 }
 0x2ee   :  { %v453_v46 = vmul.f32 0.5, %v452_v42 }
 0x2ef   :  { %v465_v52 = vmul.f32 %v1315_v49, %v460_v48  ;;  %v1290_v48 = vld [vmem:[%s1898_s18 + $0x8] sm:$0xff] }
 0x2f0   :  { %v454_v47 = vsub.f32 1.5, %v453_v46  ;;  %755 = vmatpush.bf16.msrb.mxu1 %v1290_v48  ;;  %v1319_v48 = vld [vmem:[%s1899_s19] ss:$0 sm:$0xff]  ;;  %s1399_s19 = smov 8  }
 0x2f1   :  { %v470_v55 = vadd.f32 %v1316_v53, %v465_v52 }
 0x2f2   :  { %v455_v50 = vmul.f32 %v1341_v43, %v454_v47  ;;  %v1282_v47 = vld [vmem:[%s1896_s16 + $0x8] sm:$0xff] }
 0x2f3   :  { %673 = vmatpush.bf16.msrb.mxu0 %v1282_v47 }
 0x2f4   :  { %v459_v51 = vsel %vm458_vm12, %v1341_v43, %v455_v50 }
 0x2f5   :  { %v461_v25 = vmul.f32 %v459_v51, %v427_v21 }
 0x2f7   :  { %v466_v54 = vmul.f32 %v1315_v49, %v461_v25 }
 0x2f9   :  { %v471_v37 = vadd.f32 %v1316_v53, %v466_v54  ;;  %v1281_v53 = vld [vmem:[%s1896_s16] sm:$0xff] }
 0x2fa   :  { %v1289_v54 = vld [vmem:[%s1898_s18] sm:$0xff]  ;;  %674 = vmatpush.bf16.msrb.mxu0 %v1281_v53 }
 0x2fb   :  { %v472_v56 = vpack.c.bf16 %v471_v37, %v470_v55  ;;  %756 = vmatpush.bf16.msrb.mxu1 %v1289_v54 }
 0x2fd   :  { %1169 = vmatmul.msk.bf16.vlgmr.msra.gmra.mxu3 %vm113_vm0, %v472_v56 }
 0x380   :  { %v505_v59 = vpop.f32.mrf.mxu3 }
 0x381   :  { %v1693_v60 = vadd.f32 %v1317_v57, %v505_v59 }
 0x383   :  { %v1702_v62 = vmul.f32 0.70710677, %v1693_v60 }
 0x385   :  { %v514_v2 = vmul.f32 %v1702_v62, %v1702_v62 }
 0x387   :  { %v1712_v5 = vmin.f32 %v514_v2, 16.0 }
 0x388   :  { %v507_v17 = vpop.f32.mrf.mxu3 }
 0x389   :  { %v516_v6 = vmul.f32 2.1237322e-06, %v1712_v5  ;;  %v527_v7 = vmul.f32 3.8918573e-05, %v1712_v5  ;;  %v1716_v8 = vadd.f32 %v1317_v57, %v507_v17 }
 0x38b   :  { %v517_v14 = vadd.f32 0.00028619796, %v516_v6  ;;  %v528_v15 = vadd.f32 0.001143296, %v527_v7  ;;  %v1725_v16 = vmul.f32 0.70710677, %v1716_v8 }
 0x38d   :  { %v529_v18 = vmul.f32 %v528_v15, %v1712_v5  ;;  %v554_v20 = vmul.f32 %v1725_v16, %v1725_v16  ;;  %v518_v21 = vmul.f32 %v517_v14, %v1712_v5 }
 0x38f   :  { %v530_v22 = vadd.f32 0.014752088, %v529_v18  ;;  %v1737_v23 = vmin.f32 %v554_v20, 16.0  ;;  %v519_v32 = vadd.f32 0.0036580483, %v518_v21 }
 0x391   :  { %v531_v26 = vmul.f32 %v530_v22, %v1712_v5  ;;  %v556_v30 = vmul.f32 2.1237322e-06, %v1737_v23  ;;  %v567_v31 = vmul.f32 3.8918573e-05, %v1737_v23  ;;  %v520_v44 = vmul.f32 %v519_v32, %v1712_v5 }
 0x393   :  { %v532_v33 = vadd.f32 0.112945676, %v531_v26  ;;  %v557_v35 = vadd.f32 0.00028619796, %v556_v30  ;;  %v568_v36 = vadd.f32 0.001143296, %v567_v31 }
 0x394   :  { %v521_v50 = vadd.f32 0.05243302, %v520_v44  ;;  %v510_v44 = vmul.f32 0.5, %v1693_v60 }
 0x395   :  { %v533_v38 = vmul.f32 %v532_v33, %v1712_v5  ;;  %v558_v41 = vmul.f32 %v557_v35, %v1737_v23  ;;  %v569_v43 = vmul.f32 %v568_v36, %v1737_v23 }
 0x396   :  { %v522_v37 = vmul.f32 %v521_v50, %v1712_v5 }
 0x397   :  { %v534_v27 = vadd.f32 0.4994258, %v533_v38  ;;  %v559_v42 = vadd.f32 0.0036580483, %v558_v41  ;;  %v570_v45 = vadd.f32 0.014752088, %v569_v43 }
 0x398   :  { %v523_v61 = vadd.f32 0.18741608, %v522_v37 }
 0x399   :  { %v535_v46 = vmul.f32 %v534_v27, %v1712_v5  ;;  %v571_v49 = vmul.f32 %v570_v45, %v1737_v23  ;;  %v560_v25 = vmul.f32 %v559_v42, %v1737_v23  ;;  %v511_v27 = vmul.f32 0.5, %v1716_v8 }
 0x39a   :  { %v524_v6 = vmul.f32 %v523_v61, %v1712_v5 }
 0x39b   :  { %v536_v51 = vadd.f32 1.0, %v535_v46  ;;  %v572_v52 = vadd.f32 0.112945676, %v571_v49  ;;  %v561_v56 = vadd.f32 0.05243302, %v560_v25 }
 0x39c   :  { %v525_v18 = vadd.f32 1.1283791, %v524_v6 }
 0x39d   :  { %1342 = vrcp.f32 %v536_v51  ;;  %v573_v55 = vmul.f32 %v572_v52, %v1737_v23  ;;  %v562_v3 = vmul.f32 %v561_v56, %v1737_v23  ;;  %v548_v1 = vand.u32 2147483648, %v536_v51 }
 0x39e   :  { %v546_v14 = vand.u32 2147483647, %v536_v51  ;;  %vm542_vm14 = vweird.f32 %v536_v51  ;;  %v526_v28 = vmul.f32 %v525_v18, %v1702_v62 }
 0x39f   :  { %v574_v57 = vadd.f32 0.4994258, %v573_v55  ;;  %v563_v13 = vadd.f32 0.18741608, %v562_v3  ;;  %v549_v20 = vor.u32 1.1754944e-38, %v548_v1 }
 0x3a0   :  { %vm547_vm1 = vcmp.eq.f32.partialorder %v546_v14, 8.507059e+37 }
 0x3a1   :  { %v575_v59 = vmul.f32 %v574_v57, %v1737_v23  ;;  %v564_v21 = vmul.f32 %v563_v13, %v1737_v23 }
 0x3a3   :  { %v1343_v34 = vpop.eup %1342  ;;  %v576_v4 = vadd.f32 1.0, %v575_v59  ;;  %v565_v29 = vadd.f32 1.1283791, %v564_v21 }
 0x3a4   :  { %v538_v2 = vmul.f32 %v1343_v34, %v536_v51  ;;  %vm543_vm13 = vweird.f32 %v1343_v34 }
 0x3a5   :  { %1344 = vrcp.f32 %v576_v4  ;;  %vm544_vm15 = vmor %vm542_vm14, %vm543_vm13  ;;  %v588_v30 = vand.u32 2147483648, %v576_v4  ;;  %v586_v33 = vand.u32 2147483647, %v576_v4  ;;  %vm582_vm3 = vweird.f32 %v576_v4 }
 0x3a6   :  { %v539_v17 = vsub.f32 1.0, %v538_v2  ;;  %v566_v39 = vmul.f32 %v565_v29, %v1725_v16  ;;  %v1318_v16 = vld [vmem:[%s1897_s17] ss:$0 sm:$0xff]  ;;  %s1120_s17 = sshll.u32 %s1907_s27, 4  ;;  %s1121_s17 = int_to_ptr.hbm [resolvable:$true] %s1120_s17 }
 0x3a7   :  { %v589_v36 = vor.u32 1.1754944e-38, %v588_v30  ;;  %vm587_vm5 = vcmp.eq.f32.partialorder %v586_v33, 8.507059e+37 }
 0x3a8   :  { %v540_v7 = vmul.f32 %v1343_v34, %v539_v17 }
 0x3aa   :  { %v541_v15 = vadd.f32 %v1343_v34, %v540_v7 }
 0x3ab   :  { %v1345_v19 = vpop.eup %1344 }
 0x3ac   :  { %v545_v12 = vsel %vm544_vm15, %v1343_v34, %v541_v15  ;;  %v578_v22 = vmul.f32 %v1345_v19, %v576_v4  ;;  %vm583_vm2 = vweird.f32 %v1345_v19 }
 0x3ad   :  { %v550_v26 = vsel %vm547_vm1, %v549_v20, %v545_v12  ;;  %vm584_vm4 = vmor %vm582_vm3, %vm583_vm2 }
 0x3ae   :  { %v579_v5 = vsub.f32 1.0, %v578_v22  ;;  %v551_v31 = vmul.f32 %v550_v26, %v526_v28 }
 0x3b0   :  { %v580_v32 = vmul.f32 %v1345_v19, %v579_v5  ;;  %v1170_v38 = vclamps-f32 %v551_v31, 1.0 }
 0x3b2   :  { %v581_v35 = vadd.f32 %v1345_v19, %v580_v32  ;;  %v594_v43 = vadd.f32 1.0, %v1170_v38 }
 0x3b4   :  { %v585_v23 = vsel %vm584_vm4, %v1345_v19, %v581_v35  ;;  %v596_v45 = vmul.f32 %v594_v43, %v510_v44  ;;  %v1299_v43 = vld [vmem:[%s1903_s23] sm:$0xff] }
 0x3b5   :  { %v590_v40 = vsel %vm587_vm5, %v589_v36, %v585_v23  ;;  %vm1036_vm5 = vcmask 523264  }
 0x3b6   :  { %v591_v41 = vmul.f32 %v590_v40, %v566_v39  ;;  %v1298_v40 = vld [vmem:[%s1902_s22 + $0x8] sm:$0xff] }
 0x3b7   :  { %875 = vmatpush.bf16.msrb.mxu2 %v1298_v40 }
 0x3b8   :  { %v1171_v62 = vclamps-f32 %v591_v41, 1.0 }
 0x3ba   :  { %v595_v42 = vadd.f32 1.0, %v1171_v62  ;;  %v1297_v62 = vld [vmem:[%s1902_s22] sm:$0xff] }
 0x3bb   :  { %876 = vmatpush.bf16.msrb.mxu2 %v1297_v62 }
 0x3bc   :  { %v597_v46 = vmul.f32 %v595_v42, %v511_v27 }
 0x3be   :  { %v598_v47 = vpack.c.bf16 %v597_v46, %v596_v45 }
 0x3c0   :  { %675 = vmatmul.bf16.vlgmr.msrb.gmra.mxu0 %v598_v47  ;;  %757 = vmatmul.bf16.vlgmr.msrb.gmra.mxu1 %v598_v47 }
 0x43d   :  { %v676_v49 = vpop.f32.mrf.mxu0  ;;  %v758_v50 = vpop.f32.mrf.mxu1 }
 0x43e   :  { %v677_v51 = vadd.f32 %v1318_v16, %v676_v49  ;;  %v759_v60 = vadd.f32 %v1319_v48, %v758_v50 }
 0x440   :  { %v763_v25 = vmax.f32 %v677_v51, %v759_v60 }
 0x442   :  { %v765_v8 = vsub.f32 %v677_v51, %v763_v25  ;;  %v771_v52 = vsub.f32 %v759_v60, %v763_v25 }
 0x444   :  { %v767_v53 = vmul.f32 1.442695, %v765_v8  ;;  %v773_v54 = vmul.f32 1.442695, %v771_v52 }
 0x445   :  { %v678_v55 = vpop.f32.mrf.mxu0  ;;  %v760_v37 = vpop.f32.mrf.mxu1 }
 0x446   :  { %1346 = vpow2.f32 %v767_v53  ;;  %v679_v56 = vadd.f32 %v1318_v16, %v678_v55  ;;  %v761_v57 = vadd.f32 %v1319_v48, %v760_v37  ;;  %v1320_v37 = vld [vmem:[%s1900_s20] ss:$0 sm:$0xff] }
 0x447   :  { %1348 = vpow2.f32 %v773_v54 }
 0x448   :  { %v764_v59 = vmax.f32 %v679_v56, %v761_v57 }
 0x44a   :  { %v766_v34 = vsub.f32 %v679_v56, %v764_v59  ;;  %v772_v61 = vsub.f32 %v761_v57, %v764_v59 }
 0x44c   :  { %v1347_v2 = vpop.eup %1346  ;;  %v769_v3 = vmul.f32 1.442695, %v766_v34  ;;  %v775_v4 = vmul.f32 1.442695, %v772_v61  ;;  %v1321_v61 = vld [vmem:[%s1939_s29] ss:$0 sm:$0xff] }
 0x44d   :  { %v1349_v17 = vpop.eup %1348 }
 0x44e   :  { %v777_v6 = vadd.f32 %v1349_v17, %v1347_v2  ;;  %1350 = vpow2.f32 %v769_v3 }
 0x44f   :  { %1352 = vpow2.f32 %v775_v4 }
 0x450   :  { %1354 = vrcp.f32 %v777_v6 }
 0x454   :  { %v1351_v7 = vpop.eup %1350 }
 0x455   :  { %v1353_v1 = vpop.eup %1352 }
 0x456   :  { %v1355_v13 = vpop.eup %1354  ;;  %v778_v14 = vadd.f32 %v1353_v1, %v1351_v7 }
 0x457   :  { %v781_v15 = vmul.f32 %v1355_v13, %v1347_v2  ;;  %v787_v18 = vmul.f32 %v1355_v13, %v1349_v17 }
 0x458   :  { %1356 = vrcp.f32 %v778_v14 }
 0x459   :  { %v783_v19 = vmul.f32 %v781_v15, %v1655_v63  ;;  %v789_v20 = vmul.f32 %v787_v18, %v1657_v0 }
 0x45b   :  { %v785_v12 = vadd.f32 %v783_v19, %v1573_v10 }
 0x45d   :  { %v791_v21 = vadd.f32 %v789_v20, %v785_v12 }
 0x45e   :  { %v1357_v22 = vpop.eup %1356 }
 0x45f   :  { %v795_v26 = vsel %vm113_vm0, %v791_v21, 0.0  ;;  %v782_v28 = vmul.f32 %v1357_v22, %v1351_v7  ;;  %v788_v5 = vmul.f32 %v1357_v22, %v1353_v1 }
 0x460   :  { %796 = vadd.xlane.f32.xlu0 %v795_v26 }
 0x461   :  { %v784_v29 = vmul.f32 %v782_v28, %v1664_v9  ;;  %v790_v31 = vmul.f32 %v788_v5, %v1666_v24  ;;  %v1300_v24 = vld [vmem:[%s1903_s23 + $0x8] sm:$0xff] }
 0x462   :  { %905 = vmatpush.bf16.msrb.mxu3 %v1300_v24 }
 0x463   :  { %v786_v30 = vadd.f32 %v784_v29, %v1578_v11 }
 0x465   :  { %v792_v32 = vadd.f32 %v790_v31, %v786_v30 }
 0x466   :  { %906 = vmatpush.bf16.msrb.mxu3 %v1299_v43 }
 0x467   :  { %v798_v63 = vsel %vm113_vm0, %v792_v32, 0.0 }
 0x468   :  { %799 = vadd.xlane.f32.xlu1 %v798_v63 }
 0x4d3   :  { %v797_v10 = vpop.xlane.xlu0 %796 }
 0x4d4   :  { %v801_v0 = vmul.f32 %v797_v10, %v1619_v58  ;;  %v1304_v10 = vld [vmem:[%s1904_s24 + $0x18] sm:$0xff] }
 0x4d5   :  { %1044 = vmatpush.bf16.msra.mxu2 %v1304_v10 }
 0x4d6   :  { %v803_v33 = vsub.f32 %v791_v21, %v801_v0 }
 0x4d8   :  { %v805_v35 = vmul.f32 %v803_v33, %v803_v33 }
 0x4da   :  { %v807_v36 = vsel %vm113_vm0, %v805_v35, 0.0 }
 0x4db   :  { %v800_v38 = vpop.xlane.xlu1 %799  ;;  %808 = vadd.xlane.f32.xlu2 %v807_v36 }
 0x4dc   :  { %v802_v39 = vmul.f32 %v800_v38, %v1619_v58 }
 0x4de   :  { %v804_v9 = vsub.f32 %v792_v32, %v802_v39 }
 0x4e0   :  { %v806_v23 = vmul.f32 %v804_v9, %v804_v9 }
 0x4e2   :  { %v810_v11 = vsel %vm113_vm0, %v806_v23, 0.0  ;;  %v1303_v23 = vld [vmem:[%s1904_s24 + $0x10] sm:$0xff] }
 0x4e3   :  { %811 = vadd.xlane.f32.xlu0 %v810_v11  ;;  %1045 = vmatpush.bf16.msra.mxu2 %v1303_v23 }
 0x54e   :  { %v809_v41 = vpop.xlane.xlu2 %808 }
 0x54f   :  { %v813_v44 = vmul.f32 %v809_v41, %v1619_v58 }
 0x551   :  { %v815_v27 = vadd.f32 1e-05, %v813_v44  ;;  %v1302_v44 = vld [vmem:[%s1904_s24 + $0x8] sm:$0xff] }
 0x552   :  { %1046 = vmatpush.bf16.msra.mxu2 %v1302_v44 }
 0x553   :  { %1358 = vrsqrt.f32 %v815_v27  ;;  %vm823_vm7 = vweird.f32 %v815_v27 }
 0x556   :  { %v812_v42 = vpop.xlane.xlu0 %811 }
 0x557   :  { %v814_v45 = vmul.f32 %v812_v42, %v1619_v58 }
 0x559   :  { %v1359_v46 = vpop.eup %1358  ;;  %v816_v47 = vadd.f32 1e-05, %v814_v45 }
 0x55a   :  { %v818_v16 = vmul.f32 %v1359_v46, %v815_v27  ;;  %vm824_vm6 = vweird.f32 %v1359_v46 }
 0x55b   :  { %1360 = vrsqrt.f32 %v816_v47  ;;  %vm825_vm8 = vmor %vm823_vm7, %vm824_vm6  ;;  %vm833_vm10 = vweird.f32 %v816_v47 }
 0x55c   :  { %v819_v48 = vmul.f32 %v1359_v46, %v818_v16 }
 0x55e   :  { %v820_v49 = vmul.f32 0.5, %v819_v48 }
 0x560   :  { %v821_v50 = vsub.f32 1.5, %v820_v49 }
 0x561   :  { %v1361_v51 = vpop.eup %1360 }
 0x562   :  { %v822_v60 = vmul.f32 %v1359_v46, %v821_v50  ;;  %v828_v25 = vmul.f32 %v1361_v51, %v816_v47  ;;  %vm834_vm9 = vweird.f32 %v1361_v51  ;;  %v1301_v47 = vld [vmem:[%s1904_s24] sm:$0xff] }
 0x563   :  { %vm835_vm11 = vmor %vm833_vm10, %vm834_vm9  ;;  %1047 = vmatpush.bf16.msra.mxu2 %v1301_v47 }
 0x564   :  { %v829_v8 = vmul.f32 %v1361_v51, %v828_v25  ;;  %v826_v52 = vsel %vm825_vm8, %v1359_v46, %v822_v60 }
 0x565   :  { %v837_v55 = vmul.f32 %v826_v52, %v803_v33 }
 0x566   :  { %v830_v53 = vmul.f32 0.5, %v829_v8 }
 0x567   :  { %v842_v34 = vmul.f32 %v1320_v37, %v837_v55 }
 0x568   :  { %v831_v54 = vsub.f32 1.5, %v830_v53 }
 0x569   :  { %v1821_v3 = vadd.f32 %v1321_v61, %v842_v34 }
 0x56a   :  { %v832_v56 = vmul.f32 %v1361_v51, %v831_v54 }
 0x56c   :  { %v836_v57 = vsel %vm835_vm11, %v1361_v51, %v832_v56 }
 0x56d   :  { %v838_v59 = vmul.f32 %v836_v57, %v804_v9 }
 0x56f   :  { %v843_v2 = vmul.f32 %v1320_v37, %v838_v59 }
 0x571   :  { %v1823_v4 = vadd.f32 %v1321_v61, %v843_v2 }
 0x573   :  { %v849_v17 = vpack.c.bf16 %v1823_v4, %v1821_v3 }
 0x575   :  { %1244 = vmatmul.msk.bf16.vlgmr.msrb.gmra.mxu2 %vm113_vm0, %v849_v17  ;;  %1253 = vmatmul.msk.bf16.vlgmr.msrb.gmra.mxu3 %vm113_vm0, %v849_v17 }
 0x5f8   :  { %v1829_v6 = vpop.f32.mrf.mxu3 }
 0x5f9   :  { %v1832_v7 = vmul.f32 0.70710677, %v1829_v6 }
 0x5fb   :  { %v917_v1 = vmul.f32 %v1832_v7, %v1832_v7 }
 0x5fd   :  { %v918_v13 = vmin.f32 %v917_v1, 16.0 }
 0x5ff   :  { %v919_v14 = vmul.f32 2.1237322e-06, %v918_v13  ;;  %v930_v15 = vmul.f32 3.8918573e-05, %v918_v13 }
 0x600   :  { %v1836_v18 = vpop.f32.mrf.mxu3 }
 0x601   :  { %v920_v19 = vadd.f32 0.00028619796, %v919_v14  ;;  %v931_v12 = vadd.f32 0.001143296, %v930_v15  ;;  %v1839_v20 = vmul.f32 0.70710677, %v1836_v18 }
 0x603   :  { %v921_v21 = vmul.f32 %v920_v19, %v918_v13  ;;  %v932_v22 = vmul.f32 %v931_v12, %v918_v13  ;;  %v957_v26 = vmul.f32 %v1839_v20, %v1839_v20 }
 0x605   :  { %v933_v28 = vadd.f32 0.014752088, %v932_v22  ;;  %v958_v5 = vmin.f32 %v957_v26, 16.0  ;;  %v922_v29 = vadd.f32 0.0036580483, %v921_v21 }
 0x607   :  { %v934_v30 = vmul.f32 %v933_v28, %v918_v13  ;;  %v959_v31 = vmul.f32 2.1237322e-06, %v958_v5  ;;  %v970_v32 = vmul.f32 3.8918573e-05, %v958_v5  ;;  %v923_v35 = vmul.f32 %v922_v29, %v918_v13 }
 0x609   :  { %v935_v63 = vadd.f32 0.112945676, %v934_v30  ;;  %v960_v0 = vadd.f32 0.00028619796, %v959_v31  ;;  %v971_v33 = vadd.f32 0.001143296, %v970_v32  ;;  %v878_v30 = vpop.f32.mrf.mxu2 }
 0x60a   :  { %v924_v24 = vadd.f32 0.05243302, %v923_v35 }
 0x60b   :  { %v936_v36 = vmul.f32 %v935_v63, %v918_v13  ;;  %v961_v38 = vmul.f32 %v960_v0, %v958_v5  ;;  %v972_v39 = vmul.f32 %v971_v33, %v958_v5  ;;  %v913_v0 = vmul.f32 0.5, %v1829_v6 }
 0x60c   :  { %v925_v42 = vmul.f32 %v924_v24, %v918_v13 }
 0x60d   :  { %v937_v9 = vadd.f32 0.4994258, %v936_v36  ;;  %v973_v11 = vadd.f32 0.014752088, %v972_v39  ;;  %v962_v41 = vadd.f32 0.0036580483, %v961_v38 }
 0x60e   :  { %v926_v48 = vadd.f32 0.18741608, %v925_v42  ;;  %v914_v36 = vmul.f32 0.5, %v1836_v18 }
 0x60f   :  { %v938_v40 = vmul.f32 %v937_v9, %v918_v13  ;;  %v974_v43 = vmul.f32 %v973_v11, %v958_v5  ;;  %v963_v45 = vmul.f32 %v962_v41, %v958_v5 }
 0x610   :  { %v927_v8 = vmul.f32 %v926_v48, %v918_v13 }
 0x611   :  { %v939_v62 = vadd.f32 1.0, %v938_v40  ;;  %v975_v27 = vadd.f32 0.112945676, %v974_v43  ;;  %v964_v49 = vadd.f32 0.05243302, %v963_v45  ;;  %v880_v9 = vpop.f32.mrf.mxu2 }
 0x612   :  { %v928_v56 = vadd.f32 1.1283791, %v927_v8 }
 0x613   :  { %1362 = vrcp.f32 %v939_v62  ;;  %v976_v46 = vmul.f32 %v975_v27, %v958_v5  ;;  %v965_v52 = vmul.f32 %v964_v49, %v958_v5  ;;  %v951_v54 = vand.u32 2147483648, %v939_v62 }
 0x614   :  { %v949_v37 = vand.u32 2147483647, %v939_v62  ;;  %vm945_vm13 = vweird.f32 %v939_v62  ;;  %v929_v17 = vmul.f32 %v928_v56, %v1832_v7 }
 0x615   :  { %v977_v16 = vadd.f32 0.4994258, %v976_v46  ;;  %v966_v57 = vadd.f32 0.18741608, %v965_v52  ;;  %v952_v34 = vor.u32 1.1754944e-38, %v951_v54 }
 0x616   :  { %vm950_vm15 = vcmp.eq.f32.partialorder %v949_v37, 8.507059e+37 }
 0x617   :  { %v978_v50 = vmul.f32 %v977_v16, %v958_v5  ;;  %v967_v13 = vmul.f32 %v966_v57, %v958_v5 }
 0x619   :  { %v1363_v51 = vpop.eup %1362  ;;  %v979_v25 = vadd.f32 1.0, %v978_v50  ;;  %v968_v21 = vadd.f32 1.1283791, %v967_v13 }
 0x61a   :  { %v941_v60 = vmul.f32 %v1363_v51, %v939_v62  ;;  %vm946_vm12 = vweird.f32 %v1363_v51 }
 0x61b   :  { %1364 = vrcp.f32 %v979_v25  ;;  %vm947_vm14 = vmor %vm945_vm13, %vm946_vm12  ;;  %v991_v12 = vand.u32 2147483648, %v979_v25  ;;  %v989_v26 = vand.u32 2147483647, %v979_v25  ;;  %vm985_vm2 = vweird.f32 %v979_v25 }
 0x61c   :  { %v942_v53 = vsub.f32 1.0, %v941_v60  ;;  %v969_v32 = vmul.f32 %v968_v21, %v1839_v20 }
 0x61d   :  { %v992_v31 = vor.u32 1.1754944e-38, %v991_v12  ;;  %vm990_vm4 = vcmp.eq.f32.partialorder %v989_v26, 8.507059e+37 }
 0x61e   :  { %v943_v55 = vmul.f32 %v1363_v51, %v942_v53 }
 0x620   :  { %v944_v59 = vadd.f32 %v1363_v51, %v943_v55 }
 0x621   :  { %v1365_v61 = vpop.eup %1364 }
 0x622   :  { %v948_v2 = vsel %vm947_vm14, %v1363_v51, %v944_v59  ;;  %v981_v14 = vmul.f32 %v1365_v61, %v979_v25  ;;  %vm986_vm1 = vweird.f32 %v1365_v61  ;;  %v1322_v59 = vld [vmem:[%s1905_s25] ss:$0 sm:$0xff]  ;;  %s1397_s25 = smov [#allocation2]  }
 0x623   :  { %v953_v1 = vsel %vm950_vm15, %v952_v34, %v948_v2  ;;  %vm987_vm3 = vmor %vm985_vm2, %vm986_vm1  ;;  %v1323_v2 = vld [vmem:[%s1906_s26] ss:$0 sm:$0xff]  ;;  %s1118_s18 = sshll.u32 %s1397_s25, 4  ;;  %s1398_s26 = smov 128   ;;  %s1119_s18 = int_to_ptr.vmem [resolvable:$true] %s1118_s18 }
 0x624   :  { %v954_v15 = vmul.f32 %v953_v1, %v929_v17  ;;  %v982_v19 = vsub.f32 1.0, %v981_v14 }
 0x626   :  { %v983_v22 = vmul.f32 %v1365_v61, %v982_v19  ;;  %v1254_v28 = vclamps-f32 %v954_v15, 1.0 }
 0x628   :  { %v984_v29 = vadd.f32 %v1365_v61, %v983_v22  ;;  %v997_v5 = vadd.f32 1.0, %v1254_v28 }
 0x62a   :  { %v988_v63 = vsel %vm987_vm3, %v1365_v61, %v984_v29  ;;  %v999_v35 = vmul.f32 %v997_v5, %v913_v0 }
 0x62b   :  { %v993_v7 = vsel %vm990_vm4, %v992_v31, %v988_v63 }
 0x62c   :  { %v994_v10 = vmul.f32 %v993_v7, %v969_v32  ;;  %v1001_v23 = vmul.f32 %v999_v35, %v878_v30 }
 0x62e   :  { %v1255_v33 = vclamps-f32 %v994_v10, 1.0 }
 0x630   :  { %v998_v38 = vadd.f32 1.0, %v1255_v33 }
 0x632   :  { %v1000_v39 = vmul.f32 %v998_v38, %v914_v36 }
 0x634   :  { %v1002_v11 = vmul.f32 %v1000_v39, %v880_v9 }
 0x636   :  { %v1003_v24 = vpack.c.bf16 %v1002_v11, %v1001_v23 }
 0x638   :  { %1272 = vmatmul.msk.bf16.vlgmr.msra.gmra.mxu2 %vm1036_vm5, %v1003_v24 }
 0x6bb   :  { %v1049_v20 = vpop.f32.mrf.mxu2 }
 0x6bc   :  { %v1054_v40 = vadd.f32 %v1049_v20, %v1821_v3 }
 0x6be   :  { %v1058_v41 = vsel %vm113_vm0, %v1054_v40, 0.0 }
 0x6bf   :  { %1059 = vadd.xlane.f32.xlu1 %v1058_v41 }
 0x6c3   :  { %v1051_v43 = vpop.f32.mrf.mxu2 }
 0x6c4   :  { %v1055_v6 = vadd.f32 %v1051_v43, %v1823_v4 }
 0x6c6   :  { %v1061_v62 = vsel %vm113_vm0, %v1055_v6, 0.0 }
 0x6c7   :  { %1062 = vadd.xlane.f32.xlu2 %v1061_v62 }
 0x732   :  { %v1060_v18 = vpop.xlane.xlu1 %1059 }
 0x733   :  { %v1064_v44 = vmul.f32 %v1060_v18, %v1619_v58 }
 0x735   :  { %v1066_v27 = vsub.f32 %v1054_v40, %v1064_v44 }
 0x737   :  { %v1068_v42 = vmul.f32 %v1066_v27, %v1066_v27 }
 0x739   :  { %v1070_v45 = vsel %vm113_vm0, %v1068_v42, 0.0 }
 0x73a   :  { %1071 = vadd.xlane.f32.xlu0 %v1070_v45  ;;  %v1063_v46 = vpop.xlane.xlu2 %1062 }
 0x73b   :  { %v1065_v3 = vmul.f32 %v1063_v46, %v1619_v58 }
 0x73d   :  { %v1067_v47 = vsub.f32 %v1055_v6, %v1065_v3 }
 0x73f   :  { %v1069_v16 = vmul.f32 %v1067_v47, %v1067_v47 }
 0x741   :  { %v1073_v48 = vsel %vm113_vm0, %v1069_v16, 0.0 }
 0x742   :  { %1074 = vadd.xlane.f32.xlu1 %v1073_v48 }
 0x7ad   :  { %v1072_v4 = vpop.xlane.xlu0 %1071 }
 0x7ae   :  { %v1076_v49 = vmul.f32 %v1072_v4, %v1619_v58 }
 0x7b0   :  { %v1078_v50 = vadd.f32 1e-05, %v1076_v49 }
 0x7b2   :  { %1366 = vrsqrt.f32 %v1078_v50  ;;  %vm1086_vm7 = vweird.f32 %v1078_v50 }
 0x7b5   :  { %v1075_v51 = vpop.xlane.xlu1 %1074 }
 0x7b6   :  { %v1077_v60 = vmul.f32 %v1075_v51, %v1619_v58 }
 0x7b8   :  { %v1367_v25 = vpop.eup %1366  ;;  %v1079_v8 = vadd.f32 1e-05, %v1077_v60 }
 0x7b9   :  { %v1081_v52 = vmul.f32 %v1367_v25, %v1078_v50  ;;  %vm1087_vm6 = vweird.f32 %v1367_v25 }
 0x7ba   :  { %1368 = vrsqrt.f32 %v1079_v8  ;;  %vm1088_vm8 = vmor %vm1086_vm7, %vm1087_vm6  ;;  %vm1096_vm10 = vweird.f32 %v1079_v8 }
 0x7bb   :  { %v1082_v53 = vmul.f32 %v1367_v25, %v1081_v52 }
 0x7bd   :  { %v1083_v54 = vmul.f32 0.5, %v1082_v53 }
 0x7bf   :  { %v1084_v55 = vsub.f32 1.5, %v1083_v54 }
 0x7c0   :  { %v1369_v37 = vpop.eup %1368 }
 0x7c1   :  { %v1085_v56 = vmul.f32 %v1367_v25, %v1084_v55  ;;  %v1091_v57 = vmul.f32 %v1369_v37, %v1079_v8  ;;  %vm1097_vm9 = vweird.f32 %v1369_v37 }
 0x7c2   :  { %vm1098_vm11 = vmor %vm1096_vm10, %vm1097_vm9 }
 0x7c3   :  { %v1089_v34 = vsel %vm1088_vm8, %v1367_v25, %v1085_v56  ;;  %v1092_v61 = vmul.f32 %v1369_v37, %v1091_v57 }
 0x7c4   :  { %v1100_v58 = vmul.f32 %v1089_v34, %v1066_v27 }
 0x7c5   :  { %v1093_v17 = vmul.f32 0.5, %v1092_v61 }
 0x7c6   :  { %v1105_v1 = vmul.f32 %v1322_v59, %v1100_v58 }
 0x7c7   :  { %v1094_v13 = vsub.f32 1.5, %v1093_v17 }
 0x7c8   :  { %v1110_v14 = vadd.f32 %v1323_v2, %v1105_v1 }
 0x7c9   :  { %v1095_v15 = vmul.f32 %v1369_v37, %v1094_v13 }
 0x7ca   :  { %1112 = vst.msk [vmem:[#allocation2] sm:$0xff] %vm113_vm0, %v1110_v14 }
 0x7cb   :  { %v1099_v19 = vsel %vm1098_vm11, %v1369_v37, %v1095_v15 }
 0x7cc   :  { %v1101_v12 = vmul.f32 %v1099_v19, %v1067_v47 }
 0x7ce   :  { %v1106_v21 = vmul.f32 %v1322_v59, %v1101_v12 }
 0x7d0   :  { %v1111_v22 = vadd.f32 %v1323_v2, %v1106_v21 }
 0x7d2   :  { %1113 = vst.msk [vmem:[#allocation2 + $0x8] sm:$0xff] %vm113_vm0, %v1111_v22 }
 0x7d3   :  { %1126 = dma.vmem_to_hbm [thread:$0]  %s1119_s18, 256, %s1121_s17, [#allocation3], %s1398_s26, %s1398_s26, %s1399_s19  }
 0x7d4   :  { %1394 = dma.done.wait [#allocation3], 256  }
 0x7d5   :  { %1395 = vsyncadd [#allocation3], 4294967040 }
 0x7d6   :  { %1131 = vsyncpa [#allocation3], 1 }

</bundles_post_ra>
